<compile_context>
chip_gen: v7x
topology: tpu7x:2x2x1
jax: 0.10.0
libtpu: 0.0.40
codegen_flags: <defaults>
</compile_context>

<pallas_src>
import math
import jax
import jax.numpy as jnp
from jax import lax
from jax.experimental import pallas as pl
from jax.experimental.pallas import tpu as pltpu

# ---- model config (defaults of the PyTorch module; small B/S for the test) --
TIME_DIM = 21
MODEL_DIM = 128
N_HEAD = 4
HEAD_DIM = MODEL_DIM // N_HEAD
FFN_DIM = 128          # dim_feedforward = model_dim in the module
NUM_LAYERS = 2
SEQ_LEN_MAX = 25 * 7   # positional encoding length
STATIC_DIM = 30
STATICFC_DIM = 16
SFC_PAD = 128          # lane-dense padding of the static path
HIDDEN_DIM = 128
OUTPUT_SIZE = 6
LN_EPS = 1e-5
PAD_OUT = 128          # lane-dense padded head output width
MAX_ROWS = 2048        # cap on BB*S rows processed per grid step


def _layernorm(x, g, b):
    mu = jnp.mean(x, axis=-1, keepdims=True)
    var = jnp.mean((x - mu) ** 2, axis=-1, keepdims=True)
    return (x - mu) * lax.rsqrt(var + LN_EPS) * g + b


# --------------------------- fused forward kernel ----------------------------
def fused_kernel(x_ref, xs_ref, pos_ref, emb_w_ref, emb_b_ref,
                 wqkv_ref, bqkv_ref, wo_ref, bo_ref, ln_ref,
                 w1_ref, b1_ref, w2_ref, b2_ref,
                 ws1_ref, bs1_ref, ws2_ref, bs2_ref,
                 wf1t_ref, wf1s_ref, bf1_ref, wf2_ref, bf2_ref,
                 wf3_ref, bf3_ref, o_ref):
    BB, S, T = x_ref.shape
    D = MODEL_DIM
    M = BB * S
    scale = 1.0 / math.sqrt(HEAD_DIM)

    # ---- embedding + positional encoding (one flattened (M, T) matmul) ------
    x2 = x_ref[...].reshape(M, T).astype(jnp.bfloat16)
    h = jnp.dot(x2, emb_w_ref[...], preferred_element_type=jnp.float32) + emb_b_ref[...]
    h = (h.reshape(BB, S, D) + pos_ref[...][None, :, :]).reshape(M, D)

    # ---- NUM_LAYERS encoder layers (post-norm, ReLU FFN), unrolled ----------
    for l in range(NUM_LAYERS):
        # fused QKV projection on the flattened rows: (M, D) @ (D, 3D)
        hb = h.astype(jnp.bfloat16)
        qkv = jnp.dot(hb, wqkv_ref[l], preferred_element_type=jnp.float32) + bqkv_ref[l]
        q = qkv[:, 0 * D:1 * D].astype(jnp.bfloat16).reshape(BB, S, D)
        k = qkv[:, 1 * D:2 * D].astype(jnp.bfloat16).reshape(BB, S, D)
        v = qkv[:, 2 * D:3 * D].astype(jnp.bfloat16).reshape(BB, S, D)

        heads = []
        for hd in range(N_HEAD):
            lo = hd * HEAD_DIM
            hi = lo + HEAD_DIM
            qh, kh, vh = q[:, :, lo:hi], k[:, :, lo:hi], v[:, :, lo:hi]
            # per-batch-element scores: (BB, S, S); no mask needed
            s = jnp.einsum('bqd,bkd->bqk', qh, kh,
                           preferred_element_type=jnp.float32) * scale
            s = s - jnp.max(s, axis=-1, keepdims=True)
            p = jnp.exp(s)
            p = p / jnp.sum(p, axis=-1, keepdims=True)     # exact reciprocal
            oh = jnp.einsum('bqk,bkd->bqd', p.astype(jnp.bfloat16), vh,
                            preferred_element_type=jnp.float32)
            heads.append(oh)                                # (BB, S, HEAD_DIM)
        # assemble heads on the lane axis, then a single K=128 output proj
        attn = jnp.concatenate(heads, axis=-1).reshape(M, D).astype(jnp.bfloat16)
        attn = jnp.dot(attn, wo_ref[l], preferred_element_type=jnp.float32) + bo_ref[l]

        ln = ln_ref[l]                      # (4, D): g1, b1, g2, b2
        h = _layernorm(h + attn, ln[0:1], ln[1:2])          # post-norm

        hb = h.astype(jnp.bfloat16)
        ff = jnp.maximum(
            jnp.dot(hb, w1_ref[l], preferred_element_type=jnp.float32) + b1_ref[l],
            0.0)
        ff = jnp.dot(ff.astype(jnp.bfloat16), w2_ref[l],
                     preferred_element_type=jnp.float32) + b2_ref[l]
        h = _layernorm(h + ff, ln[2:3], ln[3:4])

    # ---- head: seq-mean + static MLP (lane-padded) + final MLP --------------
    t = jnp.mean(h.reshape(BB, S, D), axis=1)               # (BB, D)

    xs = xs_ref[...].reshape(BB, STATIC_DIM).astype(jnp.bfloat16)
    s_st = jnp.maximum(
        jnp.dot(xs, ws1_ref[...], preferred_element_type=jnp.float32) + bs1_ref[...],
        0.0)                                                 # (BB, SFC_PAD)
    s_st = jnp.dot(s_st.astype(jnp.bfloat16), ws2_ref[...],
                   preferred_element_type=jnp.float32) + bs2_ref[...]

    # concat([t, s]) @ Wf1 == t @ Wf1[:D] + s @ Wf1[D:]   (s padded with zeros)
    hc = (jnp.dot(t.astype(jnp.bfloat16), wf1t_ref[...],
                  preferred_element_type=jnp.float32)
          + jnp.dot(s_st.astype(jnp.bfloat16), wf1s_ref[...],
                    preferred_element_type=jnp.float32)
          + bf1_ref[...])
    hc = jnp.maximum(hc, 0.0)
    hc = jnp.maximum(
        jnp.dot(hc.astype(jnp.bfloat16), wf2_ref[...],
                preferred_element_type=jnp.float32) + bf2_ref[...],
        0.0)
    # lane-dense (PAD_OUT wide) store; wrapper slices the first OUTPUT_SIZE lanes
    out = (jnp.dot(hc.astype(jnp.bfloat16), wf3_ref[...],
                   preferred_element_type=jnp.float32) + bf3_ref[...])
    o_ref[...] = out.reshape(BB, 1, PAD_OUT)


# ------------------------------ wrapper ---------------------------------------
def _pick_bb(B, S):
    """Largest divisor of B that keeps >=2 grid steps (v7x megacore) and
    BB*S <= MAX_ROWS (VMEM / activation budget)."""
    if B < 2:
        return max(B, 1)
    max_bb = max(1, min(128, MAX_ROWS // max(S, 1)))
    best = 1
    for bb in range(1, max_bb + 1):
        if B % bb == 0 and B // bb >= 2:
            best = bb
    return best


def pack_params(params):
    L = params['layers']
    bf16 = jnp.bfloat16
    ws1p = jnp.zeros((STATIC_DIM, SFC_PAD), jnp.float32).at[:, :STATICFC_DIM].set(params['ws1'])
    bs1p = jnp.zeros((1, SFC_PAD), jnp.float32).at[:, :STATICFC_DIM].set(params['bs1'])
    ws2p = (jnp.zeros((SFC_PAD, SFC_PAD), jnp.float32)
            .at[:STATICFC_DIM, :STATICFC_DIM].set(params['ws2']))
    bs2p = jnp.zeros((1, SFC_PAD), jnp.float32).at[:, :STATICFC_DIM].set(params['bs2'])
    wf1sp = (jnp.zeros((SFC_PAD, HIDDEN_DIM), jnp.float32)
             .at[:STATICFC_DIM, :].set(params['wf1'][MODEL_DIM:]))
    wf3p = jnp.zeros((HIDDEN_DIM, PAD_OUT), jnp.float32).at[:, :OUTPUT_SIZE].set(params['wf3'])
    bf3p = jnp.zeros((1, PAD_OUT), jnp.float32).at[:, :OUTPUT_SIZE].set(params['bf3'])
    return dict(
        pos=params['pos'],
        emb_w=params['emb_w'].astype(bf16), emb_b=params['emb_b'],
        wqkv=jnp.stack([jnp.concatenate([lp['wq'], lp['wk'], lp['wv']], axis=1)
                        for lp in L]).astype(bf16),
        bqkv=jnp.stack([jnp.concatenate([lp['bq'], lp['bk'], lp['bv']], axis=1)
                        for lp in L]),
        wo=jnp.stack([lp['wo'] for lp in L]).astype(bf16),
        bo=jnp.stack([lp['bo'] for lp in L]),
        ln=jnp.stack([jnp.concatenate([lp['g1'], lp['be1'], lp['g2'], lp['be2']],
                                      axis=0) for lp in L]),
        w1=jnp.stack([lp['w1'] for lp in L]).astype(bf16),
        b1=jnp.stack([lp['b1'] for lp in L]),
        w2=jnp.stack([lp['w2'] for lp in L]).astype(bf16),
        b2=jnp.stack([lp['b2'] for lp in L]),
        ws1=ws1p.astype(bf16), bs1=bs1p,
        ws2=ws2p.astype(bf16), bs2=bs2p,
        wf1t=params['wf1'][:MODEL_DIM].astype(bf16),
        wf1s=wf1sp.astype(bf16),
        bf1=params['bf1'], wf2=params['wf2'].astype(bf16), bf2=params['bf2'],
        wf3=wf3p.astype(bf16), bf3=bf3p,
    )


def forward(params, x, x_static):
    B, S, T = x.shape
    D, F, Lyr, H = MODEL_DIM, FFN_DIM, NUM_LAYERS, HIDDEN_DIM
    p = pack_params(params)
    pos_s = p['pos'][:S]
    xs3 = x_static.reshape(B, 1, STATIC_DIM)

    BB = _pick_bb(B, S)
    grid = (B // BB,)

    def const_spec(shape):
        nd = len(shape)
        return pl.BlockSpec(shape, lambda i, _nd=nd: (0,) * _nd)

    operands = (x, xs3, pos_s, p['emb_w'], p['emb_b'],
                p['wqkv'], p['bqkv'], p['wo'], p['bo'], p['ln'],
                p['w1'], p['b1'], p['w2'], p['b2'],
                p['ws1'], p['bs1'], p['ws2'], p['bs2'],
                p['wf1t'], p['wf1s'], p['bf1'], p['wf2'], p['bf2'],
                p['wf3'], p['bf3'])

    in_specs = [
        pl.BlockSpec((BB, S, T), lambda i: (i, 0, 0)),            # x
        pl.BlockSpec((BB, 1, STATIC_DIM), lambda i: (i, 0, 0)),   # x_static
        const_spec((S, D)),                                       # pos
        const_spec((T, D)), const_spec((1, D)),                   # embedding
        const_spec((Lyr, D, 3 * D)), const_spec((Lyr, 1, 3 * D)),
        const_spec((Lyr, D, D)), const_spec((Lyr, 1, D)),
        const_spec((Lyr, 4, D)),
        const_spec((Lyr, D, F)), const_spec((Lyr, 1, F)),
        const_spec((Lyr, F, D)), const_spec((Lyr, 1, D)),
        const_spec((STATIC_DIM, SFC_PAD)), const_spec((1, SFC_PAD)),
        const_spec((SFC_PAD, SFC_PAD)), const_spec((1, SFC_PAD)),
        const_spec((D, H)), const_spec((SFC_PAD, H)), const_spec((1, H)),
        const_spec((H, H)), const_spec((1, H)),
        const_spec((H, PAD_OUT)), const_spec((1, PAD_OUT)),
    ]

    # advisory cost estimate (per-batch attention formulation)
    flops = 2 * B * S * T * D
    flops += NUM_LAYERS * (2 * B * S * D * 3 * D
                           + 4 * B * N_HEAD * S * S * HEAD_DIM
                           + 2 * B * S * D * D
                           + 4 * B * S * D * F)
    flops += 2 * B * (STATIC_DIM * SFC_PAD + SFC_PAD * SFC_PAD
                      + D * H + SFC_PAD * H + H * H + H * PAD_OUT)
    transcend = NUM_LAYERS * B * (N_HEAD * S * S + 2 * S)
    bytes_acc = sum(int(a.size) * a.dtype.itemsize for a in operands) + B * PAD_OUT * 4

    out_pad = pl.pallas_call(
        fused_kernel,
        out_shape=jax.ShapeDtypeStruct((B, 1, PAD_OUT), jnp.float32),
        grid=grid,
        in_specs=in_specs,
        out_specs=pl.BlockSpec((BB, 1, PAD_OUT), lambda i: (i, 0, 0)),
        compiler_params=pltpu.CompilerParams(dimension_semantics=("parallel",)),
        cost_estimate=pl.CostEstimate(flops=int(flops),
                                      transcendentals=int(transcend),
                                      bytes_accessed=int(bytes_acc)),
    )(*operands)
    return out_pad.reshape(B, PAD_OUT)[:, :OUTPUT_SIZE]


# ----------------------- deterministic parameter init ------------------------
def init_params(key):
    keys = iter(jax.random.split(key, 64))

    def nrm(shape, scale=0.05):
        return scale * jax.random.normal(next(keys), shape, jnp.float32)

    p = {
        'emb_w': nrm((TIME_DIM, MODEL_DIM)),
        'emb_b': nrm((1, MODEL_DIM)),
        'pos': nrm((SEQ_LEN_MAX, MODEL_DIM)),   # nn.Parameter(randn(1, seq_len, D))
    }
    layers = []
    for _ in range(NUM_LAYERS):
        layers.append({
            'wq': nrm((MODEL_DIM, MODEL_DIM)), 'wk': nrm((MODEL_DIM, MODEL_DIM)),
            'wv': nrm((MODEL_DIM, MODEL_DIM)),
            'bq': nrm((1, MODEL_DIM)), 'bk': nrm((1, MODEL_DIM)),
            'bv': nrm((1, MODEL_DIM)),
            'wo': nrm((MODEL_DIM, MODEL_DIM)), 'bo': nrm((1, MODEL_DIM)),
            'g1': jnp.ones((1, MODEL_DIM), jnp.float32),
            'be1': jnp.zeros((1, MODEL_DIM), jnp.float32),
            'w1': nrm((MODEL_DIM, FFN_DIM)), 'b1': nrm((1, FFN_DIM)),
            'w2': nrm((FFN_DIM, MODEL_DIM)), 'b2': nrm((1, MODEL_DIM)),
            'g2': jnp.ones((1, MODEL_DIM), jnp.float32),
            'be2': jnp.zeros((1, MODEL_DIM), jnp.float32),
        })
    p['layers'] = layers
    p.update({
        'ws1': nrm((STATIC_DIM, STATICFC_DIM)), 'bs1': nrm((1, STATICFC_DIM)),
        'ws2': nrm((STATICFC_DIM, STATICFC_DIM)), 'bs2': nrm((1, STATICFC_DIM)),
        'wf1': nrm((MODEL_DIM + STATICFC_DIM, HIDDEN_DIM)), 'bf1': nrm((1, HIDDEN_DIM)),
        'wf2': nrm((HIDDEN_DIM, HIDDEN_DIM)), 'bf2': nrm((1, HIDDEN_DIM)),
        'wf3': nrm((HIDDEN_DIM, OUTPUT_SIZE)), 'bf3': nrm((1, OUTPUT_SIZE)),
    })
    return p


# ------------------------- pure-JAX reference (check) ------------------------
def reference(params, x, x_static):
    B, S, _ = x.shape
    h = x @ params['emb_w'] + params['emb_b'] + params['pos'][None, :S, :]
    for lp in params['layers']:
        q = (h @ lp['wq'] + lp['bq']).reshape(B, S, N_HEAD, HEAD_DIM)
        k = (h @ lp['wk'] + lp['bk']).reshape(B, S, N_HEAD, HEAD_DIM)
        v = (h @ lp['wv'] + lp['bv']).reshape(B, S, N_HEAD, HEAD_DIM)
        sc = jnp.einsum('bshd,bthd->bhst', q, k) / math.sqrt(HEAD_DIM)
        pr = jax.nn.softmax(sc, axis=-1)
        att = jnp.einsum('bhst,bthd->bshd', pr, v).reshape(B, S, MODEL_DIM)
        att = att @ lp['wo'] + lp['bo']
        h = _layernorm(h + att, lp['g1'], lp['be1'])
        ff = jnp.maximum(h @ lp['w1'] + lp['b1'], 0.0) @ lp['w2'] + lp['b2']
        h = _layernorm(h + ff, lp['g2'], lp['be2'])
    t = h.mean(axis=1)
    s = jnp.maximum(x_static @ params['ws1'] + params['bs1'], 0.0)
    s = s @ params['ws2'] + params['bs2']
    cat = jnp.concatenate([t, s], axis=1)
    out = jnp.maximum(cat @ params['wf1'] + params['bf1'], 0.0)
    out = jnp.maximum(out @ params['wf2'] + params['bf2'], 0.0)
    return out @ params['wf3'] + params['bf3']


if __name__ == "__main__":
    B, S = 2, 16
    key = jax.random.PRNGKey(0)
    kx, ks, kp = jax.random.split(key, 3)
    x = jax.random.normal(kx, (B, S, TIME_DIM), jnp.float32)
    x_static = jax.random.normal(ks, (B, STATIC_DIM), jnp.float32)
    params = init_params(kp)

    out = forward(params, x, x_static)
    out = jax.block_until_ready(out)

    ref = reference(params, x, x_static)
    assert out.shape == (B, OUTPUT_SIZE)
    assert jnp.all(jnp.isfinite(out))
    # kernel uses bf16 matmul operands with f32 accumulation -> ~1e-3 level
    # deviations vs the all-f32 reference; 1e-2 keeps meaningful headroom.
    assert jnp.allclose(out, ref, atol=1e-2, rtol=1e-2), (out, ref)
    print("KERNEL_OK")
</pallas_src>

<mosaic_0001>
module attributes {stable_mosaic.version = 11 : i64} {
  func.func @fused_kernel(%arg0: i32, %arg1: memref<1x16x21xf32, #tpu.memory_space<vmem>>, %arg2: memref<1x1x30xf32, #tpu.memory_space<vmem>>, %arg3: memref<16x128xf32, #tpu.memory_space<vmem>>, %arg4: memref<21x128xbf16, #tpu.memory_space<vmem>>, %arg5: memref<1x128xf32, #tpu.memory_space<vmem>>, %arg6: memref<2x128x384xbf16, #tpu.memory_space<vmem>>, %arg7: memref<2x1x384xf32, #tpu.memory_space<vmem>>, %arg8: memref<2x128x128xbf16, #tpu.memory_space<vmem>>, %arg9: memref<2x1x128xf32, #tpu.memory_space<vmem>>, %arg10: memref<2x4x128xf32, #tpu.memory_space<vmem>>, %arg11: memref<2x128x128xbf16, #tpu.memory_space<vmem>>, %arg12: memref<2x1x128xf32, #tpu.memory_space<vmem>>, %arg13: memref<2x128x128xbf16, #tpu.memory_space<vmem>>, %arg14: memref<2x1x128xf32, #tpu.memory_space<vmem>>, %arg15: memref<30x128xbf16, #tpu.memory_space<vmem>>, %arg16: memref<1x128xf32, #tpu.memory_space<vmem>>, %arg17: memref<128x128xbf16, #tpu.memory_space<vmem>>, %arg18: memref<1x128xf32, #tpu.memory_space<vmem>>, %arg19: memref<128x128xbf16, #tpu.memory_space<vmem>>, %arg20: memref<128x128xbf16, #tpu.memory_space<vmem>>, %arg21: memref<1x128xf32, #tpu.memory_space<vmem>>, %arg22: memref<128x128xbf16, #tpu.memory_space<vmem>>, %arg23: memref<1x128xf32, #tpu.memory_space<vmem>>, %arg24: memref<128x128xbf16, #tpu.memory_space<vmem>>, %arg25: memref<1x128xf32, #tpu.memory_space<vmem>>, %arg26: memref<1x1x128xf32, #tpu.memory_space<vmem>>) attributes {dimension_semantics = [#tpu.dimension_semantics<parallel>], iteration_bounds = array<i64: 2>, scalar_prefetch = 0 : i64, scratch_operands = 0 : i64, tpu.core_type = #tpu.core_type<tc>, window_params = [{transform_indices = @transform_0, window_bounds = array<i64: 1, 16, 21>}, {transform_indices = @transform_1, window_bounds = array<i64: 1, 1, 30>}, {pipeline_mode = #tpu.pipeline_mode<synchronous>, transform_indices = @transform_2, window_bounds = array<i64: 16, 128>}, {pipeline_mode = #tpu.pipeline_mode<synchronous>, transform_indices = @transform_3, window_bounds = array<i64: 21, 128>}, {pipeline_mode = #tpu.pipeline_mode<synchronous>, transform_indices = @transform_4, window_bounds = array<i64: 1, 128>}, {pipeline_mode = #tpu.pipeline_mode<synchronous>, transform_indices = @transform_5, window_bounds = array<i64: 2, 128, 384>}, {pipeline_mode = #tpu.pipeline_mode<synchronous>, transform_indices = @transform_6, window_bounds = array<i64: 2, 1, 384>}, {pipeline_mode = #tpu.pipeline_mode<synchronous>, transform_indices = @transform_7, window_bounds = array<i64: 2, 128, 128>}, {pipeline_mode = #tpu.pipeline_mode<synchronous>, transform_indices = @transform_8, window_bounds = array<i64: 2, 1, 128>}, {pipeline_mode = #tpu.pipeline_mode<synchronous>, transform_indices = @transform_9, window_bounds = array<i64: 2, 4, 128>}, {pipeline_mode = #tpu.pipeline_mode<synchronous>, transform_indices = @transform_10, window_bounds = array<i64: 2, 128, 128>}, {pipeline_mode = #tpu.pipeline_mode<synchronous>, transform_indices = @transform_11, window_bounds = array<i64: 2, 1, 128>}, {pipeline_mode = #tpu.pipeline_mode<synchronous>, transform_indices = @transform_12, window_bounds = array<i64: 2, 128, 128>}, {pipeline_mode = #tpu.pipeline_mode<synchronous>, transform_indices = @transform_13, window_bounds = array<i64: 2, 1, 128>}, {pipeline_mode = #tpu.pipeline_mode<synchronous>, transform_indices = @transform_14, window_bounds = array<i64: 30, 128>}, {pipeline_mode = #tpu.pipeline_mode<synchronous>, transform_indices = @transform_15, window_bounds = array<i64: 1, 128>}, {pipeline_mode = #tpu.pipeline_mode<synchronous>, transform_indices = @transform_16, window_bounds = array<i64: 128, 128>}, {pipeline_mode = #tpu.pipeline_mode<synchronous>, transform_indices = @transform_17, window_bounds = array<i64: 1, 128>}, {pipeline_mode = #tpu.pipeline_mode<synchronous>, transform_indices = @transform_18, window_bounds = array<i64: 128, 128>}, {pipeline_mode = #tpu.pipeline_mode<synchronous>, transform_indices = @transform_19, window_bounds = array<i64: 128, 128>}, {pipeline_mode = #tpu.pipeline_mode<synchronous>, transform_indices = @transform_20, window_bounds = array<i64: 1, 128>}, {pipeline_mode = #tpu.pipeline_mode<synchronous>, transform_indices = @transform_21, window_bounds = array<i64: 128, 128>}, {pipeline_mode = #tpu.pipeline_mode<synchronous>, transform_indices = @transform_22, window_bounds = array<i64: 1, 128>}, {pipeline_mode = #tpu.pipeline_mode<synchronous>, transform_indices = @transform_23, window_bounds = array<i64: 128, 128>}, {pipeline_mode = #tpu.pipeline_mode<synchronous>, transform_indices = @transform_24, window_bounds = array<i64: 1, 128>}, {transform_indices = @transform_25, window_bounds = array<i64: 1, 1, 128>}]} {
    %c0 = arith.constant 0 : index
    %c0_0 = arith.constant 0 : index
    %c0_1 = arith.constant 0 : index
    %0 = vector.load %arg1[%c0, %c0_0, %c0_1] : memref<1x16x21xf32, #tpu.memory_space<vmem>>, vector<1x16x21xf32>
    %1 = vector.shape_cast %0 : vector<1x16x21xf32> to vector<16x21xf32>
    %2 = arith.truncf %1 : vector<16x21xf32> to vector<16x21xbf16>
    %c0_2 = arith.constant 0 : index
    %c0_3 = arith.constant 0 : index
    %3 = vector.load %arg4[%c0_2, %c0_3] : memref<21x128xbf16, #tpu.memory_space<vmem>>, vector<21x128xbf16>
    %cst = arith.constant dense<0.000000e+00> : vector<16x128xf32>
    %4 = tpu.matmul %2, %3, %cst {dimension_numbers = #tpu.dot_dimension_numbers<[1], [0], [0], [1], [0, 0, 1, 1], [], []>} : vector<16x21xbf16>, vector<21x128xbf16>, vector<16x128xf32> -> vector<16x128xf32>
    %c0_4 = arith.constant 0 : index
    %c0_5 = arith.constant 0 : index
    %5 = vector.load %arg5[%c0_4, %c0_5] : memref<1x128xf32, #tpu.memory_space<vmem>>, vector<1x128xf32>
    %6 = vector.broadcast %5 : vector<1x128xf32> to vector<16x128xf32>
    %7 = arith.addf %4, %6 : vector<16x128xf32>
    %8 = vector.shape_cast %7 : vector<16x128xf32> to vector<1x16x128xf32>
    %c0_6 = arith.constant 0 : index
    %c0_7 = arith.constant 0 : index
    %9 = vector.load %arg3[%c0_6, %c0_7] : memref<16x128xf32, #tpu.memory_space<vmem>>, vector<16x128xf32>
    %10 = vector.shape_cast %9 : vector<16x128xf32> to vector<1x16x128xf32>
    %11 = arith.addf %8, %10 : vector<1x16x128xf32>
    %12 = vector.shape_cast %11 : vector<1x16x128xf32> to vector<16x128xf32>
    %13 = arith.truncf %12 : vector<16x128xf32> to vector<16x128xbf16>
    %c0_8 = arith.constant 0 : index
    %c0_9 = arith.constant 0 : index
    %c0_10 = arith.constant 0 : index
    %14 = vector.load %arg6[%c0_8, %c0_9, %c0_10] : memref<2x128x384xbf16, #tpu.memory_space<vmem>>, vector<1x128x384xbf16>
    %15 = vector.shape_cast %14 : vector<1x128x384xbf16> to vector<128x384xbf16>
    %cst_11 = arith.constant dense<0.000000e+00> : vector<16x384xf32>
    %16 = tpu.matmul %13, %15, %cst_11 {dimension_numbers = #tpu.dot_dimension_numbers<[1], [0], [0], [1], [0, 0, 1, 1], [], []>} : vector<16x128xbf16>, vector<128x384xbf16>, vector<16x384xf32> -> vector<16x384xf32>
    %c0_12 = arith.constant 0 : index
    %c0_13 = arith.constant 0 : index
    %c0_14 = arith.constant 0 : index
    %17 = vector.load %arg7[%c0_12, %c0_13, %c0_14] : memref<2x1x384xf32, #tpu.memory_space<vmem>>, vector<1x1x384xf32>
    %18 = vector.shape_cast %17 : vector<1x1x384xf32> to vector<1x384xf32>
    %19 = vector.broadcast %18 : vector<1x384xf32> to vector<16x384xf32>
    %20 = arith.addf %16, %19 : vector<16x384xf32>
    %21 = vector.extract_strided_slice %20 {offsets = [0, 0], sizes = [16, 128], strides = [1, 1]} : vector<16x384xf32> to vector<16x128xf32>
    %22 = arith.truncf %21 : vector<16x128xf32> to vector<16x128xbf16>
    %23 = vector.shape_cast %22 : vector<16x128xbf16> to vector<1x16x128xbf16>
    %24 = vector.extract_strided_slice %20 {offsets = [0, 128], sizes = [16, 128], strides = [1, 1]} : vector<16x384xf32> to vector<16x128xf32>
    %25 = arith.truncf %24 : vector<16x128xf32> to vector<16x128xbf16>
    %26 = vector.shape_cast %25 : vector<16x128xbf16> to vector<1x16x128xbf16>
    %27 = vector.extract_strided_slice %20 {offsets = [0, 256], sizes = [16, 128], strides = [1, 1]} : vector<16x384xf32> to vector<16x128xf32>
    %28 = arith.truncf %27 : vector<16x128xf32> to vector<16x128xbf16>
    %29 = vector.shape_cast %28 : vector<16x128xbf16> to vector<1x16x128xbf16>
    %30 = vector.extract_strided_slice %23 {offsets = [0, 0, 0], sizes = [1, 16, 32], strides = [1, 1, 1]} : vector<1x16x128xbf16> to vector<1x16x32xbf16>
    %31 = vector.extract_strided_slice %26 {offsets = [0, 0, 0], sizes = [1, 16, 32], strides = [1, 1, 1]} : vector<1x16x128xbf16> to vector<1x16x32xbf16>
    %32 = vector.extract_strided_slice %29 {offsets = [0, 0, 0], sizes = [1, 16, 32], strides = [1, 1, 1]} : vector<1x16x128xbf16> to vector<1x16x32xbf16>
    "tpu.trace_start"() <{level = 10 : i32, message = "bqd,bkd->bqk"}> : () -> ()
    %cst_15 = arith.constant dense<0.000000e+00> : vector<1x16x16xf32>
    %33 = tpu.matmul %30, %31, %cst_15 {dimension_numbers = #tpu.dot_dimension_numbers<[2], [2], [1], [1], [0, 0, 0, 1, 1, 1], [0], [0]>} : vector<1x16x32xbf16>, vector<1x16x32xbf16>, vector<1x16x16xf32> -> vector<1x16x16xf32>
    "tpu.trace_stop"() : () -> ()
    %cst_16 = arith.constant 0.176776692 : f32
    %34 = vector.broadcast %cst_16 : f32 to vector<1x16x16xf32>
    %35 = arith.mulf %33, %34 : vector<1x16x16xf32>
    %cst_17 = arith.constant dense<0xFF800000> : vector<1x16xf32>
    %36 = vector.multi_reduction <maximumf>, %35, %cst_17 [2] : vector<1x16x16xf32> to vector<1x16xf32>
    %37 = vector.shape_cast %36 : vector<1x16xf32> to vector<1x16x1xf32>
    %38 = vector.broadcast %37 : vector<1x16x1xf32> to vector<1x16x16xf32>
    %39 = arith.subf %35, %38 : vector<1x16x16xf32>
    %40 = math.exp %39 : vector<1x16x16xf32>
    %cst_18 = arith.constant dense<0.000000e+00> : vector<1x16xf32>
    %41 = vector.multi_reduction <add>, %40, %cst_18 [2] : vector<1x16x16xf32> to vector<1x16xf32>
    %42 = vector.shape_cast %41 : vector<1x16xf32> to vector<1x16x1xf32>
    %43 = vector.broadcast %42 : vector<1x16x1xf32> to vector<1x16x16xf32>
    %44 = arith.divf %40, %43 : vector<1x16x16xf32>
    %45 = arith.truncf %44 : vector<1x16x16xf32> to vector<1x16x16xbf16>
    "tpu.trace_start"() <{level = 10 : i32, message = "bqk,bkd->bqd"}> : () -> ()
    %cst_19 = arith.constant dense<0.000000e+00> : vector<1x16x32xf32>
    %46 = tpu.matmul %45, %32, %cst_19 {dimension_numbers = #tpu.dot_dimension_numbers<[2], [1], [1], [2], [0, 0, 0, 1, 1, 2], [0], [0]>} : vector<1x16x16xbf16>, vector<1x16x32xbf16>, vector<1x16x32xf32> -> vector<1x16x32xf32>
    "tpu.trace_stop"() : () -> ()
    %47 = vector.extract_strided_slice %23 {offsets = [0, 0, 32], sizes = [1, 16, 32], strides = [1, 1, 1]} : vector<1x16x128xbf16> to vector<1x16x32xbf16>
    %48 = vector.extract_strided_slice %26 {offsets = [0, 0, 32], sizes = [1, 16, 32], strides = [1, 1, 1]} : vector<1x16x128xbf16> to vector<1x16x32xbf16>
    %49 = vector.extract_strided_slice %29 {offsets = [0, 0, 32], sizes = [1, 16, 32], strides = [1, 1, 1]} : vector<1x16x128xbf16> to vector<1x16x32xbf16>
    "tpu.trace_start"() <{level = 10 : i32, message = "bqd,bkd->bqk"}> : () -> ()
    %cst_20 = arith.constant dense<0.000000e+00> : vector<1x16x16xf32>
    %50 = tpu.matmul %47, %48, %cst_20 {dimension_numbers = #tpu.dot_dimension_numbers<[2], [2], [1], [1], [0, 0, 0, 1, 1, 1], [0], [0]>} : vector<1x16x32xbf16>, vector<1x16x32xbf16>, vector<1x16x16xf32> -> vector<1x16x16xf32>
    "tpu.trace_stop"() : () -> ()
    %cst_21 = arith.constant 0.176776692 : f32
    %51 = vector.broadcast %cst_21 : f32 to vector<1x16x16xf32>
    %52 = arith.mulf %50, %51 : vector<1x16x16xf32>
    %cst_22 = arith.constant dense<0xFF800000> : vector<1x16xf32>
    %53 = vector.multi_reduction <maximumf>, %52, %cst_22 [2] : vector<1x16x16xf32> to vector<1x16xf32>
    %54 = vector.shape_cast %53 : vector<1x16xf32> to vector<1x16x1xf32>
    %55 = vector.broadcast %54 : vector<1x16x1xf32> to vector<1x16x16xf32>
    %56 = arith.subf %52, %55 : vector<1x16x16xf32>
    %57 = math.exp %56 : vector<1x16x16xf32>
    %cst_23 = arith.constant dense<0.000000e+00> : vector<1x16xf32>
    %58 = vector.multi_reduction <add>, %57, %cst_23 [2] : vector<1x16x16xf32> to vector<1x16xf32>
    %59 = vector.shape_cast %58 : vector<1x16xf32> to vector<1x16x1xf32>
    %60 = vector.broadcast %59 : vector<1x16x1xf32> to vector<1x16x16xf32>
    %61 = arith.divf %57, %60 : vector<1x16x16xf32>
    %62 = arith.truncf %61 : vector<1x16x16xf32> to vector<1x16x16xbf16>
    "tpu.trace_start"() <{level = 10 : i32, message = "bqk,bkd->bqd"}> : () -> ()
    %cst_24 = arith.constant dense<0.000000e+00> : vector<1x16x32xf32>
    %63 = tpu.matmul %62, %49, %cst_24 {dimension_numbers = #tpu.dot_dimension_numbers<[2], [1], [1], [2], [0, 0, 0, 1, 1, 2], [0], [0]>} : vector<1x16x16xbf16>, vector<1x16x32xbf16>, vector<1x16x32xf32> -> vector<1x16x32xf32>
    "tpu.trace_stop"() : () -> ()
    %64 = vector.extract_strided_slice %23 {offsets = [0, 0, 64], sizes = [1, 16, 32], strides = [1, 1, 1]} : vector<1x16x128xbf16> to vector<1x16x32xbf16>
    %65 = vector.extract_strided_slice %26 {offsets = [0, 0, 64], sizes = [1, 16, 32], strides = [1, 1, 1]} : vector<1x16x128xbf16> to vector<1x16x32xbf16>
    %66 = vector.extract_strided_slice %29 {offsets = [0, 0, 64], sizes = [1, 16, 32], strides = [1, 1, 1]} : vector<1x16x128xbf16> to vector<1x16x32xbf16>
    "tpu.trace_start"() <{level = 10 : i32, message = "bqd,bkd->bqk"}> : () -> ()
    %cst_25 = arith.constant dense<0.000000e+00> : vector<1x16x16xf32>
    %67 = tpu.matmul %64, %65, %cst_25 {dimension_numbers = #tpu.dot_dimension_numbers<[2], [2], [1], [1], [0, 0, 0, 1, 1, 1], [0], [0]>} : vector<1x16x32xbf16>, vector<1x16x32xbf16>, vector<1x16x16xf32> -> vector<1x16x16xf32>
    "tpu.trace_stop"() : () -> ()
    %cst_26 = arith.constant 0.176776692 : f32
    %68 = vector.broadcast %cst_26 : f32 to vector<1x16x16xf32>
    %69 = arith.mulf %67, %68 : vector<1x16x16xf32>
    %cst_27 = arith.constant dense<0xFF800000> : vector<1x16xf32>
    %70 = vector.multi_reduction <maximumf>, %69, %cst_27 [2] : vector<1x16x16xf32> to vector<1x16xf32>
    %71 = vector.shape_cast %70 : vector<1x16xf32> to vector<1x16x1xf32>
    %72 = vector.broadcast %71 : vector<1x16x1xf32> to vector<1x16x16xf32>
    %73 = arith.subf %69, %72 : vector<1x16x16xf32>
    %74 = math.exp %73 : vector<1x16x16xf32>
    %cst_28 = arith.constant dense<0.000000e+00> : vector<1x16xf32>
    %75 = vector.multi_reduction <add>, %74, %cst_28 [2] : vector<1x16x16xf32> to vector<1x16xf32>
    %76 = vector.shape_cast %75 : vector<1x16xf32> to vector<1x16x1xf32>
    %77 = vector.broadcast %76 : vector<1x16x1xf32> to vector<1x16x16xf32>
    %78 = arith.divf %74, %77 : vector<1x16x16xf32>
    %79 = arith.truncf %78 : vector<1x16x16xf32> to vector<1x16x16xbf16>
    "tpu.trace_start"() <{level = 10 : i32, message = "bqk,bkd->bqd"}> : () -> ()
    %cst_29 = arith.constant dense<0.000000e+00> : vector<1x16x32xf32>
    %80 = tpu.matmul %79, %66, %cst_29 {dimension_numbers = #tpu.dot_dimension_numbers<[2], [1], [1], [2], [0, 0, 0, 1, 1, 2], [0], [0]>} : vector<1x16x16xbf16>, vector<1x16x32xbf16>, vector<1x16x32xf32> -> vector<1x16x32xf32>
    "tpu.trace_stop"() : () -> ()
    %81 = vector.extract_strided_slice %23 {offsets = [0, 0, 96], sizes = [1, 16, 32], strides = [1, 1, 1]} : vector<1x16x128xbf16> to vector<1x16x32xbf16>
    %82 = vector.extract_strided_slice %26 {offsets = [0, 0, 96], sizes = [1, 16, 32], strides = [1, 1, 1]} : vector<1x16x128xbf16> to vector<1x16x32xbf16>
    %83 = vector.extract_strided_slice %29 {offsets = [0, 0, 96], sizes = [1, 16, 32], strides = [1, 1, 1]} : vector<1x16x128xbf16> to vector<1x16x32xbf16>
    "tpu.trace_start"() <{level = 10 : i32, message = "bqd,bkd->bqk"}> : () -> ()
    %cst_30 = arith.constant dense<0.000000e+00> : vector<1x16x16xf32>
    %84 = tpu.matmul %81, %82, %cst_30 {dimension_numbers = #tpu.dot_dimension_numbers<[2], [2], [1], [1], [0, 0, 0, 1, 1, 1], [0], [0]>} : vector<1x16x32xbf16>, vector<1x16x32xbf16>, vector<1x16x16xf32> -> vector<1x16x16xf32>
    "tpu.trace_stop"() : () -> ()
    %cst_31 = arith.constant 0.176776692 : f32
    %85 = vector.broadcast %cst_31 : f32 to vector<1x16x16xf32>
    %86 = arith.mulf %84, %85 : vector<1x16x16xf32>
    %cst_32 = arith.constant dense<0xFF800000> : vector<1x16xf32>
    %87 = vector.multi_reduction <maximumf>, %86, %cst_32 [2] : vector<1x16x16xf32> to vector<1x16xf32>
    %88 = vector.shape_cast %87 : vector<1x16xf32> to vector<1x16x1xf32>
    %89 = vector.broadcast %88 : vector<1x16x1xf32> to vector<1x16x16xf32>
    %90 = arith.subf %86, %89 : vector<1x16x16xf32>
    %91 = math.exp %90 : vector<1x16x16xf32>
    %cst_33 = arith.constant dense<0.000000e+00> : vector<1x16xf32>
    %92 = vector.multi_reduction <add>, %91, %cst_33 [2] : vector<1x16x16xf32> to vector<1x16xf32>
    %93 = vector.shape_cast %92 : vector<1x16xf32> to vector<1x16x1xf32>
    %94 = vector.broadcast %93 : vector<1x16x1xf32> to vector<1x16x16xf32>
    %95 = arith.divf %91, %94 : vector<1x16x16xf32>
    %96 = arith.truncf %95 : vector<1x16x16xf32> to vector<1x16x16xbf16>
    "tpu.trace_start"() <{level = 10 : i32, message = "bqk,bkd->bqd"}> : () -> ()
    %cst_34 = arith.constant dense<0.000000e+00> : vector<1x16x32xf32>
    %97 = tpu.matmul %96, %83, %cst_34 {dimension_numbers = #tpu.dot_dimension_numbers<[2], [1], [1], [2], [0, 0, 0, 1, 1, 2], [0], [0]>} : vector<1x16x16xbf16>, vector<1x16x32xbf16>, vector<1x16x32xf32> -> vector<1x16x32xf32>
    "tpu.trace_stop"() : () -> ()
    %98 = tpu.concatenate %46, %63, %80, %97 in 2 : vector<1x16x32xf32>, vector<1x16x32xf32>, vector<1x16x32xf32>, vector<1x16x32xf32> -> vector<1x16x128xf32>
    %99 = vector.shape_cast %98 : vector<1x16x128xf32> to vector<16x128xf32>
    %100 = arith.truncf %99 : vector<16x128xf32> to vector<16x128xbf16>
    %c0_35 = arith.constant 0 : index
    %c0_36 = arith.constant 0 : index
    %c0_37 = arith.constant 0 : index
    %101 = vector.load %arg8[%c0_35, %c0_36, %c0_37] : memref<2x128x128xbf16, #tpu.memory_space<vmem>>, vector<1x128x128xbf16>
    %102 = vector.shape_cast %101 : vector<1x128x128xbf16> to vector<128x128xbf16>
    %cst_38 = arith.constant dense<0.000000e+00> : vector<16x128xf32>
    %103 = tpu.matmul %100, %102, %cst_38 {dimension_numbers = #tpu.dot_dimension_numbers<[1], [0], [0], [1], [0, 0, 1, 1], [], []>} : vector<16x128xbf16>, vector<128x128xbf16>, vector<16x128xf32> -> vector<16x128xf32>
    %c0_39 = arith.constant 0 : index
    %c0_40 = arith.constant 0 : index
    %c0_41 = arith.constant 0 : index
    %104 = vector.load %arg9[%c0_39, %c0_40, %c0_41] : memref<2x1x128xf32, #tpu.memory_space<vmem>>, vector<1x1x128xf32>
    %105 = vector.shape_cast %104 : vector<1x1x128xf32> to vector<1x128xf32>
    %106 = vector.broadcast %105 : vector<1x128xf32> to vector<16x128xf32>
    %107 = arith.addf %103, %106 : vector<16x128xf32>
    %c0_42 = arith.constant 0 : index
    %c0_43 = arith.constant 0 : index
    %c0_44 = arith.constant 0 : index
    %108 = vector.load %arg10[%c0_42, %c0_43, %c0_44] : memref<2x4x128xf32, #tpu.memory_space<vmem>>, vector<1x4x128xf32>
    %109 = vector.shape_cast %108 : vector<1x4x128xf32> to vector<4x128xf32>
    %110 = arith.addf %12, %107 : vector<16x128xf32>
    %111 = vector.extract_strided_slice %109 {offsets = [0, 0], sizes = [1, 128], strides = [1, 1]} : vector<4x128xf32> to vector<1x128xf32>
    %112 = vector.extract_strided_slice %109 {offsets = [1, 0], sizes = [1, 128], strides = [1, 1]} : vector<4x128xf32> to vector<1x128xf32>
    %cst_45 = arith.constant dense<0.000000e+00> : vector<16xf32>
    %113 = vector.multi_reduction <add>, %110, %cst_45 [1] : vector<16x128xf32> to vector<16xf32>
    %114 = vector.shape_cast %113 : vector<16xf32> to vector<16x1xf32>
    %cst_46 = arith.constant 1.280000e+02 : f32
    %115 = vector.broadcast %cst_46 : f32 to vector<16x1xf32>
    %116 = arith.divf %114, %115 : vector<16x1xf32>
    %117 = vector.broadcast %116 : vector<16x1xf32> to vector<16x128xf32>
    %118 = arith.subf %110, %117 : vector<16x128xf32>
    %119 = arith.mulf %118, %118 : vector<16x128xf32>
    %cst_47 = arith.constant dense<0.000000e+00> : vector<16xf32>
    %120 = vector.multi_reduction <add>, %119, %cst_47 [1] : vector<16x128xf32> to vector<16xf32>
    %121 = vector.shape_cast %120 : vector<16xf32> to vector<16x1xf32>
    %cst_48 = arith.constant 1.280000e+02 : f32
    %122 = vector.broadcast %cst_48 : f32 to vector<16x1xf32>
    %123 = arith.divf %121, %122 : vector<16x1xf32>
    %124 = vector.broadcast %116 : vector<16x1xf32> to vector<16x128xf32>
    %125 = arith.subf %110, %124 : vector<16x128xf32>
    %cst_49 = arith.constant 9.99999974E-6 : f32
    %126 = vector.broadcast %cst_49 : f32 to vector<16x1xf32>
    %127 = arith.addf %123, %126 : vector<16x1xf32>
    %128 = math.rsqrt %127 : vector<16x1xf32>
    %129 = vector.broadcast %128 : vector<16x1xf32> to vector<16x128xf32>
    %130 = arith.mulf %125, %129 : vector<16x128xf32>
    %131 = vector.broadcast %111 : vector<1x128xf32> to vector<16x128xf32>
    %132 = arith.mulf %130, %131 : vector<16x128xf32>
    %133 = vector.broadcast %112 : vector<1x128xf32> to vector<16x128xf32>
    %134 = arith.addf %132, %133 : vector<16x128xf32>
    %135 = arith.truncf %134 : vector<16x128xf32> to vector<16x128xbf16>
    %c0_50 = arith.constant 0 : index
    %c0_51 = arith.constant 0 : index
    %c0_52 = arith.constant 0 : index
    %136 = vector.load %arg11[%c0_50, %c0_51, %c0_52] : memref<2x128x128xbf16, #tpu.memory_space<vmem>>, vector<1x128x128xbf16>
    %137 = vector.shape_cast %136 : vector<1x128x128xbf16> to vector<128x128xbf16>
    %cst_53 = arith.constant dense<0.000000e+00> : vector<16x128xf32>
    %138 = tpu.matmul %135, %137, %cst_53 {dimension_numbers = #tpu.dot_dimension_numbers<[1], [0], [0], [1], [0, 0, 1, 1], [], []>} : vector<16x128xbf16>, vector<128x128xbf16>, vector<16x128xf32> -> vector<16x128xf32>
    %c0_54 = arith.constant 0 : index
    %c0_55 = arith.constant 0 : index
    %c0_56 = arith.constant 0 : index
    %139 = vector.load %arg12[%c0_54, %c0_55, %c0_56] : memref<2x1x128xf32, #tpu.memory_space<vmem>>, vector<1x1x128xf32>
    %140 = vector.shape_cast %139 : vector<1x1x128xf32> to vector<1x128xf32>
    %141 = vector.broadcast %140 : vector<1x128xf32> to vector<16x128xf32>
    %142 = arith.addf %138, %141 : vector<16x128xf32>
    %cst_57 = arith.constant 0.000000e+00 : f32
    %143 = vector.broadcast %cst_57 : f32 to vector<16x128xf32>
    %144 = arith.maximumf %142, %143 : vector<16x128xf32>
    %145 = arith.truncf %144 : vector<16x128xf32> to vector<16x128xbf16>
    %c0_58 = arith.constant 0 : index
    %c0_59 = arith.constant 0 : index
    %c0_60 = arith.constant 0 : index
    %146 = vector.load %arg13[%c0_58, %c0_59, %c0_60] : memref<2x128x128xbf16, #tpu.memory_space<vmem>>, vector<1x128x128xbf16>
    %147 = vector.shape_cast %146 : vector<1x128x128xbf16> to vector<128x128xbf16>
    %cst_61 = arith.constant dense<0.000000e+00> : vector<16x128xf32>
    %148 = tpu.matmul %145, %147, %cst_61 {dimension_numbers = #tpu.dot_dimension_numbers<[1], [0], [0], [1], [0, 0, 1, 1], [], []>} : vector<16x128xbf16>, vector<128x128xbf16>, vector<16x128xf32> -> vector<16x128xf32>
    %c0_62 = arith.constant 0 : index
    %c0_63 = arith.constant 0 : index
    %c0_64 = arith.constant 0 : index
    %149 = vector.load %arg14[%c0_62, %c0_63, %c0_64] : memref<2x1x128xf32, #tpu.memory_space<vmem>>, vector<1x1x128xf32>
    %150 = vector.shape_cast %149 : vector<1x1x128xf32> to vector<1x128xf32>
    %151 = vector.broadcast %150 : vector<1x128xf32> to vector<16x128xf32>
    %152 = arith.addf %148, %151 : vector<16x128xf32>
    %153 = arith.addf %134, %152 : vector<16x128xf32>
    %154 = vector.extract_strided_slice %109 {offsets = [2, 0], sizes = [1, 128], strides = [1, 1]} : vector<4x128xf32> to vector<1x128xf32>
    %155 = vector.extract_strided_slice %109 {offsets = [3, 0], sizes = [1, 128], strides = [1, 1]} : vector<4x128xf32> to vector<1x128xf32>
    %cst_65 = arith.constant dense<0.000000e+00> : vector<16xf32>
    %156 = vector.multi_reduction <add>, %153, %cst_65 [1] : vector<16x128xf32> to vector<16xf32>
    %157 = vector.shape_cast %156 : vector<16xf32> to vector<16x1xf32>
    %cst_66 = arith.constant 1.280000e+02 : f32
    %158 = vector.broadcast %cst_66 : f32 to vector<16x1xf32>
    %159 = arith.divf %157, %158 : vector<16x1xf32>
    %160 = vector.broadcast %159 : vector<16x1xf32> to vector<16x128xf32>
    %161 = arith.subf %153, %160 : vector<16x128xf32>
    %162 = arith.mulf %161, %161 : vector<16x128xf32>
    %cst_67 = arith.constant dense<0.000000e+00> : vector<16xf32>
    %163 = vector.multi_reduction <add>, %162, %cst_67 [1] : vector<16x128xf32> to vector<16xf32>
    %164 = vector.shape_cast %163 : vector<16xf32> to vector<16x1xf32>
    %cst_68 = arith.constant 1.280000e+02 : f32
    %165 = vector.broadcast %cst_68 : f32 to vector<16x1xf32>
    %166 = arith.divf %164, %165 : vector<16x1xf32>
    %167 = vector.broadcast %159 : vector<16x1xf32> to vector<16x128xf32>
    %168 = arith.subf %153, %167 : vector<16x128xf32>
    %cst_69 = arith.constant 9.99999974E-6 : f32
    %169 = vector.broadcast %cst_69 : f32 to vector<16x1xf32>
    %170 = arith.addf %166, %169 : vector<16x1xf32>
    %171 = math.rsqrt %170 : vector<16x1xf32>
    %172 = vector.broadcast %171 : vector<16x1xf32> to vector<16x128xf32>
    %173 = arith.mulf %168, %172 : vector<16x128xf32>
    %174 = vector.broadcast %154 : vector<1x128xf32> to vector<16x128xf32>
    %175 = arith.mulf %173, %174 : vector<16x128xf32>
    %176 = vector.broadcast %155 : vector<1x128xf32> to vector<16x128xf32>
    %177 = arith.addf %175, %176 : vector<16x128xf32>
    %178 = arith.truncf %177 : vector<16x128xf32> to vector<16x128xbf16>
    %c1 = arith.constant 1 : index
    %c0_70 = arith.constant 0 : index
    %c0_71 = arith.constant 0 : index
    %179 = vector.load %arg6[%c1, %c0_70, %c0_71] : memref<2x128x384xbf16, #tpu.memory_space<vmem>>, vector<1x128x384xbf16>
    %180 = vector.shape_cast %179 : vector<1x128x384xbf16> to vector<128x384xbf16>
    %cst_72 = arith.constant dense<0.000000e+00> : vector<16x384xf32>
    %181 = tpu.matmul %178, %180, %cst_72 {dimension_numbers = #tpu.dot_dimension_numbers<[1], [0], [0], [1], [0, 0, 1, 1], [], []>} : vector<16x128xbf16>, vector<128x384xbf16>, vector<16x384xf32> -> vector<16x384xf32>
    %c1_73 = arith.constant 1 : index
    %c0_74 = arith.constant 0 : index
    %c0_75 = arith.constant 0 : index
    %182 = vector.load %arg7[%c1_73, %c0_74, %c0_75] : memref<2x1x384xf32, #tpu.memory_space<vmem>>, vector<1x1x384xf32>
    %183 = vector.shape_cast %182 : vector<1x1x384xf32> to vector<1x384xf32>
    %184 = vector.broadcast %183 : vector<1x384xf32> to vector<16x384xf32>
    %185 = arith.addf %181, %184 : vector<16x384xf32>
    %186 = vector.extract_strided_slice %185 {offsets = [0, 0], sizes = [16, 128], strides = [1, 1]} : vector<16x384xf32> to vector<16x128xf32>
    %187 = arith.truncf %186 : vector<16x128xf32> to vector<16x128xbf16>
    %188 = vector.shape_cast %187 : vector<16x128xbf16> to vector<1x16x128xbf16>
    %189 = vector.extract_strided_slice %185 {offsets = [0, 128], sizes = [16, 128], strides = [1, 1]} : vector<16x384xf32> to vector<16x128xf32>
    %190 = arith.truncf %189 : vector<16x128xf32> to vector<16x128xbf16>
    %191 = vector.shape_cast %190 : vector<16x128xbf16> to vector<1x16x128xbf16>
    %192 = vector.extract_strided_slice %185 {offsets = [0, 256], sizes = [16, 128], strides = [1, 1]} : vector<16x384xf32> to vector<16x128xf32>
    %193 = arith.truncf %192 : vector<16x128xf32> to vector<16x128xbf16>
    %194 = vector.shape_cast %193 : vector<16x128xbf16> to vector<1x16x128xbf16>
    %195 = vector.extract_strided_slice %188 {offsets = [0, 0, 0], sizes = [1, 16, 32], strides = [1, 1, 1]} : vector<1x16x128xbf16> to vector<1x16x32xbf16>
    %196 = vector.extract_strided_slice %191 {offsets = [0, 0, 0], sizes = [1, 16, 32], strides = [1, 1, 1]} : vector<1x16x128xbf16> to vector<1x16x32xbf16>
    %197 = vector.extract_strided_slice %194 {offsets = [0, 0, 0], sizes = [1, 16, 32], strides = [1, 1, 1]} : vector<1x16x128xbf16> to vector<1x16x32xbf16>
    "tpu.trace_start"() <{level = 10 : i32, message = "bqd,bkd->bqk"}> : () -> ()
    %cst_76 = arith.constant dense<0.000000e+00> : vector<1x16x16xf32>
    %198 = tpu.matmul %195, %196, %cst_76 {dimension_numbers = #tpu.dot_dimension_numbers<[2], [2], [1], [1], [0, 0, 0, 1, 1, 1], [0], [0]>} : vector<1x16x32xbf16>, vector<1x16x32xbf16>, vector<1x16x16xf32> -> vector<1x16x16xf32>
    "tpu.trace_stop"() : () -> ()
    %cst_77 = arith.constant 0.176776692 : f32
    %199 = vector.broadcast %cst_77 : f32 to vector<1x16x16xf32>
    %200 = arith.mulf %198, %199 : vector<1x16x16xf32>
    %cst_78 = arith.constant dense<0xFF800000> : vector<1x16xf32>
    %201 = vector.multi_reduction <maximumf>, %200, %cst_78 [2] : vector<1x16x16xf32> to vector<1x16xf32>
    %202 = vector.shape_cast %201 : vector<1x16xf32> to vector<1x16x1xf32>
    %203 = vector.broadcast %202 : vector<1x16x1xf32> to vector<1x16x16xf32>
    %204 = arith.subf %200, %203 : vector<1x16x16xf32>
    %205 = math.exp %204 : vector<1x16x16xf32>
    %cst_79 = arith.constant dense<0.000000e+00> : vector<1x16xf32>
    %206 = vector.multi_reduction <add>, %205, %cst_79 [2] : vector<1x16x16xf32> to vector<1x16xf32>
    %207 = vector.shape_cast %206 : vector<1x16xf32> to vector<1x16x1xf32>
    %208 = vector.broadcast %207 : vector<1x16x1xf32> to vector<1x16x16xf32>
    %209 = arith.divf %205, %208 : vector<1x16x16xf32>
    %210 = arith.truncf %209 : vector<1x16x16xf32> to vector<1x16x16xbf16>
    "tpu.trace_start"() <{level = 10 : i32, message = "bqk,bkd->bqd"}> : () -> ()
    %cst_80 = arith.constant dense<0.000000e+00> : vector<1x16x32xf32>
    %211 = tpu.matmul %210, %197, %cst_80 {dimension_numbers = #tpu.dot_dimension_numbers<[2], [1], [1], [2], [0, 0, 0, 1, 1, 2], [0], [0]>} : vector<1x16x16xbf16>, vector<1x16x32xbf16>, vector<1x16x32xf32> -> vector<1x16x32xf32>
    "tpu.trace_stop"() : () -> ()
    %212 = vector.extract_strided_slice %188 {offsets = [0, 0, 32], sizes = [1, 16, 32], strides = [1, 1, 1]} : vector<1x16x128xbf16> to vector<1x16x32xbf16>
    %213 = vector.extract_strided_slice %191 {offsets = [0, 0, 32], sizes = [1, 16, 32], strides = [1, 1, 1]} : vector<1x16x128xbf16> to vector<1x16x32xbf16>
    %214 = vector.extract_strided_slice %194 {offsets = [0, 0, 32], sizes = [1, 16, 32], strides = [1, 1, 1]} : vector<1x16x128xbf16> to vector<1x16x32xbf16>
    "tpu.trace_start"() <{level = 10 : i32, message = "bqd,bkd->bqk"}> : () -> ()
    %cst_81 = arith.constant dense<0.000000e+00> : vector<1x16x16xf32>
    %215 = tpu.matmul %212, %213, %cst_81 {dimension_numbers = #tpu.dot_dimension_numbers<[2], [2], [1], [1], [0, 0, 0, 1, 1, 1], [0], [0]>} : vector<1x16x32xbf16>, vector<1x16x32xbf16>, vector<1x16x16xf32> -> vector<1x16x16xf32>
    "tpu.trace_stop"() : () -> ()
    %cst_82 = arith.constant 0.176776692 : f32
    %216 = vector.broadcast %cst_82 : f32 to vector<1x16x16xf32>
    %217 = arith.mulf %215, %216 : vector<1x16x16xf32>
    %cst_83 = arith.constant dense<0xFF800000> : vector<1x16xf32>
    %218 = vector.multi_reduction <maximumf>, %217, %cst_83 [2] : vector<1x16x16xf32> to vector<1x16xf32>
    %219 = vector.shape_cast %218 : vector<1x16xf32> to vector<1x16x1xf32>
    %220 = vector.broadcast %219 : vector<1x16x1xf32> to vector<1x16x16xf32>
    %221 = arith.subf %217, %220 : vector<1x16x16xf32>
    %222 = math.exp %221 : vector<1x16x16xf32>
    %cst_84 = arith.constant dense<0.000000e+00> : vector<1x16xf32>
    %223 = vector.multi_reduction <add>, %222, %cst_84 [2] : vector<1x16x16xf32> to vector<1x16xf32>
    %224 = vector.shape_cast %223 : vector<1x16xf32> to vector<1x16x1xf32>
    %225 = vector.broadcast %224 : vector<1x16x1xf32> to vector<1x16x16xf32>
    %226 = arith.divf %222, %225 : vector<1x16x16xf32>
    %227 = arith.truncf %226 : vector<1x16x16xf32> to vector<1x16x16xbf16>
    "tpu.trace_start"() <{level = 10 : i32, message = "bqk,bkd->bqd"}> : () -> ()
    %cst_85 = arith.constant dense<0.000000e+00> : vector<1x16x32xf32>
    %228 = tpu.matmul %227, %214, %cst_85 {dimension_numbers = #tpu.dot_dimension_numbers<[2], [1], [1], [2], [0, 0, 0, 1, 1, 2], [0], [0]>} : vector<1x16x16xbf16>, vector<1x16x32xbf16>, vector<1x16x32xf32> -> vector<1x16x32xf32>
    "tpu.trace_stop"() : () -> ()
    %229 = vector.extract_strided_slice %188 {offsets = [0, 0, 64], sizes = [1, 16, 32], strides = [1, 1, 1]} : vector<1x16x128xbf16> to vector<1x16x32xbf16>
    %230 = vector.extract_strided_slice %191 {offsets = [0, 0, 64], sizes = [1, 16, 32], strides = [1, 1, 1]} : vector<1x16x128xbf16> to vector<1x16x32xbf16>
    %231 = vector.extract_strided_slice %194 {offsets = [0, 0, 64], sizes = [1, 16, 32], strides = [1, 1, 1]} : vector<1x16x128xbf16> to vector<1x16x32xbf16>
    "tpu.trace_start"() <{level = 10 : i32, message = "bqd,bkd->bqk"}> : () -> ()
    %cst_86 = arith.constant dense<0.000000e+00> : vector<1x16x16xf32>
    %232 = tpu.matmul %229, %230, %cst_86 {dimension_numbers = #tpu.dot_dimension_numbers<[2], [2], [1], [1], [0, 0, 0, 1, 1, 1], [0], [0]>} : vector<1x16x32xbf16>, vector<1x16x32xbf16>, vector<1x16x16xf32> -> vector<1x16x16xf32>
    "tpu.trace_stop"() : () -> ()
    %cst_87 = arith.constant 0.176776692 : f32
    %233 = vector.broadcast %cst_87 : f32 to vector<1x16x16xf32>
    %234 = arith.mulf %232, %233 : vector<1x16x16xf32>
    %cst_88 = arith.constant dense<0xFF800000> : vector<1x16xf32>
    %235 = vector.multi_reduction <maximumf>, %234, %cst_88 [2] : vector<1x16x16xf32> to vector<1x16xf32>
    %236 = vector.shape_cast %235 : vector<1x16xf32> to vector<1x16x1xf32>
    %237 = vector.broadcast %236 : vector<1x16x1xf32> to vector<1x16x16xf32>
    %238 = arith.subf %234, %237 : vector<1x16x16xf32>
    %239 = math.exp %238 : vector<1x16x16xf32>
    %cst_89 = arith.constant dense<0.000000e+00> : vector<1x16xf32>
    %240 = vector.multi_reduction <add>, %239, %cst_89 [2] : vector<1x16x16xf32> to vector<1x16xf32>
    %241 = vector.shape_cast %240 : vector<1x16xf32> to vector<1x16x1xf32>
    %242 = vector.broadcast %241 : vector<1x16x1xf32> to vector<1x16x16xf32>
    %243 = arith.divf %239, %242 : vector<1x16x16xf32>
    %244 = arith.truncf %243 : vector<1x16x16xf32> to vector<1x16x16xbf16>
    "tpu.trace_start"() <{level = 10 : i32, message = "bqk,bkd->bqd"}> : () -> ()
    %cst_90 = arith.constant dense<0.000000e+00> : vector<1x16x32xf32>
    %245 = tpu.matmul %244, %231, %cst_90 {dimension_numbers = #tpu.dot_dimension_numbers<[2], [1], [1], [2], [0, 0, 0, 1, 1, 2], [0], [0]>} : vector<1x16x16xbf16>, vector<1x16x32xbf16>, vector<1x16x32xf32> -> vector<1x16x32xf32>
    "tpu.trace_stop"() : () -> ()
    %246 = vector.extract_strided_slice %188 {offsets = [0, 0, 96], sizes = [1, 16, 32], strides = [1, 1, 1]} : vector<1x16x128xbf16> to vector<1x16x32xbf16>
    %247 = vector.extract_strided_slice %191 {offsets = [0, 0, 96], sizes = [1, 16, 32], strides = [1, 1, 1]} : vector<1x16x128xbf16> to vector<1x16x32xbf16>
    %248 = vector.extract_strided_slice %194 {offsets = [0, 0, 96], sizes = [1, 16, 32], strides = [1, 1, 1]} : vector<1x16x128xbf16> to vector<1x16x32xbf16>
    "tpu.trace_start"() <{level = 10 : i32, message = "bqd,bkd->bqk"}> : () -> ()
    %cst_91 = arith.constant dense<0.000000e+00> : vector<1x16x16xf32>
    %249 = tpu.matmul %246, %247, %cst_91 {dimension_numbers = #tpu.dot_dimension_numbers<[2], [2], [1], [1], [0, 0, 0, 1, 1, 1], [0], [0]>} : vector<1x16x32xbf16>, vector<1x16x32xbf16>, vector<1x16x16xf32> -> vector<1x16x16xf32>
    "tpu.trace_stop"() : () -> ()
    %cst_92 = arith.constant 0.176776692 : f32
    %250 = vector.broadcast %cst_92 : f32 to vector<1x16x16xf32>
    %251 = arith.mulf %249, %250 : vector<1x16x16xf32>
    %cst_93 = arith.constant dense<0xFF800000> : vector<1x16xf32>
    %252 = vector.multi_reduction <maximumf>, %251, %cst_93 [2] : vector<1x16x16xf32> to vector<1x16xf32>
    %253 = vector.shape_cast %252 : vector<1x16xf32> to vector<1x16x1xf32>
    %254 = vector.broadcast %253 : vector<1x16x1xf32> to vector<1x16x16xf32>
    %255 = arith.subf %251, %254 : vector<1x16x16xf32>
    %256 = math.exp %255 : vector<1x16x16xf32>
    %cst_94 = arith.constant dense<0.000000e+00> : vector<1x16xf32>
    %257 = vector.multi_reduction <add>, %256, %cst_94 [2] : vector<1x16x16xf32> to vector<1x16xf32>
    %258 = vector.shape_cast %257 : vector<1x16xf32> to vector<1x16x1xf32>
    %259 = vector.broadcast %258 : vector<1x16x1xf32> to vector<1x16x16xf32>
    %260 = arith.divf %256, %259 : vector<1x16x16xf32>
    %261 = arith.truncf %260 : vector<1x16x16xf32> to vector<1x16x16xbf16>
    "tpu.trace_start"() <{level = 10 : i32, message = "bqk,bkd->bqd"}> : () -> ()
    %cst_95 = arith.constant dense<0.000000e+00> : vector<1x16x32xf32>
    %262 = tpu.matmul %261, %248, %cst_95 {dimension_numbers = #tpu.dot_dimension_numbers<[2], [1], [1], [2], [0, 0, 0, 1, 1, 2], [0], [0]>} : vector<1x16x16xbf16>, vector<1x16x32xbf16>, vector<1x16x32xf32> -> vector<1x16x32xf32>
    "tpu.trace_stop"() : () -> ()
    %263 = tpu.concatenate %211, %228, %245, %262 in 2 : vector<1x16x32xf32>, vector<1x16x32xf32>, vector<1x16x32xf32>, vector<1x16x32xf32> -> vector<1x16x128xf32>
    %264 = vector.shape_cast %263 : vector<1x16x128xf32> to vector<16x128xf32>
    %265 = arith.truncf %264 : vector<16x128xf32> to vector<16x128xbf16>
    %c1_96 = arith.constant 1 : index
    %c0_97 = arith.constant 0 : index
    %c0_98 = arith.constant 0 : index
    %266 = vector.load %arg8[%c1_96, %c0_97, %c0_98] : memref<2x128x128xbf16, #tpu.memory_space<vmem>>, vector<1x128x128xbf16>
    %267 = vector.shape_cast %266 : vector<1x128x128xbf16> to vector<128x128xbf16>
    %cst_99 = arith.constant dense<0.000000e+00> : vector<16x128xf32>
    %268 = tpu.matmul %265, %267, %cst_99 {dimension_numbers = #tpu.dot_dimension_numbers<[1], [0], [0], [1], [0, 0, 1, 1], [], []>} : vector<16x128xbf16>, vector<128x128xbf16>, vector<16x128xf32> -> vector<16x128xf32>
    %c1_100 = arith.constant 1 : index
    %c0_101 = arith.constant 0 : index
    %c0_102 = arith.constant 0 : index
    %269 = vector.load %arg9[%c1_100, %c0_101, %c0_102] : memref<2x1x128xf32, #tpu.memory_space<vmem>>, vector<1x1x128xf32>
    %270 = vector.shape_cast %269 : vector<1x1x128xf32> to vector<1x128xf32>
    %271 = vector.broadcast %270 : vector<1x128xf32> to vector<16x128xf32>
    %272 = arith.addf %268, %271 : vector<16x128xf32>
    %c1_103 = arith.constant 1 : index
    %c0_104 = arith.constant 0 : index
    %c0_105 = arith.constant 0 : index
    %273 = vector.load %arg10[%c1_103, %c0_104, %c0_105] : memref<2x4x128xf32, #tpu.memory_space<vmem>>, vector<1x4x128xf32>
    %274 = vector.shape_cast %273 : vector<1x4x128xf32> to vector<4x128xf32>
    %275 = arith.addf %177, %272 : vector<16x128xf32>
    %276 = vector.extract_strided_slice %274 {offsets = [0, 0], sizes = [1, 128], strides = [1, 1]} : vector<4x128xf32> to vector<1x128xf32>
    %277 = vector.extract_strided_slice %274 {offsets = [1, 0], sizes = [1, 128], strides = [1, 1]} : vector<4x128xf32> to vector<1x128xf32>
    %cst_106 = arith.constant dense<0.000000e+00> : vector<16xf32>
    %278 = vector.multi_reduction <add>, %275, %cst_106 [1] : vector<16x128xf32> to vector<16xf32>
    %279 = vector.shape_cast %278 : vector<16xf32> to vector<16x1xf32>
    %cst_107 = arith.constant 1.280000e+02 : f32
    %280 = vector.broadcast %cst_107 : f32 to vector<16x1xf32>
    %281 = arith.divf %279, %280 : vector<16x1xf32>
    %282 = vector.broadcast %281 : vector<16x1xf32> to vector<16x128xf32>
    %283 = arith.subf %275, %282 : vector<16x128xf32>
    %284 = arith.mulf %283, %283 : vector<16x128xf32>
    %cst_108 = arith.constant dense<0.000000e+00> : vector<16xf32>
    %285 = vector.multi_reduction <add>, %284, %cst_108 [1] : vector<16x128xf32> to vector<16xf32>
    %286 = vector.shape_cast %285 : vector<16xf32> to vector<16x1xf32>
    %cst_109 = arith.constant 1.280000e+02 : f32
    %287 = vector.broadcast %cst_109 : f32 to vector<16x1xf32>
    %288 = arith.divf %286, %287 : vector<16x1xf32>
    %289 = vector.broadcast %281 : vector<16x1xf32> to vector<16x128xf32>
    %290 = arith.subf %275, %289 : vector<16x128xf32>
    %cst_110 = arith.constant 9.99999974E-6 : f32
    %291 = vector.broadcast %cst_110 : f32 to vector<16x1xf32>
    %292 = arith.addf %288, %291 : vector<16x1xf32>
    %293 = math.rsqrt %292 : vector<16x1xf32>
    %294 = vector.broadcast %293 : vector<16x1xf32> to vector<16x128xf32>
    %295 = arith.mulf %290, %294 : vector<16x128xf32>
    %296 = vector.broadcast %276 : vector<1x128xf32> to vector<16x128xf32>
    %297 = arith.mulf %295, %296 : vector<16x128xf32>
    %298 = vector.broadcast %277 : vector<1x128xf32> to vector<16x128xf32>
    %299 = arith.addf %297, %298 : vector<16x128xf32>
    %300 = arith.truncf %299 : vector<16x128xf32> to vector<16x128xbf16>
    %c1_111 = arith.constant 1 : index
    %c0_112 = arith.constant 0 : index
    %c0_113 = arith.constant 0 : index
    %301 = vector.load %arg11[%c1_111, %c0_112, %c0_113] : memref<2x128x128xbf16, #tpu.memory_space<vmem>>, vector<1x128x128xbf16>
    %302 = vector.shape_cast %301 : vector<1x128x128xbf16> to vector<128x128xbf16>
    %cst_114 = arith.constant dense<0.000000e+00> : vector<16x128xf32>
    %303 = tpu.matmul %300, %302, %cst_114 {dimension_numbers = #tpu.dot_dimension_numbers<[1], [0], [0], [1], [0, 0, 1, 1], [], []>} : vector<16x128xbf16>, vector<128x128xbf16>, vector<16x128xf32> -> vector<16x128xf32>
    %c1_115 = arith.constant 1 : index
    %c0_116 = arith.constant 0 : index
    %c0_117 = arith.constant 0 : index
    %304 = vector.load %arg12[%c1_115, %c0_116, %c0_117] : memref<2x1x128xf32, #tpu.memory_space<vmem>>, vector<1x1x128xf32>
    %305 = vector.shape_cast %304 : vector<1x1x128xf32> to vector<1x128xf32>
    %306 = vector.broadcast %305 : vector<1x128xf32> to vector<16x128xf32>
    %307 = arith.addf %303, %306 : vector<16x128xf32>
    %cst_118 = arith.constant 0.000000e+00 : f32
    %308 = vector.broadcast %cst_118 : f32 to vector<16x128xf32>
    %309 = arith.maximumf %307, %308 : vector<16x128xf32>
    %310 = arith.truncf %309 : vector<16x128xf32> to vector<16x128xbf16>
    %c1_119 = arith.constant 1 : index
    %c0_120 = arith.constant 0 : index
    %c0_121 = arith.constant 0 : index
    %311 = vector.load %arg13[%c1_119, %c0_120, %c0_121] : memref<2x128x128xbf16, #tpu.memory_space<vmem>>, vector<1x128x128xbf16>
    %312 = vector.shape_cast %311 : vector<1x128x128xbf16> to vector<128x128xbf16>
    %cst_122 = arith.constant dense<0.000000e+00> : vector<16x128xf32>
    %313 = tpu.matmul %310, %312, %cst_122 {dimension_numbers = #tpu.dot_dimension_numbers<[1], [0], [0], [1], [0, 0, 1, 1], [], []>} : vector<16x128xbf16>, vector<128x128xbf16>, vector<16x128xf32> -> vector<16x128xf32>
    %c1_123 = arith.constant 1 : index
    %c0_124 = arith.constant 0 : index
    %c0_125 = arith.constant 0 : index
    %314 = vector.load %arg14[%c1_123, %c0_124, %c0_125] : memref<2x1x128xf32, #tpu.memory_space<vmem>>, vector<1x1x128xf32>
    %315 = vector.shape_cast %314 : vector<1x1x128xf32> to vector<1x128xf32>
    %316 = vector.broadcast %315 : vector<1x128xf32> to vector<16x128xf32>
    %317 = arith.addf %313, %316 : vector<16x128xf32>
    %318 = arith.addf %299, %317 : vector<16x128xf32>
    %319 = vector.extract_strided_slice %274 {offsets = [2, 0], sizes = [1, 128], strides = [1, 1]} : vector<4x128xf32> to vector<1x128xf32>
    %320 = vector.extract_strided_slice %274 {offsets = [3, 0], sizes = [1, 128], strides = [1, 1]} : vector<4x128xf32> to vector<1x128xf32>
    %cst_126 = arith.constant dense<0.000000e+00> : vector<16xf32>
    %321 = vector.multi_reduction <add>, %318, %cst_126 [1] : vector<16x128xf32> to vector<16xf32>
    %322 = vector.shape_cast %321 : vector<16xf32> to vector<16x1xf32>
    %cst_127 = arith.constant 1.280000e+02 : f32
    %323 = vector.broadcast %cst_127 : f32 to vector<16x1xf32>
    %324 = arith.divf %322, %323 : vector<16x1xf32>
    %325 = vector.broadcast %324 : vector<16x1xf32> to vector<16x128xf32>
    %326 = arith.subf %318, %325 : vector<16x128xf32>
    %327 = arith.mulf %326, %326 : vector<16x128xf32>
    %cst_128 = arith.constant dense<0.000000e+00> : vector<16xf32>
    %328 = vector.multi_reduction <add>, %327, %cst_128 [1] : vector<16x128xf32> to vector<16xf32>
    %329 = vector.shape_cast %328 : vector<16xf32> to vector<16x1xf32>
    %cst_129 = arith.constant 1.280000e+02 : f32
    %330 = vector.broadcast %cst_129 : f32 to vector<16x1xf32>
    %331 = arith.divf %329, %330 : vector<16x1xf32>
    %332 = vector.broadcast %324 : vector<16x1xf32> to vector<16x128xf32>
    %333 = arith.subf %318, %332 : vector<16x128xf32>
    %cst_130 = arith.constant 9.99999974E-6 : f32
    %334 = vector.broadcast %cst_130 : f32 to vector<16x1xf32>
    %335 = arith.addf %331, %334 : vector<16x1xf32>
    %336 = math.rsqrt %335 : vector<16x1xf32>
    %337 = vector.broadcast %336 : vector<16x1xf32> to vector<16x128xf32>
    %338 = arith.mulf %333, %337 : vector<16x128xf32>
    %339 = vector.broadcast %319 : vector<1x128xf32> to vector<16x128xf32>
    %340 = arith.mulf %338, %339 : vector<16x128xf32>
    %341 = vector.broadcast %320 : vector<1x128xf32> to vector<16x128xf32>
    %342 = arith.addf %340, %341 : vector<16x128xf32>
    %343 = vector.shape_cast %342 : vector<16x128xf32> to vector<1x16x128xf32>
    %cst_131 = arith.constant dense<0.000000e+00> : vector<1x128xf32>
    %344 = vector.multi_reduction <add>, %343, %cst_131 [1] : vector<1x16x128xf32> to vector<1x128xf32>
    %cst_132 = arith.constant 1.600000e+01 : f32
    %345 = vector.broadcast %cst_132 : f32 to vector<1x128xf32>
    %346 = arith.divf %344, %345 : vector<1x128xf32>
    %c0_133 = arith.constant 0 : index
    %c0_134 = arith.constant 0 : index
    %c0_135 = arith.constant 0 : index
    %347 = vector.load %arg2[%c0_133, %c0_134, %c0_135] : memref<1x1x30xf32, #tpu.memory_space<vmem>>, vector<1x1x30xf32>
    %348 = vector.shape_cast %347 : vector<1x1x30xf32> to vector<1x30xf32>
    %349 = arith.truncf %348 : vector<1x30xf32> to vector<1x30xbf16>
    %c0_136 = arith.constant 0 : index
    %c0_137 = arith.constant 0 : index
    %350 = vector.load %arg15[%c0_136, %c0_137] : memref<30x128xbf16, #tpu.memory_space<vmem>>, vector<30x128xbf16>
    %cst_138 = arith.constant dense<0.000000e+00> : vector<1x128xf32>
    %351 = tpu.matmul %349, %350, %cst_138 {dimension_numbers = #tpu.dot_dimension_numbers<[1], [0], [0], [1], [0, 0, 1, 1], [], []>} : vector<1x30xbf16>, vector<30x128xbf16>, vector<1x128xf32> -> vector<1x128xf32>
    %c0_139 = arith.constant 0 : index
    %c0_140 = arith.constant 0 : index
    %352 = vector.load %arg16[%c0_139, %c0_140] : memref<1x128xf32, #tpu.memory_space<vmem>>, vector<1x128xf32>
    %353 = arith.addf %351, %352 : vector<1x128xf32>
    %cst_141 = arith.constant 0.000000e+00 : f32
    %354 = vector.broadcast %cst_141 : f32 to vector<1x128xf32>
    %355 = arith.maximumf %353, %354 : vector<1x128xf32>
    %356 = arith.truncf %355 : vector<1x128xf32> to vector<1x128xbf16>
    %c0_142 = arith.constant 0 : index
    %c0_143 = arith.constant 0 : index
    %357 = vector.load %arg17[%c0_142, %c0_143] : memref<128x128xbf16, #tpu.memory_space<vmem>>, vector<128x128xbf16>
    %cst_144 = arith.constant dense<0.000000e+00> : vector<1x128xf32>
    %358 = tpu.matmul %356, %357, %cst_144 {dimension_numbers = #tpu.dot_dimension_numbers<[1], [0], [0], [1], [0, 0, 1, 1], [], []>} : vector<1x128xbf16>, vector<128x128xbf16>, vector<1x128xf32> -> vector<1x128xf32>
    %c0_145 = arith.constant 0 : index
    %c0_146 = arith.constant 0 : index
    %359 = vector.load %arg18[%c0_145, %c0_146] : memref<1x128xf32, #tpu.memory_space<vmem>>, vector<1x128xf32>
    %360 = arith.addf %358, %359 : vector<1x128xf32>
    %361 = arith.truncf %346 : vector<1x128xf32> to vector<1x128xbf16>
    %c0_147 = arith.constant 0 : index
    %c0_148 = arith.constant 0 : index
    %362 = vector.load %arg19[%c0_147, %c0_148] : memref<128x128xbf16, #tpu.memory_space<vmem>>, vector<128x128xbf16>
    %cst_149 = arith.constant dense<0.000000e+00> : vector<1x128xf32>
    %363 = tpu.matmul %361, %362, %cst_149 {dimension_numbers = #tpu.dot_dimension_numbers<[1], [0], [0], [1], [0, 0, 1, 1], [], []>} : vector<1x128xbf16>, vector<128x128xbf16>, vector<1x128xf32> -> vector<1x128xf32>
    %364 = arith.truncf %360 : vector<1x128xf32> to vector<1x128xbf16>
    %c0_150 = arith.constant 0 : index
    %c0_151 = arith.constant 0 : index
    %365 = vector.load %arg20[%c0_150, %c0_151] : memref<128x128xbf16, #tpu.memory_space<vmem>>, vector<128x128xbf16>
    %cst_152 = arith.constant dense<0.000000e+00> : vector<1x128xf32>
    %366 = tpu.matmul %364, %365, %cst_152 {dimension_numbers = #tpu.dot_dimension_numbers<[1], [0], [0], [1], [0, 0, 1, 1], [], []>} : vector<1x128xbf16>, vector<128x128xbf16>, vector<1x128xf32> -> vector<1x128xf32>
    %367 = arith.addf %363, %366 : vector<1x128xf32>
    %c0_153 = arith.constant 0 : index
    %c0_154 = arith.constant 0 : index
    %368 = vector.load %arg21[%c0_153, %c0_154] : memref<1x128xf32, #tpu.memory_space<vmem>>, vector<1x128xf32>
    %369 = arith.addf %367, %368 : vector<1x128xf32>
    %cst_155 = arith.constant 0.000000e+00 : f32
    %370 = vector.broadcast %cst_155 : f32 to vector<1x128xf32>
    %371 = arith.maximumf %369, %370 : vector<1x128xf32>
    %372 = arith.truncf %371 : vector<1x128xf32> to vector<1x128xbf16>
    %c0_156 = arith.constant 0 : index
    %c0_157 = arith.constant 0 : index
    %373 = vector.load %arg22[%c0_156, %c0_157] : memref<128x128xbf16, #tpu.memory_space<vmem>>, vector<128x128xbf16>
    %cst_158 = arith.constant dense<0.000000e+00> : vector<1x128xf32>
    %374 = tpu.matmul %372, %373, %cst_158 {dimension_numbers = #tpu.dot_dimension_numbers<[1], [0], [0], [1], [0, 0, 1, 1], [], []>} : vector<1x128xbf16>, vector<128x128xbf16>, vector<1x128xf32> -> vector<1x128xf32>
    %c0_159 = arith.constant 0 : index
    %c0_160 = arith.constant 0 : index
    %375 = vector.load %arg23[%c0_159, %c0_160] : memref<1x128xf32, #tpu.memory_space<vmem>>, vector<1x128xf32>
    %376 = arith.addf %374, %375 : vector<1x128xf32>
    %cst_161 = arith.constant 0.000000e+00 : f32
    %377 = vector.broadcast %cst_161 : f32 to vector<1x128xf32>
    %378 = arith.maximumf %376, %377 : vector<1x128xf32>
    %379 = arith.truncf %378 : vector<1x128xf32> to vector<1x128xbf16>
    %c0_162 = arith.constant 0 : index
    %c0_163 = arith.constant 0 : index
    %380 = vector.load %arg24[%c0_162, %c0_163] : memref<128x128xbf16, #tpu.memory_space<vmem>>, vector<128x128xbf16>
    %cst_164 = arith.constant dense<0.000000e+00> : vector<1x128xf32>
    %381 = tpu.matmul %379, %380, %cst_164 {dimension_numbers = #tpu.dot_dimension_numbers<[1], [0], [0], [1], [0, 0, 1, 1], [], []>} : vector<1x128xbf16>, vector<128x128xbf16>, vector<1x128xf32> -> vector<1x128xf32>
    %c0_165 = arith.constant 0 : index
    %c0_166 = arith.constant 0 : index
    %382 = vector.load %arg25[%c0_165, %c0_166] : memref<1x128xf32, #tpu.memory_space<vmem>>, vector<1x128xf32>
    %383 = arith.addf %381, %382 : vector<1x128xf32>
    %384 = vector.shape_cast %383 : vector<1x128xf32> to vector<1x1x128xf32>
    %c0_167 = arith.constant 0 : index
    %c0_168 = arith.constant 0 : index
    %c0_169 = arith.constant 0 : index
    %385 = vector.load %arg26[%c0_167, %c0_168, %c0_169] : memref<1x1x128xf32, #tpu.memory_space<vmem>>, vector<1x1x128xf32>
    tpu.vector_store %arg26[%c0_167, %c0_168, %c0_169], %384 {strides = array<i32>} : memref<1x1x128xf32, #tpu.memory_space<vmem>>, vector<1x1x128xf32>,
    return
  }
  func.func @transform_0(%arg0: i32) -> (i32, i32, i32) {
    %c0_i32 = arith.constant 0 : i32
    %c0_i32_0 = arith.constant 0 : i32
    %c0_i32_1 = arith.constant 0 : i32
    return %arg0, %c0_i32, %c0_i32_0 : i32, i32, i32
  }
  func.func @transform_1(%arg0: i32) -> (i32, i32, i32) {
    %c0_i32 = arith.constant 0 : i32
    %c0_i32_0 = arith.constant 0 : i32
    %c0_i32_1 = arith.constant 0 : i32
    return %arg0, %c0_i32, %c0_i32_0 : i32, i32, i32
  }
  func.func @transform_2(%arg0: i32) -> (i32, i32) {
    %c0_i32 = arith.constant 0 : i32
    %c0_i32_0 = arith.constant 0 : i32
    %c0_i32_1 = arith.constant 0 : i32
    return %c0_i32, %c0_i32_0 : i32, i32
  }
  func.func @transform_3(%arg0: i32) -> (i32, i32) {
    %c0_i32 = arith.constant 0 : i32
    %c0_i32_0 = arith.constant 0 : i32
    %c0_i32_1 = arith.constant 0 : i32
    return %c0_i32, %c0_i32_0 : i32, i32
  }
  func.func @transform_4(%arg0: i32) -> (i32, i32) {
    %c0_i32 = arith.constant 0 : i32
    %c0_i32_0 = arith.constant 0 : i32
    %c0_i32_1 = arith.constant 0 : i32
    return %c0_i32, %c0_i32_0 : i32, i32
  }
  func.func @transform_5(%arg0: i32) -> (i32, i32, i32) {
    %c0_i32 = arith.constant 0 : i32
    %c0_i32_0 = arith.constant 0 : i32
    %c0_i32_1 = arith.constant 0 : i32
    %c0_i32_2 = arith.constant 0 : i32
    return %c0_i32, %c0_i32_0, %c0_i32_1 : i32, i32, i32
  }
  func.func @transform_6(%arg0: i32) -> (i32, i32, i32) {
    %c0_i32 = arith.constant 0 : i32
    %c0_i32_0 = arith.constant 0 : i32
    %c0_i32_1 = arith.constant 0 : i32
    %c0_i32_2 = arith.constant 0 : i32
    return %c0_i32, %c0_i32_0, %c0_i32_1 : i32, i32, i32
  }
  func.func @transform_7(%arg0: i32) -> (i32, i32, i32) {
    %c0_i32 = arith.constant 0 : i32
    %c0_i32_0 = arith.constant 0 : i32
    %c0_i32_1 = arith.constant 0 : i32
    %c0_i32_2 = arith.constant 0 : i32
    return %c0_i32, %c0_i32_0, %c0_i32_1 : i32, i32, i32
  }
  func.func @transform_8(%arg0: i32) -> (i32, i32, i32) {
    %c0_i32 = arith.constant 0 : i32
    %c0_i32_0 = arith.constant 0 : i32
    %c0_i32_1 = arith.constant 0 : i32
    %c0_i32_2 = arith.constant 0 : i32
    return %c0_i32, %c0_i32_0, %c0_i32_1 : i32, i32, i32
  }
  func.func @transform_9(%arg0: i32) -> (i32, i32, i32) {
    %c0_i32 = arith.constant 0 : i32
    %c0_i32_0 = arith.constant 0 : i32
    %c0_i32_1 = arith.constant 0 : i32
    %c0_i32_2 = arith.constant 0 : i32
    return %c0_i32, %c0_i32_0, %c0_i32_1 : i32, i32, i32
  }
  func.func @transform_10(%arg0: i32) -> (i32, i32, i32) {
    %c0_i32 = arith.constant 0 : i32
    %c0_i32_0 = arith.constant 0 : i32
    %c0_i32_1 = arith.constant 0 : i32
    %c0_i32_2 = arith.constant 0 : i32
    return %c0_i32, %c0_i32_0, %c0_i32_1 : i32, i32, i32
  }
  func.func @transform_11(%arg0: i32) -> (i32, i32, i32) {
    %c0_i32 = arith.constant 0 : i32
    %c0_i32_0 = arith.constant 0 : i32
    %c0_i32_1 = arith.constant 0 : i32
    %c0_i32_2 = arith.constant 0 : i32
    return %c0_i32, %c0_i32_0, %c0_i32_1 : i32, i32, i32
  }
  func.func @transform_12(%arg0: i32) -> (i32, i32, i32) {
    %c0_i32 = arith.constant 0 : i32
    %c0_i32_0 = arith.constant 0 : i32
    %c0_i32_1 = arith.constant 0 : i32
    %c0_i32_2 = arith.constant 0 : i32
    return %c0_i32, %c0_i32_0, %c0_i32_1 : i32, i32, i32
  }
  func.func @transform_13(%arg0: i32) -> (i32, i32, i32) {
    %c0_i32 = arith.constant 0 : i32
    %c0_i32_0 = arith.constant 0 : i32
    %c0_i32_1 = arith.constant 0 : i32
    %c0_i32_2 = arith.constant 0 : i32
    return %c0_i32, %c0_i32_0, %c0_i32_1 : i32, i32, i32
  }
  func.func @transform_14(%arg0: i32) -> (i32, i32) {
    %c0_i32 = arith.constant 0 : i32
    %c0_i32_0 = arith.constant 0 : i32
    %c0_i32_1 = arith.constant 0 : i32
    return %c0_i32, %c0_i32_0 : i32, i32
  }
  func.func @transform_15(%arg0: i32) -> (i32, i32) {
    %c0_i32 = arith.constant 0 : i32
    %c0_i32_0 = arith.constant 0 : i32
    %c0_i32_1 = arith.constant 0 : i32
    return %c0_i32, %c0_i32_0 : i32, i32
  }
  func.func @transform_16(%arg0: i32) -> (i32, i32) {
    %c0_i32 = arith.constant 0 : i32
    %c0_i32_0 = arith.constant 0 : i32
    %c0_i32_1 = arith.constant 0 : i32
    return %c0_i32, %c0_i32_0 : i32, i32
  }
  func.func @transform_17(%arg0: i32) -> (i32, i32) {
    %c0_i32 = arith.constant 0 : i32
    %c0_i32_0 = arith.constant 0 : i32
    %c0_i32_1 = arith.constant 0 : i32
    return %c0_i32, %c0_i32_0 : i32, i32
  }
  func.func @transform_18(%arg0: i32) -> (i32, i32) {
    %c0_i32 = arith.constant 0 : i32
    %c0_i32_0 = arith.constant 0 : i32
    %c0_i32_1 = arith.constant 0 : i32
    return %c0_i32, %c0_i32_0 : i32, i32
  }
  func.func @transform_19(%arg0: i32) -> (i32, i32) {
    %c0_i32 = arith.constant 0 : i32
    %c0_i32_0 = arith.constant 0 : i32
    %c0_i32_1 = arith.constant 0 : i32
    return %c0_i32, %c0_i32_0 : i32, i32
  }
  func.func @transform_20(%arg0: i32) -> (i32, i32) {
    %c0_i32 = arith.constant 0 : i32
    %c0_i32_0 = arith.constant 0 : i32
    %c0_i32_1 = arith.constant 0 : i32
    return %c0_i32, %c0_i32_0 : i32, i32
  }
  func.func @transform_21(%arg0: i32) -> (i32, i32) {
    %c0_i32 = arith.constant 0 : i32
    %c0_i32_0 = arith.constant 0 : i32
    %c0_i32_1 = arith.constant 0 : i32
    return %c0_i32, %c0_i32_0 : i32, i32
  }
  func.func @transform_22(%arg0: i32) -> (i32, i32) {
    %c0_i32 = arith.constant 0 : i32
    %c0_i32_0 = arith.constant 0 : i32
    %c0_i32_1 = arith.constant 0 : i32
    return %c0_i32, %c0_i32_0 : i32, i32
  }
  func.func @transform_23(%arg0: i32) -> (i32, i32) {
    %c0_i32 = arith.constant 0 : i32
    %c0_i32_0 = arith.constant 0 : i32
    %c0_i32_1 = arith.constant 0 : i32
    return %c0_i32, %c0_i32_0 : i32, i32
  }
  func.func @transform_24(%arg0: i32) -> (i32, i32) {
    %c0_i32 = arith.constant 0 : i32
    %c0_i32_0 = arith.constant 0 : i32
    %c0_i32_1 = arith.constant 0 : i32
    return %c0_i32, %c0_i32_0 : i32, i32
  }
  func.func @transform_25(%arg0: i32) -> (i32, i32, i32) {
    %c0_i32 = arith.constant 0 : i32
    %c0_i32_0 = arith.constant 0 : i32
    %c0_i32_1 = arith.constant 0 : i32
    return %arg0, %c0_i32, %c0_i32_0 : i32, i32, i32
  }
}

</mosaic_0001>

<bundles_post_ra>
// kernel: tpu_custom_call.1
= control target key start
LH: loop header
LB: loop body
LE: loop exit
PB: predicated region body
PF: predicated region fallthrough
CT: control target
= control target key end

     0   :  { %s7483_s0 = inlined_call_operand.hbm [shape: f32[2,16,21], index: 0, kind: input, shape index: {}]   ;;  %s7484_s1 = inlined_call_operand.vmem [shape: f32[2,1,30], index: 1, kind: input, shape index: {}]   ;;  %s7485_s2 = inlined_call_operand.hbm [shape: f32[16,128], index: 2, kind: input, shape index: {}]   ;;  %s7486_s3 = inlined_call_operand.hbm [shape: bf16[21,128], index: 3, kind: input, shape index: {}]   ;;  %s7487_s4 = inlined_call_operand.hbm [shape: f32[1,128], index: 4, kind: input, shape index: {}]   ;;  %s7488_s5 = inlined_call_operand.hbm [shape: bf16[2,128,384], index: 5, kind: input, shape index: {}]   ;;  %s7489_s6 = inlined_call_operand.hbm [shape: f32[2,1,384], index: 6, kind: input, shape index: {}]   ;;  %s7490_s7 = inlined_call_operand.hbm [shape: bf16[2,128,128], index: 7, kind: input, shape index: {}]   ;;  %s7491_s8 = inlined_call_operand.vmem [shape: f32[2,1,128], index: 8, kind: input, shape index: {}]   ;;  %s7492_s9 = inlined_call_operand.hbm [shape: f32[2,4,128], index: 9, kind: input, shape index: {}]   ;;  %s7493_s10 = inlined_call_operand.hbm [shape: bf16[2,128,128], index: 10, kind: input, shape index: {}]   ;;  %s7494_s11 = inlined_call_operand.hbm [shape: f32[2,1,128], index: 11, kind: input, shape index: {}]   ;;  %s7495_s12 = inlined_call_operand.hbm [shape: bf16[2,128,128], index: 12, kind: input, shape index: {}]   ;;  %s7496_s13 = inlined_call_operand.hbm [shape: f32[2,1,128], index: 13, kind: input, shape index: {}]   ;;  %s7497_s14 = inlined_call_operand.hbm [shape: bf16[30,128], index: 14, kind: input, shape index: {}]   ;;  %s7498_s15 = inlined_call_operand.hbm [shape: f32[1,128], index: 15, kind: input, shape index: {}]   ;;  %s7499_s16 = inlined_call_operand.hbm [shape: bf16[128,128], index: 16, kind: input, shape index: {}]   ;;  %s7500_s17 = inlined_call_operand.hbm [shape: f32[1,128], index: 17, kind: input, shape index: {}]   ;;  %s7501_s18 = inlined_call_operand.vmem [shape: bf16[128,128], index: 18, kind: input, shape index: {}]   ;;  %s7502_s19 = inlined_call_operand.hbm [shape: bf16[128,128], index: 19, kind: input, shape index: {}]   ;;  %s7503_s20 = inlined_call_operand.vmem [shape: f32[1,128], index: 20, kind: input, shape index: {}]   ;;  %s7504_s21 = inlined_call_operand.hbm [shape: bf16[128,128], index: 21, kind: input, shape index: {}]   ;;  %s7505_s22 = inlined_call_operand.vmem [shape: f32[1,128], index: 22, kind: input, shape index: {}]   ;;  %s7506_s23 = inlined_call_operand.hbm [shape: bf16[128,128], index: 23, kind: input, shape index: {}]   ;;  %s7507_s24 = inlined_call_operand.vmem [shape: f32[1,128], index: 24, kind: input, shape index: {}]   ;;  %s7508_s25 = inlined_call_operand.hbm [shape: f32[2,1,128], index: 25, kind: output, shape index: {}]  }
   0x1   :  { %7541 = sst [smem:[#allocation50_spill]] %s7483_s0 }
   0x2   :  { %7542 = sst [smem:[#allocation51_spill]] %s7484_s1 }
   0x3   :  { %7543 = sst [smem:[#allocation52_spill]] %s7485_s2 }
   0x4   :  { %7544 = sst [smem:[#allocation53_spill]] %s7486_s3 }
   0x5   :  { %7545 = sst [smem:[#allocation54_spill]] %s7487_s4 }
   0x6   :  { %7546 = sst [smem:[#allocation55_spill]] %s7488_s5 }
   0x7   :  { %7547 = sst [smem:[#allocation56_spill]] %s7489_s6 }
   0x8   :  { %7548 = sst [smem:[#allocation57_spill]] %s7490_s7 }
   0x9   :  { %7549 = sst [smem:[#allocation58_spill]] %s7491_s8 }
   0xa   :  { %7550 = sst [smem:[#allocation59_spill]] %s7492_s9 }
   0xb   :  { %7551 = sst [smem:[#allocation60_spill]] %s7494_s11 }
   0xc   :  { %7552 = sst [smem:[#allocation61_spill]] %s7496_s13 }
   0xd   :  { %7553 = sst [smem:[#allocation62_spill]] %s7498_s15 }
   0xe   :  { %7554 = sst [smem:[#allocation63_spill]] %s7500_s17 }
   0xf   :  { %7555 = sst [smem:[#allocation64_spill]] %s7501_s18 }
  0x10   :  { %7556 = sst [smem:[#allocation65_spill]] %s7503_s20 }
  0x11   :  { %7557 = sst [smem:[#allocation66_spill]] %s7505_s22 }
  0x12   :  { %7558 = sst [smem:[#allocation67_spill]] %s7507_s24 }
  0x13   :  { %7559 = sst [smem:[#allocation68_spill]] %s7508_s25 }
  0x14   :  { %30 = vsyncpa [#allocation3], 0 }
  0x15   :  { %32 = vsyncpa [#allocation3 + $0x1], 0 }
  0x16   :  { %33 = vsyncpa [#allocation6], 0 }
  0x17   :  { %34 = vsyncpa [#allocation9], 0 }
  0x18   :  { %35 = vsyncpa [#allocation12], 0 }
  0x19   :  { %36 = vsyncpa [#allocation15], 0 }
  0x1a   :  { %37 = vsyncpa [#allocation18], 0 }
  0x1b   :  { %38 = vsyncpa [#allocation21], 0 }
  0x1c   :  { %39 = vsyncpa [#allocation24], 0 }
  0x1d   :  { %40 = vsyncpa [#allocation27], 0 }
  0x1e   :  { %41 = vsyncpa [#allocation30], 0 }
  0x1f   :  { %42 = vsyncpa [#allocation4], 0 }
  0x20   :  { %44 = vsyncpa [#allocation4 + $0x1], 0  ;;  %s6462_s29 = smov 0   ;;  %s6464_s2 = smov 0  }
  0x21   :  { %s6466_s6 = smov 0   ;;  %s6468_s30 = smov 0  }
  0x22 LB: > { %7560 = sst [smem:[#allocation44_spill]] %s6281_s29  ;;  %s6295_s7 = smov [#allocation5]   ;;  %s6293_s30 = sphi %s6468_s30, %s6888_s30   ;;  %s6289_s6 = sphi %s6466_s6, %s7634_s6   ;;  %s6285_s2 = sphi %s6464_s2, %s7633_s2   ;;  %s6281_s29 = sphi %s6462_s29, %s7632_s29  }
  0x23   : > { %7561 = sst [smem:[#allocation45_spill]] %s6285_s2  ;;  %s628_s3 = sshll.u32 %s6295_s7, 4  ;;  %s6488_s3 = int_to_ptr.vmem [resolvable:$true] %s628_s3 }
  0x24   : > { %7562 = sst [smem:[#allocation46_spill]] %s6289_s6  ;;  %s6483_s26 = sadd.s32 4294967295, %s6293_s30  }
  0x25   : > { %7563 = sst [smem:[#allocation47_spill]] %s6293_s30  ;;  %p4407_p0 = scmp.ge.s32.totalorder %s6293_s30, 1 }
  0x26   : > { %7564 = sst [smem:[#allocation48_spill]] %s6483_s26  ;;  %p7532_p1 = scmp.eq.s32.totalorder %s6483_s26, 0 }
  0x27   : > { %p616_p2 = scmp.lt.s32.totalorder %s6293_s30, 3  ;;  %s6296_s8 = smov [#allocation8]  }
  0x28   : > { %s655_s27 = sshll.u32 %s6296_s8, 4  ;;  %s6297_s28 = smov [#allocation11]   ;;  %s6503_s27 = int_to_ptr.vmem [resolvable:$true] %s655_s27 }
  0x29   : > { %p6490_p3 = pnand %p4407_p0, %p616_p2  ;;  %s678_s9 = sshll.u32 %s6297_s28, 4  ;;  %s6505_s9 = int_to_ptr.vmem [resolvable:$true] %s678_s9 }
  0x2a   : > { %s7568_s7 = sld [smem:[#allocation52_spill]] }
  0x2b   : > { %s7565_s1 = scalar_select %p6490_p3, 1, 0 }
  0x2c   : > { %p5223_p5 = pneg %p6490_p3 }
  0x2d   : > { %7566 = sst [smem:[#allocation49_spill]] %s7565_s1 }
  0x2e   : > { %p6499_p6 = pnand %p5223_p5, %p7532_p1 }
  0x30   : > { %s5657_s25 = scalar_lea.hbm %s7568_s7, 256  ;;  %p6515_p8 = pneg %p6499_p6 }
  0x31   : > { %p5658_p7 = scmp.ne.s32.totalorder %s7568_s7, %s5657_s25  ;;  %p5664_p11 = scmp.lt.u32.totalorder %s5657_s25, %s7568_s7 }
  0x33   : > { %p5660_p9 = pnand %p6515_p8, %p5658_p7 }
  0x35   : > { %p5661_p10 = pneg %p5660_p9 }
  0x37   : > { %p5666_p12 = pnand %p5664_p11, %p5661_p10 }
  0x39   : > { %5669 = shalt.err (!%p5666_p12)
}
  0x3a   : > { %s5670_s22 = scalar_lea.vmem %s6488_s3, 256  ;;  %p5678_p5 = scmp.lt.s32.totalorder %s6488_s3, %s6488_s3 }
  0x3b   : > { %p5671_p13 = scmp.ne.s32.totalorder %s6488_s3, %s5670_s22  ;;  %p5679_p4 = scmp.lt.s32.totalorder %s5670_s22, %s5670_s22 }
  0x3d   : > { %p5673_p0 = pnand %p5671_p13, %p6515_p8  ;;  %p5680_p7 = por %p5679_p4, %p5678_p5 }
  0x3f   : > { %p5674_p2 = pneg %p5673_p0 }
  0x41   : > { %p5681_p9 = pnand %p5680_p7, %p5674_p2 }
  0x43   : > { %5684 = shalt.err (!%p5681_p9)
}
  0x44   : > { %s7525_s24 = smov 128   ;;  %s7526_s20 = smov 8  }
  0x45   : > { %5226 = dma.hbm_to_vmem [thread:$0]  (!%p6499_p6), %s7568_s7, 256, %s6488_s3, [#allocation6], %s7525_s24, %s7525_s24, %s7526_s20  }
  0x46   : > { %s7570_s18 = sld [smem:[#allocation54_spill]] }
  0x4c   : > { %s5685_s22 = scalar_lea.hbm %s7570_s18, 16 }
  0x4d   : > { %p5686_p4 = scmp.ne.s32.totalorder %s7570_s18, %s5685_s22  ;;  %p5692_p12 = scmp.lt.u32.totalorder %s5685_s22, %s7570_s18 }
  0x4f   : > { %p5688_p10 = pnand %p5686_p4, %p6515_p8 }
  0x51   : > { %p5689_p11 = pneg %p5688_p10 }
  0x53   : > { %p5694_p13 = pnand %p5692_p12, %p5689_p11 }
  0x55   : > { %5697 = shalt.err (!%p5694_p13)
}
  0x56   : > { %s5698_s3 = scalar_lea.vmem %s6503_s27, 16  ;;  %s5705_s26 = scalar_lea.vmem %s6503_s27, 32 }
  0x57   : > { %p5699_p0 = scmp.ne.s32.totalorder %s6503_s27, %s5698_s3  ;;  %p5706_p7 = scmp.lt.s32.totalorder %s6503_s27, %s6503_s27 }
  0x58   : > { %p5707_p9 = scmp.lt.s32.totalorder %s5705_s26, %s5698_s3 }
  0x59   : > { %p5701_p2 = pnand %p5699_p0, %p6515_p8 }
  0x5a   : > { %p5708_p4 = por %p5707_p9, %p5706_p7 }
  0x5b   : > { %p5702_p5 = pneg %p5701_p2 }
  0x5d   : > { %p5709_p10 = pnand %p5708_p4, %p5702_p5 }
  0x5f   : > { %5712 = shalt.err (!%p5709_p10)
}
  0x60   : > { %5232 = dma.hbm_to_vmem [thread:$0]  (!%p6499_p6), %s7570_s18, 16, %s6503_s27, [#allocation9]  }
  0x61   : > { %s7571_s5 = sld [smem:[#allocation56_spill]] }
  0x67   : > { %s5713_s0 = scalar_lea.hbm %s7571_s5, 96 }
  0x68   : > { %p5714_p11 = scmp.ne.s32.totalorder %s7571_s5, %s5713_s0  ;;  %p5720_p0 = scmp.lt.u32.totalorder %s5713_s0, %s7571_s5 }
  0x6a   : > { %p5716_p12 = pnand %p5714_p11, %p6515_p8 }
  0x6c   : > { %p5717_p13 = pneg %p5716_p12 }
  0x6e   : > { %p5722_p2 = pnand %p5720_p0, %p5717_p13 }
  0x70   : > { %5725 = shalt.err (!%p5722_p2)
}
  0x71   : > { %s5726_s27 = scalar_lea.vmem %s6505_s9, 96  ;;  %p5734_p4 = scmp.lt.s32.totalorder %s6505_s9, %s6505_s9 }
  0x72   : > { %p5727_p5 = scmp.ne.s32.totalorder %s6505_s9, %s5726_s27  ;;  %p5735_p10 = scmp.lt.s32.totalorder %s5726_s27, %s5726_s27 }
  0x74   : > { %p5729_p7 = pnand %p5727_p5, %p6515_p8  ;;  %p5736_p11 = por %p5735_p10, %p5734_p4 }
  0x76   : > { %p5730_p9 = pneg %p5729_p7 }
  0x78   : > { %p5737_p12 = pnand %p5736_p11, %p5730_p9 }
  0x7a   : > { %5740 = shalt.err (!%p5737_p12)
}
  0x7b   : > { %s6300_s29 = smov 48   ;;  %s6301_s2 = smov 3  }
  0x7c   : > { %5238 = dma.hbm_to_vmem [thread:$0]  (!%p6499_p6), %s7571_s5, 96, %s6505_s9, [#allocation12], %s6300_s29, %s6300_s29, %s6301_s2  }
  0x7d   : > { %s6302_s0 = smov [#allocation14]   ;;  %s6303_s22 = smov [#allocation17]  }
  0x7e   : > { %s707_s28 = sshll.u32 %s6302_s0, 4  ;;  %s733_s3 = sshll.u32 %s6303_s22, 4  ;;  %s708_s28 = int_to_ptr.vmem [resolvable:$true] %s707_s28  ;;  %s734_s3 = int_to_ptr.vmem [resolvable:$true] %s733_s3 }
  0x7f   : > { %s7572_s24 = sld [smem:[#allocation59_spill]] }
  0x85   : > { %s5741_s20 = scalar_lea.hbm %s7572_s24, 128 }
  0x86   : > { %p5742_p13 = scmp.ne.s32.totalorder %s7572_s24, %s5741_s20  ;;  %p5748_p5 = scmp.lt.u32.totalorder %s5741_s20, %s7572_s24 }
  0x88   : > { %p5744_p0 = pnand %p5742_p13, %p6515_p8 }
  0x8a   : > { %p5745_p2 = pneg %p5744_p0 }
  0x8c   : > { %p5750_p7 = pnand %p5748_p5, %p5745_p2 }
  0x8e   : > { %5753 = shalt.err (!%p5750_p7)
}
  0x8f   : > { %s5754_s9 = scalar_lea.vmem %s708_s28, 128  ;;  %p5762_p11 = scmp.lt.s32.totalorder %s708_s28, %s708_s28 }
  0x90   : > { %p5755_p9 = scmp.ne.s32.totalorder %s708_s28, %s5754_s9  ;;  %p5763_p12 = scmp.lt.s32.totalorder %s5754_s9, %s5754_s9 }
  0x92   : > { %p5757_p4 = pnand %p5755_p9, %p6515_p8  ;;  %p5764_p1 = por %p5763_p12, %p5762_p11 }
  0x94   : > { %p5758_p10 = pneg %p5757_p4 }
  0x96   : > { %p5765_p3 = pnand %p5764_p1, %p5758_p10 }
  0x98   : > { %5768 = shalt.err (!%p5765_p3)
}
  0x99   : > { %s7534_s18 = smov 64   ;;  %s7536_s7 = smov 4  }
  0x9a   : > { %5244 = dma.hbm_to_vmem [thread:$0]  (!%p6499_p6), %s7572_s24, 128, %s708_s28, [#allocation15], %s7534_s18, %s7534_s18, %s7536_s7  }
  0x9b   : > { %s7573_s11 = sld [smem:[#allocation60_spill]] }
  0xa1   : > { %s5769_s2 = scalar_lea.hbm %s7573_s11, 32 }
  0xa2   : > { %p5770_p1 = scmp.ne.s32.totalorder %s7573_s11, %s5769_s2  ;;  %p5776_p0 = scmp.lt.u32.totalorder %s5769_s2, %s7573_s11 }
  0xa4   : > { %p5772_p3 = pnand %p5770_p1, %p6515_p8 }
  0xa6   : > { %p5773_p13 = pneg %p5772_p3 }
  0xa8   : > { %p5778_p2 = pnand %p5776_p0, %p5773_p13 }
  0xaa   : > { %5781 = shalt.err (!%p5778_p2)
}
  0xab   : > { %s5782_s26 = scalar_lea.vmem %s734_s3, 32  ;;  %p5790_p4 = scmp.lt.s32.totalorder %s734_s3, %s734_s3 }
  0xac   : > { %p5783_p5 = scmp.ne.s32.totalorder %s734_s3, %s5782_s26  ;;  %p5791_p10 = scmp.lt.s32.totalorder %s5782_s26, %s5782_s26 }
  0xae   : > { %p5785_p7 = pnand %p5783_p5, %p6515_p8  ;;  %p5792_p11 = por %p5791_p10, %p5790_p4 }
  0xb0   : > { %p5786_p9 = pneg %p5785_p7 }
  0xb2   : > { %p5793_p12 = pnand %p5792_p11, %p5786_p9 }
  0xb4   : > { %5796 = shalt.err (!%p5793_p12)
}
  0xb5   : > { %s6306_s28 = smov 16   ;;  %s6307_s27 = smov 1  }
  0xb6   : > { %5250 = dma.hbm_to_vmem [thread:$0]  (!%p6499_p6), %s7573_s11, 32, %s734_s3, [#allocation18], %s6306_s28, %s6306_s28, %s6307_s27  }
  0xb7   : > { %s6308_s30 = smov [#allocation20]   ;;  %s6309_s29 = smov [#allocation23]  }
  0xb8   : > { %s759_s20 = sshll.u32 %s6308_s30, 4  ;;  %s786_s2 = sshll.u32 %s6309_s29, 4  ;;  %s760_s20 = int_to_ptr.vmem [resolvable:$true] %s759_s20  ;;  %s787_s2 = int_to_ptr.vmem [resolvable:$true] %s786_s2 }
  0xb9   : > { %s7574_s13 = sld [smem:[#allocation61_spill]] }
  0xbf   : > { %s5797_s0 = scalar_lea.hbm %s7574_s13, 32 }
  0xc0   : > { %p5798_p1 = scmp.ne.s32.totalorder %s7574_s13, %s5797_s0  ;;  %p5804_p0 = scmp.lt.u32.totalorder %s5797_s0, %s7574_s13 }
  0xc2   : > { %p5800_p3 = pnand %p5798_p1, %p6515_p8 }
  0xc4   : > { %p5801_p13 = pneg %p5800_p3 }
  0xc6   : > { %p5806_p2 = pnand %p5804_p0, %p5801_p13 }
  0xc8   : > { %5809 = shalt.err (!%p5806_p2)
}
  0xc9   : > { %s5810_s3 = scalar_lea.vmem %s760_s20, 32  ;;  %p5818_p4 = scmp.lt.s32.totalorder %s760_s20, %s760_s20 }
  0xca   : > { %p5811_p5 = scmp.ne.s32.totalorder %s760_s20, %s5810_s3  ;;  %p5819_p10 = scmp.lt.s32.totalorder %s5810_s3, %s5810_s3 }
  0xcc   : > { %p5813_p7 = pnand %p5811_p5, %p6515_p8  ;;  %p5820_p11 = por %p5819_p10, %p5818_p4 }
  0xce   : > { %p5814_p9 = pneg %p5813_p7 }
  0xd0   : > { %p5821_p12 = pnand %p5820_p11, %p5814_p9 }
  0xd2   : > { %5824 = shalt.err (!%p5821_p12)
}
  0xd3   : > { %5256 = dma.hbm_to_vmem [thread:$0]  (!%p6499_p6), %s7574_s13, 32, %s760_s20, [#allocation21], %s6306_s28, %s6306_s28, %s6307_s27  }
  0xd4   : > { %s7575_s15 = sld [smem:[#allocation62_spill]] }
  0xda   : > { %s5825_s30 = scalar_lea.hbm %s7575_s15, 16 }
  0xdb   : > { %p5826_p1 = scmp.ne.s32.totalorder %s7575_s15, %s5825_s30  ;;  %p5832_p0 = scmp.lt.u32.totalorder %s5825_s30, %s7575_s15 }
  0xdd   : > { %p5828_p3 = pnand %p5826_p1, %p6515_p8 }
  0xdf   : > { %p5829_p13 = pneg %p5828_p3 }
  0xe1   : > { %p5834_p2 = pnand %p5832_p0, %p5829_p13 }
  0xe3   : > { %5837 = shalt.err (!%p5834_p2)
}
  0xe4   : > { %s5838_s22 = scalar_lea.vmem %s787_s2, 16  ;;  %s5845_s28 = scalar_lea.vmem %s787_s2, 32 }
  0xe5   : > { %p5839_p5 = scmp.ne.s32.totalorder %s787_s2, %s5838_s22  ;;  %p5846_p4 = scmp.lt.s32.totalorder %s787_s2, %s787_s2 }
  0xe6   : > { %p5847_p10 = scmp.lt.s32.totalorder %s5845_s28, %s5838_s22 }
  0xe7   : > { %p5841_p7 = pnand %p5839_p5, %p6515_p8 }
  0xe8   : > { %p5848_p11 = por %p5847_p10, %p5846_p4 }
  0xe9   : > { %p5842_p9 = pneg %p5841_p7 }
  0xeb   : > { %p5849_p12 = pnand %p5848_p11, %p5842_p9 }
  0xed   : > { %5852 = shalt.err (!%p5849_p12)
}
  0xee   : > { %5262 = dma.hbm_to_vmem [thread:$0]  (!%p6499_p6), %s7575_s15, 16, %s787_s2, [#allocation24]  }
  0xef   : > { %s6310_s26 = smov [#allocation26]   ;;  %s6311_s9 = smov [#allocation29]  }
  0xf0   : > { %s810_s3 = sshll.u32 %s6310_s26, 4  ;;  %s839_s6 = sshll.u32 %s6311_s9, 4  ;;  %s811_s3 = int_to_ptr.vmem [resolvable:$true] %s810_s3  ;;  %s840_s6 = int_to_ptr.vmem [resolvable:$true] %s839_s6 }
  0xf1   : > { %s7576_s17 = sld [smem:[#allocation63_spill]] }
  0xf7   : > { %s5853_s30 = scalar_lea.hbm %s7576_s17, 16 }
  0xf8   : > { %p5854_p1 = scmp.ne.s32.totalorder %s7576_s17, %s5853_s30  ;;  %p5860_p0 = scmp.lt.u32.totalorder %s5853_s30, %s7576_s17 }
  0xfa   : > { %p5856_p3 = pnand %p5854_p1, %p6515_p8 }
  0xfc   : > { %p5857_p13 = pneg %p5856_p3 }
  0xfe   : > { %p5862_p2 = pnand %p5860_p0, %p5857_p13 }
 0x100   : > { %5865 = shalt.err (!%p5862_p2)
}
 0x101   : > { %s5866_s2 = scalar_lea.vmem %s811_s3, 16  ;;  %s5873_s22 = scalar_lea.vmem %s811_s3, 32 }
 0x102   : > { %p5867_p5 = scmp.ne.s32.totalorder %s811_s3, %s5866_s2  ;;  %p5874_p4 = scmp.lt.s32.totalorder %s811_s3, %s811_s3 }
 0x103   : > { %p5875_p10 = scmp.lt.s32.totalorder %s5873_s22, %s5866_s2 }
 0x104   : > { %p5869_p7 = pnand %p5867_p5, %p6515_p8 }
 0x105   : > { %p5876_p11 = por %p5875_p10, %p5874_p4 }
 0x106   : > { %p5870_p9 = pneg %p5869_p7 }
 0x108   : > { %p5877_p12 = pnand %p5876_p11, %p5870_p9 }
 0x10a   : > { %5880 = shalt.err (!%p5877_p12)
}
 0x10b   : > { %5268 = dma.hbm_to_vmem [thread:$0]  (!%p6499_p6), %s7576_s17, 16, %s811_s3, [#allocation27]  }
 0x10c   : > { %s5881_s9 = scalar_lea.hbm %s7504_s21, 1024 }
 0x10d   : > { %p5882_p1 = scmp.ne.s32.totalorder %s7504_s21, %s5881_s9  ;;  %p5888_p0 = scmp.lt.u32.totalorder %s5881_s9, %s7504_s21 }
 0x10f   : > { %p5884_p3 = pnand %p5882_p1, %p6515_p8 }
 0x111   : > { %p5885_p13 = pneg %p5884_p3 }
 0x113   : > { %p5890_p2 = pnand %p5888_p0, %p5885_p13 }
 0x115   : > { %5893 = shalt.err (!%p5890_p2)
}
 0x116   : > { %s5894_s1 = scalar_lea.vmem %s840_s6, 1024  ;;  %p5902_p4 = scmp.lt.s32.totalorder %s840_s6, %s840_s6 }
 0x117   : > { %p5895_p5 = scmp.ne.s32.totalorder %s840_s6, %s5894_s1  ;;  %p5903_p10 = scmp.lt.s32.totalorder %s5894_s1, %s5894_s1 }
 0x119   : > { %p5897_p7 = pnand %p5895_p5, %p6515_p8  ;;  %p5904_p11 = por %p5903_p10, %p5902_p4 }
 0x11b   : > { %p5898_p9 = pneg %p5897_p7 }
 0x11d   : > { %p5905_p12 = pnand %p5904_p11, %p5898_p9 }
 0x11f   : > { %5908 = shalt.err (!%p5905_p12)
}
 0x120   : > { %s7577_s3 = smov 4   ;;  %s7578_s25 = smov 64  }
 0x121   : > { %5274 = dma.hbm_to_vmem [thread:$0]  (!%p6499_p6), %s7504_s21, 1024, %s840_s6, [#allocation30], %s7578_s25, %s7578_s25, %s7577_s3  }
 0x122   : > { %s6312_s22 = smov [#allocation7]   ;;  %s6313_s27 = smov [#allocation10]  }
 0x123   : > { %s641_s28 = sshll.u32 %s6312_s22, 4  ;;  %s665_s20 = sshll.u32 %s6313_s27, 4  ;;  %s642_s28 = int_to_ptr.vmem [resolvable:$true] %s641_s28  ;;  %s666_s20 = int_to_ptr.vmem [resolvable:$true] %s665_s20 }
 0x124   : > { %s7579_s18 = sld [smem:[#allocation53_spill]] }
 0x12a   : > { %s5909_s7 = scalar_lea.hbm %s7579_s18, 192 }
 0x12b   : > { %p5910_p1 = scmp.ne.s32.totalorder %s7579_s18, %s5909_s7  ;;  %p5916_p0 = scmp.lt.u32.totalorder %s5909_s7, %s7579_s18 }
 0x12d   : > { %p5912_p3 = pnand %p5910_p1, %p6515_p8 }
 0x12f   : > { %p5913_p13 = pneg %p5912_p3 }
 0x131   : > { %p5918_p2 = pnand %p5916_p0, %p5913_p13 }
 0x133   : > { %5921 = shalt.err (!%p5918_p2)
}
 0x134   : > { %s5922_s6 = scalar_lea.vmem %s642_s28, 192  ;;  %p5930_p4 = scmp.lt.s32.totalorder %s642_s28, %s642_s28 }
 0x135   : > { %p5923_p5 = scmp.ne.s32.totalorder %s642_s28, %s5922_s6  ;;  %p5931_p10 = scmp.lt.s32.totalorder %s5922_s6, %s5922_s6 }
 0x137   : > { %p5925_p7 = pnand %p5923_p5, %p6515_p8  ;;  %p5932_p11 = por %p5931_p10, %p5930_p4 }
 0x139   : > { %p5926_p9 = pneg %p5925_p7 }
 0x13b   : > { %p5933_p12 = pnand %p5932_p11, %p5926_p9 }
 0x13d   : > { %5936 = shalt.err (!%p5933_p12)
}
 0x13e   : > { %5229 = dma.hbm_to_vmem [thread:$0]  (!%p6499_p6), %s7579_s18, 192, %s642_s28, [#allocation6], %s7578_s25, %s7578_s25, %s7577_s3  }
 0x13f   : > { %s7580_s9 = sld [smem:[#allocation55_spill]] }
 0x145   : > { %s5937_s7 = scalar_lea.hbm %s7580_s9, 6144 }
 0x146   : > { %p5938_p1 = scmp.ne.s32.totalorder %s7580_s9, %s5937_s7  ;;  %p5944_p0 = scmp.lt.u32.totalorder %s5937_s7, %s7580_s9 }
 0x148   : > { %p5940_p3 = pnand %p5938_p1, %p6515_p8 }
 0x14a   : > { %p5941_p13 = pneg %p5940_p3 }
 0x14c   : > { %p5946_p2 = pnand %p5944_p0, %p5941_p13 }
 0x14e   : > { %5949 = shalt.err (!%p5946_p2)
}
 0x14f   : > { %s5950_s6 = scalar_lea.vmem %s666_s20, 6144  ;;  %p5958_p4 = scmp.lt.s32.totalorder %s666_s20, %s666_s20 }
 0x150   : > { %p5951_p5 = scmp.ne.s32.totalorder %s666_s20, %s5950_s6  ;;  %p5959_p10 = scmp.lt.s32.totalorder %s5950_s6, %s5950_s6 }
 0x152   : > { %p5953_p7 = pnand %p5951_p5, %p6515_p8  ;;  %p5960_p11 = por %p5959_p10, %p5958_p4 }
 0x154   : > { %p5954_p9 = pneg %p5953_p7 }
 0x156   : > { %p5961_p12 = pnand %p5960_p11, %p5954_p9 }
 0x158   : > { %5964 = shalt.err (!%p5961_p12)
}
 0x159   : > { %s6314_s28 = smov 192   ;;  %s6315_s2 = smov 12  }
 0x15a   : > { %5235 = dma.hbm_to_vmem [thread:$0]  (!%p6499_p6), %s7580_s9, 6144, %s666_s20, [#allocation9], %s6314_s28, %s6314_s28, %s6315_s2  }
 0x15b   : > { %s6316_s26 = smov [#allocation13]   ;;  %s6317_s30 = smov [#allocation16]  }
 0x15c   : > { %s691_s7 = sshll.u32 %s6316_s26, 4  ;;  %s720_s29 = sshll.u32 %s6317_s30, 4  ;;  %s692_s7 = int_to_ptr.vmem [resolvable:$true] %s691_s7  ;;  %s721_s29 = int_to_ptr.vmem [resolvable:$true] %s720_s29 }
 0x15d   : > { %s7581_s6 = sld [smem:[#allocation57_spill]] }
 0x163   : > { %s7582_s5 = smov %s7581_s6  ;;  %s5965_s11 = scalar_lea.hbm %s7581_s6, 2048 }
 0x164   : > { %p5966_p1 = scmp.ne.s32.totalorder %s7582_s5, %s5965_s11  ;;  %p5972_p0 = scmp.lt.u32.totalorder %s5965_s11, %s7582_s5 }
 0x166   : > { %p5968_p3 = pnand %p5966_p1, %p6515_p8 }
 0x168   : > { %p5969_p13 = pneg %p5968_p3 }
 0x16a   : > { %p5974_p2 = pnand %p5972_p0, %p5969_p13 }
 0x16c   : > { %5977 = shalt.err (!%p5974_p2)
}
 0x16d   : > { %s5978_s20 = scalar_lea.vmem %s692_s7, 2048  ;;  %p5986_p4 = scmp.lt.s32.totalorder %s692_s7, %s692_s7 }
 0x16e   : > { %p5979_p5 = scmp.ne.s32.totalorder %s692_s7, %s5978_s20  ;;  %p5987_p10 = scmp.lt.s32.totalorder %s5978_s20, %s5978_s20 }
 0x170   : > { %p5981_p7 = pnand %p5979_p5, %p6515_p8  ;;  %p5988_p11 = por %p5987_p10, %p5986_p4 }
 0x172   : > { %p5982_p9 = pneg %p5981_p7 }
 0x174   : > { %p5989_p12 = pnand %p5988_p11, %p5982_p9 }
 0x176   : > { %5992 = shalt.err (!%p5989_p12)
}
 0x177   : > { %5241 = dma.hbm_to_vmem [thread:$0]  (!%p6499_p6), %s7582_s5, 2048, %s692_s7, [#allocation12], %s7578_s25, %s7578_s25, %s7577_s3  }
 0x178   : > { %s5993_s18 = scalar_lea.hbm %s7493_s10, 2048 }
 0x179   : > { %p5994_p1 = scmp.ne.s32.totalorder %s7493_s10, %s5993_s18  ;;  %p6000_p0 = scmp.lt.u32.totalorder %s5993_s18, %s7493_s10 }
 0x17b   : > { %p5996_p3 = pnand %p5994_p1, %p6515_p8 }
 0x17d   : > { %p5997_p13 = pneg %p5996_p3 }
 0x17f   : > { %p6002_p2 = pnand %p6000_p0, %p5997_p13 }
 0x181   : > { %6005 = shalt.err (!%p6002_p2)
}
 0x182   : > { %s6006_s26 = scalar_lea.vmem %s721_s29, 2048  ;;  %p6014_p4 = scmp.lt.s32.totalorder %s721_s29, %s721_s29 }
 0x183   : > { %p6007_p5 = scmp.ne.s32.totalorder %s721_s29, %s6006_s26  ;;  %p6015_p10 = scmp.lt.s32.totalorder %s6006_s26, %s6006_s26 }
 0x185   : > { %p6009_p7 = pnand %p6007_p5, %p6515_p8  ;;  %p6016_p11 = por %p6015_p10, %p6014_p4 }
 0x187   : > { %p6010_p9 = pneg %p6009_p7 }
 0x189   : > { %p6017_p12 = pnand %p6016_p11, %p6010_p9 }
 0x18b   : > { %6020 = shalt.err (!%p6017_p12)
}
 0x18c   : > { %5247 = dma.hbm_to_vmem [thread:$0]  (!%p6499_p6), %s7493_s10, 2048, %s721_s29, [#allocation15], %s7578_s25, %s7578_s25, %s7577_s3  }
 0x18d   : > { %s6318_s1 = smov [#allocation19]   ;;  %s6319_s6 = smov [#allocation22]  }
 0x18e   : > { %s746_s0 = sshll.u32 %s6318_s1, 4  ;;  %s772_s20 = sshll.u32 %s6319_s6, 4  ;;  %s747_s0 = int_to_ptr.vmem [resolvable:$true] %s746_s0  ;;  %s773_s20 = int_to_ptr.vmem [resolvable:$true] %s772_s20 }
 0x18f   : > { %s6021_s15 = scalar_lea.hbm %s7495_s12, 2048 }
 0x190   : > { %p6022_p1 = scmp.ne.s32.totalorder %s7495_s12, %s6021_s15  ;;  %p6028_p0 = scmp.lt.u32.totalorder %s6021_s15, %s7495_s12 }
 0x192   : > { %p6024_p3 = pnand %p6022_p1, %p6515_p8 }
 0x194   : > { %p6025_p13 = pneg %p6024_p3 }
 0x196   : > { %p6030_p2 = pnand %p6028_p0, %p6025_p13 }
 0x198   : > { %6033 = shalt.err (!%p6030_p2)
}
 0x199   : > { %s6034_s29 = scalar_lea.vmem %s747_s0, 2048  ;;  %p6042_p4 = scmp.lt.s32.totalorder %s747_s0, %s747_s0 }
 0x19a   : > { %p6035_p5 = scmp.ne.s32.totalorder %s747_s0, %s6034_s29  ;;  %p6043_p10 = scmp.lt.s32.totalorder %s6034_s29, %s6034_s29 }
 0x19c   : > { %p6037_p7 = pnand %p6035_p5, %p6515_p8  ;;  %p6044_p11 = por %p6043_p10, %p6042_p4 }
 0x19e   : > { %p6038_p9 = pneg %p6037_p7 }
 0x1a0   : > { %p6045_p12 = pnand %p6044_p11, %p6038_p9 }
 0x1a2   : > { %6048 = shalt.err (!%p6045_p12)
}
 0x1a3   : > { %5253 = dma.hbm_to_vmem [thread:$0]  (!%p6499_p6), %s7495_s12, 2048, %s747_s0, [#allocation18], %s7578_s25, %s7578_s25, %s7577_s3  }
 0x1a4   : > { %s6049_s30 = scalar_lea.hbm %s7497_s14, 256 }
 0x1a5   : > { %p6050_p1 = scmp.ne.s32.totalorder %s7497_s14, %s6049_s30  ;;  %p6056_p0 = scmp.lt.u32.totalorder %s6049_s30, %s7497_s14 }
 0x1a7   : > { %p6052_p3 = pnand %p6050_p1, %p6515_p8 }
 0x1a9   : > { %p6053_p13 = pneg %p6052_p3 }
 0x1ab   : > { %p6058_p2 = pnand %p6056_p0, %p6053_p13 }
 0x1ad   : > { %6061 = shalt.err (!%p6058_p2)
}
 0x1ae   : > { %s6062_s15 = scalar_lea.vmem %s773_s20, 256  ;;  %p6070_p4 = scmp.lt.s32.totalorder %s773_s20, %s773_s20 }
 0x1af   : > { %p6063_p5 = scmp.ne.s32.totalorder %s773_s20, %s6062_s15  ;;  %p6071_p10 = scmp.lt.s32.totalorder %s6062_s15, %s6062_s15 }
 0x1b1   : > { %p6065_p7 = pnand %p6063_p5, %p6515_p8  ;;  %p6072_p11 = por %p6071_p10, %p6070_p4 }
 0x1b3   : > { %p6066_p9 = pneg %p6065_p7 }
 0x1b5   : > { %p6073_p12 = pnand %p6072_p11, %p6066_p9 }
 0x1b7   : > { %6076 = shalt.err (!%p6073_p12)
}
 0x1b8   : > { %5259 = dma.hbm_to_vmem [thread:$0]  (!%p6499_p6), %s7497_s14, 256, %s773_s20, [#allocation21], %s7578_s25, %s7578_s25, %s7577_s3  }
 0x1b9   : > { %s6320_s18 = smov [#allocation25]   ;;  %s6321_s2 = smov [#allocation28]  }
 0x1ba   : > { %s796_s28 = sshll.u32 %s6320_s18, 4  ;;  %s823_s29 = sshll.u32 %s6321_s2, 4  ;;  %s797_s28 = int_to_ptr.vmem [resolvable:$true] %s796_s28  ;;  %s824_s29 = int_to_ptr.vmem [resolvable:$true] %s823_s29 }
 0x1bb   : > { %s6077_s26 = scalar_lea.hbm %s7499_s16, 1024 }
 0x1bc   : > { %p6078_p1 = scmp.ne.s32.totalorder %s7499_s16, %s6077_s26  ;;  %p6084_p0 = scmp.lt.u32.totalorder %s6077_s26, %s7499_s16 }
 0x1be   : > { %p6080_p3 = pnand %p6078_p1, %p6515_p8 }
 0x1c0   : > { %p6081_p13 = pneg %p6080_p3 }
 0x1c2   : > { %p6086_p2 = pnand %p6084_p0, %p6081_p13 }
 0x1c4   : > { %6089 = shalt.err (!%p6086_p2)
}
 0x1c5   : > { %s6090_s20 = scalar_lea.vmem %s797_s28, 1024  ;;  %p6098_p4 = scmp.lt.s32.totalorder %s797_s28, %s797_s28 }
 0x1c6   : > { %p6091_p5 = scmp.ne.s32.totalorder %s797_s28, %s6090_s20  ;;  %p6099_p10 = scmp.lt.s32.totalorder %s6090_s20, %s6090_s20 }
 0x1c8   : > { %p6093_p7 = pnand %p6091_p5, %p6515_p8  ;;  %p6100_p11 = por %p6099_p10, %p6098_p4 }
 0x1ca   : > { %p6094_p9 = pneg %p6093_p7 }
 0x1cc   : > { %p6101_p12 = pnand %p6100_p11, %p6094_p9 }
 0x1ce   : > { %6104 = shalt.err (!%p6101_p12)
}
 0x1cf   : > { %5265 = dma.hbm_to_vmem [thread:$0]  (!%p6499_p6), %s7499_s16, 1024, %s797_s28, [#allocation24], %s7578_s25, %s7578_s25, %s7577_s3  }
 0x1d0   : > { %s6105_s17 = scalar_lea.hbm %s7502_s19, 1024 }
 0x1d1   : > { %p6106_p1 = scmp.ne.s32.totalorder %s7502_s19, %s6105_s17  ;;  %p6112_p0 = scmp.lt.u32.totalorder %s6105_s17, %s7502_s19 }
 0x1d3   : > { %p6108_p3 = pnand %p6106_p1, %p6515_p8 }
 0x1d5   : > { %p6109_p13 = pneg %p6108_p3 }
 0x1d7   : > { %p6114_p2 = pnand %p6112_p0, %p6109_p13 }
 0x1d9   : > { %6117 = shalt.err (!%p6114_p2)
}
 0x1da   : > { %s6118_s26 = scalar_lea.vmem %s824_s29, 1024  ;;  %p6126_p4 = scmp.lt.s32.totalorder %s824_s29, %s824_s29 }
 0x1db   : > { %p6119_p5 = scmp.ne.s32.totalorder %s824_s29, %s6118_s26  ;;  %p6127_p10 = scmp.lt.s32.totalorder %s6118_s26, %s6118_s26 }
 0x1dd   : > { %p6121_p7 = pnand %p6119_p5, %p6515_p8  ;;  %p6128_p11 = por %p6127_p10, %p6126_p4 }
 0x1df   : > { %p6122_p9 = pneg %p6121_p7 }
 0x1e1   : > { %p6129_p12 = pnand %p6128_p11, %p6122_p9 }
 0x1e3   : > { %6132 = shalt.err (!%p6129_p12)
}
 0x1e4   : > { %5271 = dma.hbm_to_vmem [thread:$0]  (!%p6499_p6), %s7502_s19, 1024, %s824_s29, [#allocation27], %s7578_s25, %s7578_s25, %s7577_s3  }
 0x1e5   : > { %s6322_s30 = smov [#allocation31]   ;;  %s6133_s13 = scalar_lea.hbm %s7506_s23, 1024 }
 0x1e6   : > { %s855_s1 = sshll.u32 %s6322_s30, 4  ;;  %p6134_p1 = scmp.ne.s32.totalorder %s7506_s23, %s6133_s13  ;;  %s856_s1 = int_to_ptr.vmem [resolvable:$true] %s855_s1 }
 0x1e7   : > { %p6140_p0 = scmp.lt.u32.totalorder %s6133_s13, %s7506_s23 }
 0x1e8   : > { %p6136_p3 = pnand %p6134_p1, %p6515_p8 }
 0x1ea   : > { %p6137_p13 = pneg %p6136_p3 }
 0x1ec   : > { %p6142_p2 = pnand %p6140_p0, %p6137_p13 }
 0x1ee   : > { %6145 = shalt.err (!%p6142_p2)
}
 0x1ef   : > { %s6146_s29 = scalar_lea.vmem %s856_s1, 1024  ;;  %p6154_p4 = scmp.lt.s32.totalorder %s856_s1, %s856_s1 }
 0x1f0   : > { %p6147_p5 = scmp.ne.s32.totalorder %s856_s1, %s6146_s29  ;;  %p6155_p10 = scmp.lt.s32.totalorder %s6146_s29, %s6146_s29 }
 0x1f2   : > { %p6149_p7 = pnand %p6147_p5, %p6515_p8  ;;  %p6156_p11 = por %p6155_p10, %p6154_p4 }
 0x1f4   : > { %p6150_p9 = pneg %p6149_p7 }
 0x1f6   : > { %p6157_p12 = pnand %p6156_p11, %p6150_p9 }
 0x1f8   : > { %6160 = shalt.err (!%p6157_p12)
}
 0x1f9   : > { %s7583_s22 = sld [smem:[#allocation47_spill]]  ;;  %s7584_s27 = sld [smem:[#allocation46_spill]] }
 0x1fa   : > { %s7585_s8 = sld [smem:[#allocation45_spill]]  ;;  %s7586_s26 = sld [smem:[#allocation44_spill]] }
 0x1fb   : > { %s7587_s28 = sld [smem:[#allocation48_spill]]  ;;  %s7593_s18 = sld [smem:[#allocation50_spill]] }
 0x1fc   : > { %5277 = dma.hbm_to_vmem [thread:$0]  (!%p6499_p6), %s7506_s23, 1024, %s856_s1, [#allocation30], %s7578_s25, %s7578_s25, %s7577_s3  }
 0x1ff   : > { %s4406_s4 = sadd.s32 4294967294, %s7583_s22   ;;  %s6888_s30 = sadd.s32 1, %s7583_s22  }
 0x200   : > { %s54_s7 = ssub.s32 %s7583_s22, %s6888_s30  ;;  %s57_s6 = sadd.s32 1, %s7584_s27 }
 0x201   : > { %p55_p8 = scmp.eq.s32.totalorder %s54_s7, 0  ;;  %p64_p1 = scmp.ne.s32.totalorder %s7584_s27, %s7585_s8 }
 0x202   : > { %p65_p3 = scmp.eq.s32.totalorder %s7583_s22, 0  ;;  %p70_p13 = scmp.ne.s32.totalorder %s7585_s8, %s7586_s26 }
 0x203   : > { %s6899_s20 = scalar_select %p55_p8, %s7584_s27, %s57_s6  }
 0x204   : > { %p6901_p0 = por %p65_p3, %p64_p1  ;;  %p7589_p2 = scmp.eq.s32.totalorder %s7587_s28, 0 }
 0x205   : > { %p603_p5 = scmp.eq.s32.totalorder %s7587_s28, 1  ;;  %p609_p7 = scmp.eq.s32.totalorder %s4406_s4, 1 }
 0x206   : > { %p6907_p6 = por %p7589_p2, %p70_p13  ;;  %p5304_p9 = scmp.lt.s32.totalorder %s7583_s22, 2 }
 0x207   : > { %s872_s25 = sand.u32 1, %s7584_s27   ;;  %p6914_p4 = por %p603_p5, %p64_p1 }
 0x208   : > { %p6918_p10 = por %p609_p7, %p70_p13  ;;  %s4427_s15 = sshll.u32 %s872_s25, 4 }
 0x209   : > { %s7591_s1 = scalar_select %p6914_p4, 1, 0 }
 0x20a   : > { %s7592_s11 = scalar_select %p6918_p10, 1, 0 }
 0x20b   : > { %s4619_s0 = sshll.u32 %s7583_s22, 8  ;;  %s876_s27 = scalar_lea.vmem [#allocation2], %s4427_s15 }
 0x20c   : > { %s6926_s2 = scalar_lea.hbm %s7593_s18, %s4619_s0  ;;  %s883_s8 = sshll.u32 %s876_s27, 4  ;;  %s6928_s8 = int_to_ptr.vmem [resolvable:$true] %s883_s8 }
 0x20d   : > { %p6932_p11 = pnand %p5304_p9, %p6901_p0  ;;  %s6936_s22 = scalar_lea.sflag [#allocation3], %s872_s25 }
 0x20e   : > { %s6161_s28 = scalar_lea.hbm %s6926_s2, 256  ;;  %s6166_s6 = scalar_lea.hbm %s7593_s18, 512 }
 0x20f   : > { %p6162_p12 = scmp.ne.s32.totalorder %s6926_s2, %s6161_s28  ;;  %p6163_p8 = pneg %p6932_p11 }
 0x210   : > { %p6167_p13 = scmp.lt.u32.totalorder %s6926_s2, %s7593_s18  ;;  %p6168_p0 = scmp.lt.u32.totalorder %s6166_s6, %s6161_s28 }
 0x211   : > { %p6164_p1 = pnand %p6163_p8, %p6162_p12  ;;  %p6170_p5 = scmp.lt.u32.totalorder %s6161_s28, %s6926_s2 }
 0x212   : > { %p6169_p2 = por %p6168_p0, %p6167_p13 }
 0x213   : > { %p6165_p3 = pneg %p6164_p1 }
 0x214   : > { %p6171_p7 = por %p6170_p5, %p6169_p2 }
 0x216   : > { %p6172_p9 = pnand %p6171_p7, %p6165_p3 }
 0x218   : > { %6175 = shalt.err (!%p6172_p9)
}
 0x219   : > { %s6176_s25 = scalar_lea.vmem %s6928_s8, 256  ;;  %s6323_s0 = smov [#allocation2]  }
 0x21a   : > { %p6177_p12 = scmp.ne.s32.totalorder %s6928_s8, %s6176_s25  ;;  %s6181_s17 = sshll.u32 %s6323_s0, 4  ;;  %s6182_s17 = int_to_ptr.vmem [resolvable:$false] %s6181_s17 }
 0x21b   : > { %s6183_s29 = scalar_lea.vmem %s6182_s17, 512  ;;  %p6184_p4 = scmp.lt.s32.totalorder %s6928_s8, %s6182_s17 }
 0x21c   : > { %p6179_p1 = pnand %p6177_p12, %p6163_p8  ;;  %p6185_p13 = scmp.lt.s32.totalorder %s6183_s29, %s6176_s25 }
 0x21e   : > { %p6180_p10 = pneg %p6179_p1  ;;  %p6186_p0 = por %p6185_p13, %p6184_p4 }
 0x220   : > { %p6187_p2 = pnand %p6186_p0, %p6180_p10 }
 0x222   : > { %6190 = shalt.err (!%p6187_p2)
}
 0x223   : > { %s7595_s27 = smov 8   ;;  %s7596_s28 = smov 128  }
 0x224   : > { %5281 = dma.hbm_to_vmem [thread:$0]  (!%p6932_p11), %s6926_s2, 256, %s6928_s8, %s6936_s22, %s7596_s28, %s7596_s28, %s7595_s27  }
 0x225   : > { %s7597_s4 = sld [smem:[#allocation49_spill]] }
 0x22b   : > { %p7598_p8 = scmp.ne.s32.totalorder %s7597_s4, 0 }
 0x22c   : > { %s7599_s7 = sld [smem:[#allocation45_spill]] (!%p7598_p8) }
 0x22d   : > { %901 = sbr.rel (%p7598_p8) target bundleno = 6970 (0x1b3a), region = 120 }
 0x232   : > { %s6970_s6 = sand.u32 (!%p7598_p8), 1, %s7599_s7  }
 0x233   : > { %s4431_s13 = sshll.u32 (!%p7598_p8), %s6970_s6, 4  ;;  %s904_s15 = scalar_lea.sflag (!%p7598_p8), [#allocation3], %s6970_s6 }
 0x234   : > { %s6974_s25 = scalar_lea.vmem [#allocation2], %s4431_s13 }
 0x235   : > { %6236 = dma.done.wait (%p6907_p6), %s904_s15, 256  }
 0x236   : > { %6238 = vsyncadd (%p6907_p6), %s904_s15, 4294967040  ;;  %s7600_s26 = sld [smem:[#allocation48_spill]] }
 0x23c   : > { %p7601_p4 = scmp.eq.s32.totalorder %s7600_s26, 0 }
 0x23e   : > { %6240 = dma.done.wait (%p7601_p4), [#allocation6], 448   ;;  %p7602_p10 = pmov %p7601_p4 }
 0x23f   : > { %p7603_p11 = pmov %p7601_p4 }
 0x240   : > { %6242 = vsyncadd (%p7602_p10), [#allocation6], 4294966848 }
 0x241   : > { %6244 = dma.done.wait (%p7603_p11), [#allocation9], 6160   ;;  %p7604_p3 = pmov %p7601_p4 }
 0x243   : > { %6246 = vsyncadd (%p7604_p3), [#allocation9], 4294961136  ;;  %p7605_p5 = pmov %p7604_p3 }
 0x244   : > { %p7606_p7 = pmov %p7604_p3 }
 0x245   : > { %6248 = dma.done.wait (%p7605_p5), [#allocation12], 2144  }
 0x246   : > { %6250 = vsyncadd (%p7606_p7), [#allocation12], 4294965152  ;;  %p7607_p6 = pmov %p7604_p3 }
 0x247   : > { %p7608_p9 = pmov %p7604_p3 }
 0x248   : > { %6252 = dma.done.wait (%p7607_p6), [#allocation15], 2176  }
 0x249   : > { %6254 = vsyncadd (%p7608_p9), [#allocation15], 4294965120  ;;  %p7609_p12 = pmov %p7604_p3 }
 0x24a   : > { %p7610_p1 = pmov %p7604_p3 }
 0x24b   : > { %6256 = dma.done.wait (%p7609_p12), [#allocation18], 2080  }
 0x24c   : > { %6258 = vsyncadd (%p7610_p1), [#allocation18], 4294965216  ;;  %p7611_p13 = pmov %p7610_p1 }
 0x24d   : > { %p7612_p0 = pmov %p7610_p1 }
 0x24e   : > { %6260 = dma.done.wait (%p7611_p13), [#allocation21], 288  }
 0x24f   : > { %6262 = vsyncadd (%p7612_p0), [#allocation21], 4294967008  ;;  %p7613_p2 = pmov %p7612_p0 }
 0x250   : > { %p7614_p8 = pmov %p7612_p0 }
 0x251   : > { %6264 = dma.done.wait (%p7613_p2), [#allocation24], 1040  }
 0x252   : > { %6266 = vsyncadd (%p7614_p8), [#allocation24], 4294966256  ;;  %p7615_p4 = pmov %p7612_p0 }
 0x253   : > { %p7616_p10 = pmov %p7612_p0 }
 0x254   : > { %6268 = dma.done.wait (%p7615_p4), [#allocation27], 1040  }
 0x255   : > { %6270 = vsyncadd (%p7616_p10), [#allocation27], 4294966256  ;;  %p7617_p11 = pmov %p7612_p0 }
 0x256   : > { %p7618_p3 = pmov %p7612_p0 }
 0x257   : > { %6272 = dma.done.wait (%p7617_p11), [#allocation30], 2048  }
 0x258   : > { %6274 = vsyncadd (%p7618_p3), [#allocation30], 4294965248  ;;  %v6324_v0 = vmov 0.0   ;;  %vm1078_vm0 = vcmask 1041408   ;;  %vm6325_vm1 = vmmov 0   ;;  %vm1079_vm2 = vcmask 1042432  }
 0x259   : > { %4775 = vmatprep.subr.bf16.mxu1 %v6324_v0  ;;  %4783 = vmatprep.subr.bf16.mxu0 %v6324_v0  ;;  %v6326_v1 = vmov 65535   ;;  %v5421_v3 = vld [vmem:[#allocation7] sm:$0xff]   ;;  %v5422_v5 = vld [vmem:[#allocation7 + $0x8] ss:$0 sps:$4 sm:$0x77]   ;;  %vm1074_vm3 = vcmask 171008   ;;  %v1165_v47 = vlaneseq }
 0x25a   : > { %4779 = vmatprep.mubr.msk.bf16.mxu1 %vm6325_vm1, %v6324_v0  ;;  %4799 = vmatprep.mubr.msk.bf16.mxu0 %vm6325_vm1, %v6324_v0  ;;  %v1080_v2 = vsel %vm1078_vm0, 4294967295, %v6326_v1  ;;  %v1052_v6 = vld [vmem:[%s6974_s25] sm:$0xff]  ;;  %v1053_v7 = vld [vmem:[%s6974_s25 + $0x8] sm:$0xff]  ;;  %v6327_v34 = vmov 0   ;;  %vm1395_vm4 = vcmask 261120   ;;  %s6328_s3 = smov 64  }
 0x25b   : > { %v1081_v4 = vsel %vm1079_vm2, %v1080_v2, 0  ;;  %4776 = vmatpush3.bf16.msra.mxu1 %v5421_v3  ;;  %v5425_v9 = vld [vmem:[#allocation10 + $0x4] ss:$12 sps:$4 sm:$0xff]   ;;  %v5426_v10 = vld [vmem:[#allocation10 + $0x8] ss:$12 sps:$4 sm:$0xff]   ;;  %v1054_v11 = vpack.c.bf16 %v1053_v7, %v1052_v6  ;;  %v7045_v48 = vshrl.u32 %v1165_v47, 7 }
 0x25c   : > { %4777 = vmatprep.subr.bf16.mxu1 %v6324_v0  ;;  %v1083_v8 = vand.u32 %v5422_v5, %v1081_v4  ;;  %v5423_v12 = vld [vmem:[#allocation10] ss:$12 sps:$4 sm:$0xff]   ;;  %4784 = vmatpush3.bf16.msra.mxu0 %v5426_v10  ;;  %v5429_v14 = vld [vmem:[#allocation10 + $0x1c] ss:$12 sps:$4 sm:$0xff]   ;;  %v5427_v15 = vld [vmem:[#allocation10 + $0x18] ss:$12 sps:$4 sm:$0xff]  }
 0x25d   : > { %v5430_v13 = vld [vmem:[#allocation10 + $0x20] ss:$12 sps:$4 sm:$0xff]   ;;  %4785 = vmatprep.subr.bf16.mxu0 %v6324_v0  ;;  %v5434_v16 = vld [vmem:[#allocation10 + $0x38] ss:$12 sps:$4 sm:$0xff]   ;;  %v5431_v18 = vld [vmem:[#allocation10 + $0x30] ss:$12 sps:$4 sm:$0xff]  }
 0x25e   : > { %v5433_v17 = vld [vmem:[#allocation10 + $0x34] ss:$12 sps:$4 sm:$0xff]   ;;  %v5438_v19 = vld [vmem:[#allocation10 + $0x50] ss:$12 sps:$4 sm:$0xff]   ;;  %v5437_v20 = vld [vmem:[#allocation10 + $0x4c] ss:$12 sps:$4 sm:$0xff]  }
 0x25f   : > { %4778 = vmatpush3.bf16.msra.mxu1 %v1083_v8  ;;  %v5435_v21 = vld [vmem:[#allocation10 + $0x48] ss:$12 sps:$4 sm:$0xff]   ;;  %v5441_v23 = vld [vmem:[#allocation10 + $0x64] ss:$12 sps:$4 sm:$0xff]   ;;  %v5439_v24 = vld [vmem:[#allocation10 + $0x60] ss:$12 sps:$4 sm:$0xff]  }
 0x260   : > { %1308 = vmatprep.subr.bf16.mxu1 %v5425_v9  ;;  %4786 = vmatpush3.bf16.msra.mxu0 %v5430_v13  ;;  %v5442_v22 = vld [vmem:[#allocation10 + $0x68] ss:$12 sps:$4 sm:$0xff]   ;;  %v5446_v25 = vld [vmem:[#allocation10 + $0x80] ss:$12 sps:$4 sm:$0xff]   ;;  %v5443_v27 = vld [vmem:[#allocation10 + $0x78] ss:$12 sps:$4 sm:$0xff]  }
 0x261   : > { %4787 = vmatprep.subr.bf16.mxu0 %v6324_v0  ;;  %v5445_v26 = vld [vmem:[#allocation10 + $0x7c] ss:$12 sps:$4 sm:$0xff]   ;;  %v5449_v28 = vld [vmem:[#allocation10 + $0x94] ss:$12 sps:$4 sm:$0xff]   ;;  %v5450_v30 = vld [vmem:[#allocation10 + $0x98] ss:$12 sps:$4 sm:$0xff]  }
 0x262   : > { %4780 = vmatmul.mubr.msk.bf16.vlgmr.msra.gmra.mrb[0].mxu1 %vm1074_vm3, %v1054_v11  ;;  %v5447_v29 = vld [vmem:[#allocation10 + $0x90] ss:$12 sps:$4 sm:$0xff]   ;;  %v5453_v31 = vld [vmem:[#allocation10 + $0xac] ss:$12 sps:$4 sm:$0xff]   ;;  %v5451_v32 = vld [vmem:[#allocation10 + $0xa8] ss:$12 sps:$4 sm:$0xff]  }
 0x263   : > { %1309 = vmatpush1.bf16.msra.mxu1 %v5423_v12  ;;  %v5454_v33 = vld [vmem:[#allocation10 + $0xb0] ss:$12 sps:$4 sm:$0xff]   ;;  %1340 = vmatprep.mubr.bf16.mxu1 %v6327_v34  ;;  %v1126_v39 = vld [vmem:[#allocation5] sm:$0xff]  ;;  %v7048_v49 = vsub.s32 0, %v7045_v48  ;;  %v7051_v50 = vsub.s32 2, %v7045_v48  ;;  %v7054_v52 = vsub.s32 1, %v7045_v48 }
 0x264   : > { %1310 = vmatprep.subr.bf16.mxu1 %v5429_v14  ;;  %4788 = vmatpush3.bf16.msra.mxu0 %v5434_v16  ;;  %v4450_v35 = vld [vmem:[#allocation8] ss:$0 sm:$0xff]  ;;  %v1127_v41 = vld [vmem:[#allocation5 + $0x8] sm:$0xff]  ;;  %v1163_v51 = vld [vmem:[#allocation11] sm:$0x7]  ;;  %s6329_s2 = smov 96  }
 0x265   : > { %4789 = vmatprep.subr.bf16.mxu0 %v6324_v0  ;;  %v1168_v53 = vrot.slane %v1163_v51, %v7048_v49  ;;  %v1176_v54 = vrot.slane %v1163_v51, %v7051_v50  ;;  %v1172_v57 = vrot.slane %v1163_v51, %v7054_v52  ;;  %s6330_s8 = smov 32   ;;  %vm1445_vm5 = vcmask 130048   ;;  %s7619_s17 = sld [smem:[#allocation58_spill]] }
 0x266   : > { %vm1911_vm6 = vcmask 523264   ;;  %vm1914_vm7 = vcmask 785408   ;;  %vm3569_vm8 = vcmask 1046528   ;;  %p1048_p5 = scmp.lt.s32.totalorder %s7600_s26, 1  ;;  %s7620_s13 = sld [smem:[#allocation51_spill]]  ;;  %vm3565_vm9 = vcmask 244736  }
 0x267   : > { %1311 = vmatpush1.bf16.msra.mxu1 %v5427_v15  ;;  %s1047_s22 = scalar_lea.vmem [#allocation32], %s6970_s6  ;;  %s4148_s7 = scalar_lea.sflag [#allocation4], %s6970_s6 }
 0x268   : > { %1312 = vmatprep.subr.bf16.mxu1 %v5433_v17  ;;  %4790 = vmatpush3.bf16.msra.mxu0 %v5438_v19  ;;  %s1049_s28 = scalar_select %p1048_p5, %s7600_s26, 1 }
 0x269   : > { %4791 = vmatprep.subr.bf16.mxu0 %v6324_v0  ;;  %s4160_s0 = sshll.u32 %s1047_s22, 4  ;;  %p7627_p6 = scmp.ne.s32.totalorder %s7591_s1, 0  ;;  %s7441_s0 = int_to_ptr.vmem [resolvable:$true] %s4160_s0 }
 0x26b   : > { %1313 = vmatpush1.bf16.msra.mxu1 %v5431_v18 }
 0x26c   : > { %1314 = vmatprep.subr.bf16.mxu1 %v5437_v20  ;;  %4792 = vmatpush3.bf16.msra.mxu0 %v5442_v22  ;;  %s1050_s15 = scalar_lea.vmem %s7620_s13, %s1049_s28  ;;  %s7623_s28 = sld [smem:[#allocation65_spill]] }
 0x26d   : > { %4793 = vmatprep.subr.bf16.mxu0 %v6324_v0  ;;  %s7624_s13 = sld [smem:[#allocation66_spill]] }
 0x26f   : > { %1315 = vmatpush1.bf16.msra.mxu1 %v5435_v21 }
 0x270   : > { %1316 = vmatprep.subr.bf16.mxu1 %v5441_v23  ;;  %4794 = vmatpush3.bf16.msra.mxu0 %v5446_v25 }
 0x271   : > { %4795 = vmatprep.subr.bf16.mxu0 %v6324_v0 }
 0x273   : > { %1317 = vmatpush1.bf16.msra.mxu1 %v5439_v24 }
 0x274   : > { %1318 = vmatprep.subr.bf16.mxu1 %v5445_v26  ;;  %4796 = vmatpush3.bf16.msra.mxu0 %v5450_v30 }
 0x275   : > { %4797 = vmatprep.subr.bf16.mxu0 %v6324_v0 }
 0x277   : > { %1319 = vmatpush1.bf16.msra.mxu1 %v5443_v27 }
 0x278   : > { %1320 = vmatprep.subr.bf16.mxu1 %v5449_v28  ;;  %4798 = vmatpush3.bf16.msra.mxu0 %v5454_v33 }
 0x279   : > { %4809 = vmatprep.subr.bf16.mxu0 %v6324_v0 }
 0x27b   : > { %1321 = vmatpush1.bf16.msra.mxu1 %v5447_v29 }
 0x27c   : > { %1322 = vmatprep.subr.bf16.mxu1 %v5453_v31 }
 0x27f   : > { %1323 = vmatpush1.bf16.msra.mxu1 %v5451_v32 }
 0x280   : > { %4803 = vmatprep.subr.bf16.mxu1 %v6324_v0 }
 0x335   : > { %v1119_v36 = vpop.f32.mrb[0].mxu1 }
 0x336   : > { %v1120_v37 = vadd.f32 %v4450_v35, %v1119_v36  ;;  %v4781_v38 = vpop.f32.mrb[1].mxu1 }
 0x337   : > { %v1122_v40 = vpop.f32.mrb[2].mxu1 }
 0x338   : > { %v1123_v42 = vadd.f32 %v4450_v35, %v1122_v40  ;;  %v4782_v43 = vpop.f32.mrb[3].mxu1  ;;  %v7035_v44 = vadd.f32 %v1126_v39, %v1120_v37 }
 0x33a   : > { %v7037_v45 = vadd.f32 %v1127_v41, %v1123_v42 }
 0x33c   : > { %v1130_v46 = vpack.c.bf16 %v7037_v45, %v7035_v44 }
 0x33e   : > { %1341 = vmatmul.mubr.bf16.vlgmr.msra.gmra.mrb[4].mxu1 %v1130_v46  ;;  %4800 = vmatmul.mubr.bf16.vlgmr.msra.gmra.mrb[0].mxu0 %v1130_v46 }
 0x33f   : > { %4805 = vmatprep.mubr.msk.bf16.mxu1 %vm6325_vm1, %v6324_v0  ;;  %4811 = vmatprep.mubr.msk.bf16.mxu0 %vm6325_vm1, %v6324_v0 }
 0x411   : > { %v1342_v55 = vpop.f32.mrb[4].mxu1  ;;  %v1385_v56 = vpop.f32.mrb[0].mxu0 }
 0x412   : > { %v1344_v58 = vpop.f32.mrb[5].mxu1  ;;  %v4801_v59 = vpop.f32.mrb[1].mxu0  ;;  %v1343_v62 = vadd.f32 %v1342_v55, %v1168_v53  ;;  %v1386_v63 = vadd.f32 %v1385_v56, %v1176_v54 }
 0x413   : > { %v1346_v60 = vpop.f32.mrb[6].mxu1  ;;  %v1388_v61 = vpop.f32.mrb[2].mxu0  ;;  %v1345_v5 = vadd.f32 %v1344_v58, %v1172_v57 }
 0x414   : > { %v1347_v1 = vadd.f32 %v1346_v60, %v1168_v53  ;;  %v1389_v2 = vadd.f32 %v1388_v61, %v1176_v54  ;;  %v1348_v3 = vpop.f32.mrb[7].mxu1  ;;  %v4802_v4 = vpop.f32.mrb[3].mxu0 }
 0x415   : > { %v1349_v6 = vadd.f32 %v1348_v3, %v1172_v57 }
 0x416   : > { %v1392_v7 = vpack.c.bf16 %v1347_v1, %v1343_v62  ;;  %v7059_v8 = vpack.c.bf16 %v1389_v2, %v1386_v63 }
 0x417   : > { %v1393_v9 = vpack.c.bf16 %v1349_v6, %v1345_v5 }
 0x418   : > { %4810 = vmatpush3.bf16.msra.mxu0 %v7059_v8 }
 0x419   : > { %1641 = vrot.lane.b32.xlu1 %v1393_v9, %s6328_s3  ;;  %1517 = vrot.lane.b32.xlu0 %v1393_v9, %s6329_s2  ;;  %v1400_v10 = vsel %vm1395_vm4, %v1393_v9, 0 }
 0x41a   : > { %4804 = vmatpush3.bf16.xpose.msra.mxu1 %v1400_v10  ;;  %4821 = vmatprep.subr.bf16.mxu0 %v6324_v0 }
 0x41b   : > { %4815 = vmatprep.subr.bf16.mxu1 %v6324_v0 }
 0x41d   : > { %1639 = vrot.lane.b32.xlu1 %v1392_v7, %s6328_s3  ;;  %1514 = vrot.lane.b32.xlu0 %v1392_v7, %s6329_s2 }
 0x421   : > { %1762 = vrot.lane.b32.xlu1 %v1392_v7, %s6330_s8  ;;  %1764 = vrot.lane.b32.xlu0 %v1393_v9, %s6330_s8 }
 0x422   : > { %4806 = vmatmul.mubr.msk.bf16.vlgmr.msra.gmra.mrb[8].mxu1 %vm1395_vm4, %v1392_v7 }
 0x423   : > { %4817 = vmatprep.mubr.msk.bf16.mxu1 %vm6325_vm1, %v6324_v0 }
 0x48b   : > { %v1518_v11 = vpop.permute.xlu0 %1517  ;;  %v1642_v13 = vpop.permute.xlu1 %1641 }
 0x48c   : > { %v1523_v12 = vsel %vm1395_vm4, %v1518_v11, 0  ;;  %v1647_v15 = vsel %vm1395_vm4, %v1642_v13, 0 }
 0x48d   : > { %4816 = vmatpush3.bf16.xpose.msra.mxu1 %v1523_v12 }
 0x48e   : > { %4827 = vmatprep.subr.bf16.mxu1 %v6324_v0 }
 0x48f   : > { %v1515_v14 = vpop.permute.xlu0 %1514  ;;  %v1640_v17 = vpop.permute.xlu1 %1639 }
 0x493   : > { %v1765_v16 = vpop.permute.xlu0 %1764  ;;  %v1763_v19 = vpop.permute.xlu1 %1762 }
 0x494   : > { %4818 = vmatmul.mubr.msk.bf16.vlgmr.msra.gmra.mrb[12].mxu1 %vm1395_vm4, %v1515_v14  ;;  %v1770_v18 = vsel %vm1395_vm4, %v1765_v16, 0 }
 0x495   : > { %4828 = vmatpush3.bf16.xpose.msra.mxu1 %v1647_v15  ;;  %4829 = vmatprep.mubr.msk.bf16.mxu1 %vm6325_vm1, %v6324_v0 }
 0x496   : > { %4839 = vmatprep.subr.bf16.mxu1 %v6324_v0 }
 0x49c   : > { %4830 = vmatmul.mubr.msk.bf16.vlgmr.msra.gmra.mrb[16].mxu1 %vm1395_vm4, %v1640_v17 }
 0x49d   : > { %4840 = vmatpush3.bf16.xpose.msra.mxu1 %v1770_v18  ;;  %4841 = vmatprep.mubr.msk.bf16.mxu1 %vm6325_vm1, %v6324_v0 }
 0x49e   : > { %4851 = vmatprep.subr.bf16.mxu1 %v6324_v0 }
 0x4a4   : > { %4842 = vmatmul.mubr.msk.bf16.vlgmr.msra.gmra.mrb[20].mxu1 %vm1395_vm4, %v1763_v19 }
 0x4a5   : > { %4867 = vmatprep.mubr.msk.bf16.mxu1 %vm6325_vm1, %v6324_v0 }
 0x4f5   : > { %v1436_v20 = vpop.f32.mrb[8].mxu1 }
 0x4f6   : > { %v1443_v21 = vmul.f32 0.17677669, %v1436_v20  ;;  %v4807_v22 = vpop.f32.mrb[9].mxu1 }
 0x4f7   : > { %v1439_v23 = vpop.f32.mrb[10].mxu1 }
 0x4f8   : > { %v1444_v24 = vmul.f32 0.17677669, %v1439_v23  ;;  %v4808_v25 = vpop.f32.mrb[11].mxu1  ;;  %v1446_v26 = vsel %vm1445_vm5, %v1443_v21, -inf }
 0x4f9   : > { %1447 = vmax.xlane.f32.xlu0 %v1446_v26 }
 0x4fa   : > { %v1449_v27 = vsel %vm1445_vm5, %v1444_v24, -inf }
 0x4fb   : > { %1450 = vmax.xlane.f32.xlu1 %v1449_v27 }
 0x567   : > { %v1559_v28 = vpop.f32.mrb[12].mxu1 }
 0x568   : > { %v1566_v29 = vmul.f32 0.17677669, %v1559_v28  ;;  %v4819_v30 = vpop.f32.mrb[13].mxu1 }
 0x569   : > { %v1562_v31 = vpop.f32.mrb[14].mxu1 }
 0x56a   : > { %v1567_v32 = vmul.f32 0.17677669, %v1562_v31  ;;  %v4820_v33 = vpop.f32.mrb[15].mxu1  ;;  %v1568_v35 = vsel %vm1445_vm5, %v1566_v29, -inf }
 0x56b   : > { %1569 = vmax.xlane.f32.xlu0 %v1568_v35 }
 0x56c   : > { %v1571_v36 = vsel %vm1445_vm5, %v1567_v32, -inf }
 0x56f   : > { %1572 = vmax.xlane.f32.xlu0 %v1571_v36  ;;  %v1683_v37 = vpop.f32.mrb[16].mxu1 }
 0x570   : > { %v1690_v38 = vmul.f32 0.17677669, %v1683_v37  ;;  %v4831_v39 = vpop.f32.mrb[17].mxu1 }
 0x571   : > { %v1686_v40 = vpop.f32.mrb[18].mxu1 }
 0x572   : > { %v1691_v41 = vmul.f32 0.17677669, %v1686_v40  ;;  %v4832_v42 = vpop.f32.mrb[19].mxu1  ;;  %v1692_v43 = vsel %vm1445_vm5, %v1690_v38, -inf }
 0x573   : > { %1693 = vmax.xlane.f32.xlu1 %v1692_v43 }
 0x574   : > { %v1695_v46 = vsel %vm1445_vm5, %v1691_v41, -inf }
 0x575   : > { %1696 = vmax.xlane.f32.xlu0 %v1695_v46 }
 0x577   : > { %v1806_v47 = vpop.f32.mrb[20].mxu1 }
 0x578   : > { %v1813_v51 = vmul.f32 0.17677669, %v1806_v47  ;;  %v4843_v53 = vpop.f32.mrb[21].mxu1 }
 0x579   : > { %v1809_v54 = vpop.f32.mrb[22].mxu1 }
 0x57a   : > { %v1814_v55 = vmul.f32 0.17677669, %v1809_v54  ;;  %v4844_v56 = vpop.f32.mrb[23].mxu1  ;;  %v1815_v57 = vsel %vm1445_vm5, %v1813_v51, -inf }
 0x57b   : > { %1816 = vmax.xlane.f32.xlu1 %v1815_v57 }
 0x57c   : > { %v1818_v58 = vsel %vm1445_vm5, %v1814_v55, -inf }
 0x57d   : > { %1819 = vmax.xlane.f32.xlu0 %v1818_v58 }
 0x586   : > { %v1448_v59 = vpop.xlane.xlu0 %1447 }
 0x587   : > { %v1452_v60 = vsub.f32 %v1443_v21, %v1448_v59 }
 0x588   : > { %v1451_v61 = vpop.xlane.xlu1 %1450 }
 0x589   : > { %v1454_v62 = vmul.f32 1.442695, %v1452_v60  ;;  %v1453_v63 = vsub.f32 %v1444_v24, %v1451_v61 }
 0x58b   : > { %5577 = vpow2.f32 %v1454_v62  ;;  %v1456_v1 = vmul.f32 1.442695, %v1453_v63 }
 0x58d   : > { %5579 = vpow2.f32 %v1456_v1 }
 0x595   : > { %v5578_v2 = vpop.eup %5577 }
 0x596   : > { %v1458_v3 = vsel %vm1445_vm5, %v5578_v2, 0.0 }
 0x597   : > { %v5580_v4 = vpop.eup %5579  ;;  %1459 = vadd.xlane.f32.xlu1 %v1458_v3 }
 0x598   : > { %v1461_v5 = vsel %vm1445_vm5, %v5580_v4, 0.0 }
 0x599   : > { %1462 = vadd.xlane.f32.xlu0 %v1461_v5 }
 0x5a8   : > { %1592 = vrot.lane.b32.xlu1 %v7059_v8, %s6329_s2 }
 0x5f8   : > { %v1570_v6 = vpop.xlane.xlu0 %1569 }
 0x5f9   : > { %v1574_v7 = vsub.f32 %v1566_v29, %v1570_v6 }
 0x5fb   : > { %v1576_v9 = vmul.f32 1.442695, %v1574_v7 }
 0x5fc   : > { %v1573_v10 = vpop.xlane.xlu0 %1572 }
 0x5fd   : > { %5581 = vpow2.f32 %v1576_v9  ;;  %v1575_v11 = vsub.f32 %v1567_v32, %v1573_v10 }
 0x5ff   : > { %v1578_v12 = vmul.f32 1.442695, %v1575_v11 }
 0x600   : > { %v1694_v13 = vpop.xlane.xlu1 %1693 }
 0x601   : > { %5583 = vpow2.f32 %v1578_v12  ;;  %v1698_v14 = vsub.f32 %v1690_v38, %v1694_v13 }
 0x602   : > { %v1697_v15 = vpop.xlane.xlu0 %1696 }
 0x603   : > { %v1700_v16 = vmul.f32 1.442695, %v1698_v14  ;;  %v1699_v17 = vsub.f32 %v1691_v41, %v1697_v15 }
 0x605   : > { %5585 = vpow2.f32 %v1700_v16  ;;  %v1702_v18 = vmul.f32 1.442695, %v1699_v17  ;;  %v5455_v16 = vld [vmem:[#allocation13] sm:$0xff]   ;;  %v5456_v17 = vld [vmem:[#allocation13 + $0x8] sm:$0xff]  }
 0x606   : > { %4852 = vmatpush3.bf16.msra.mxu1 %v5455_v16 }
 0x607   : > { %v5582_v19 = vpop.eup %5581  ;;  %5587 = vpow2.f32 %v1702_v18  ;;  %4853 = vmatprep.subr.bf16.mxu1 %v6324_v0  ;;  %v5457_v18 = vld [vmem:[#allocation13 + $0x10] sm:$0xff]  }
 0x608   : > { %v1817_v20 = vpop.xlane.xlu1 %1816  ;;  %v1580_v21 = vsel %vm1445_vm5, %v5582_v19, 0.0 }
 0x609   : > { %v1821_v22 = vsub.f32 %v1813_v51, %v1817_v20  ;;  %1581 = vadd.xlane.f32.xlu1 %v1580_v21  ;;  %v5459_v20 = vld [vmem:[#allocation13 + $0x20] sm:$0xff]  }
 0x60a   : > { %v1820_v23 = vpop.xlane.xlu0 %1819  ;;  %4854 = vmatpush3.bf16.msra.mxu1 %v5456_v17  ;;  %v5464_v17 = vld [vmem:[#allocation16 + $0x8] sm:$0xff]  }
 0x60b   : > { %v5584_v24 = vpop.eup %5583  ;;  %v1823_v25 = vmul.f32 1.442695, %v1821_v22  ;;  %v1822_v26 = vsub.f32 %v1814_v55, %v1820_v23  ;;  %4855 = vmatprep.subr.bf16.mxu1 %v6324_v0 }
 0x60c   : > { %v1583_v27 = vsel %vm1445_vm5, %v5584_v24, 0.0 }
 0x60d   : > { %5589 = vpow2.f32 %v1823_v25  ;;  %v1825_v28 = vmul.f32 1.442695, %v1822_v26  ;;  %1584 = vadd.xlane.f32.xlu0 %v1583_v27  ;;  %v5461_v27 = vld [vmem:[#allocation13 + $0x30] sm:$0xff]  }
 0x60e   : > { %4856 = vmatpush3.bf16.msra.mxu1 %v5457_v18  ;;  %v5467_v18 = vld [vmem:[#allocation16 + $0x20] sm:$0xff]  }
 0x60f   : > { %v5586_v29 = vpop.eup %5585  ;;  %5591 = vpow2.f32 %v1825_v28  ;;  %4857 = vmatprep.subr.bf16.mxu1 %v6324_v0 }
 0x610   : > { %v1704_v30 = vsel %vm1445_vm5, %v5586_v29, 0.0 }
 0x611   : > { %v5588_v31 = vpop.eup %5587  ;;  %1705 = vadd.xlane.f32.xlu1 %v1704_v30 }
 0x612   : > { %v1707_v32 = vsel %vm1445_vm5, %v5588_v31, 0.0 }
 0x613   : > { %1708 = vadd.xlane.f32.xlu0 %v1707_v32 }
 0x617   : > { %v5590_v33 = vpop.eup %5589 }
 0x618   : > { %v1827_v35 = vsel %vm1445_vm5, %v5590_v33, 0.0 }
 0x619   : > { %v5592_v36 = vpop.eup %5591  ;;  %1828 = vadd.xlane.f32.xlu1 %v1827_v35 }
 0x61a   : > { %v1830_v37 = vsel %vm1445_vm5, %v5592_v36, 0.0 }
 0x61b   : > { %1831 = vadd.xlane.f32.xlu0 %v1830_v37 }
 0x624   : > { %v1460_v38 = vpop.xlane.xlu1 %1459 }
 0x625   : > { %5593 = vrcp.f32 %v1460_v38 }
 0x626   : > { %v1463_v39 = vpop.xlane.xlu0 %1462 }
 0x627   : > { %5595 = vrcp.f32 %v1463_v39 }
 0x628   : > { %v1593_v47 = vpop.permute.xlu1 %1592 }
 0x62a   : > { %1838 = vrot.lane.b32.xlu1 %v7059_v8, %s6330_s8 }
 0x62f   : > { %v5594_v40 = vpop.eup %5593 }
 0x630   : > { %v1465_v42 = vmul.f32 %v5594_v40, %v5578_v2 }
 0x631   : > { %v5596_v41 = vpop.eup %5595  ;;  %1715 = vrot.lane.b32.xlu0 %v7059_v8, %s6328_s3 }
 0x632   : > { %v1467_v43 = vmul.f32 %v5596_v41, %v5580_v4 }
 0x634   : > { %v1468_v46 = vpack.c.bf16 %v1467_v43, %v1465_v42 }
 0x636   : > { %4812 = vmatmul.mubr.msk.bf16.vlgmr.msra.gmra.mrb[4].mxu0 %vm1445_vm5, %v1468_v46 }
 0x637   : > { %4822 = vmatpush3.bf16.msra.mxu0 %v1593_v47  ;;  %4823 = vmatprep.mubr.msk.bf16.mxu0 %vm6325_vm1, %v6324_v0 }
 0x638   : > { %4833 = vmatprep.subr.bf16.mxu0 %v6324_v0 }
 0x696   : > { %v1582_v51 = vpop.xlane.xlu1 %1581 }
 0x697   : > { %5597 = vrcp.f32 %v1582_v51 }
 0x69a   : > { %v1585_v53 = vpop.xlane.xlu0 %1584 }
 0x69b   : > { %5599 = vrcp.f32 %v1585_v53 }
 0x69e   : > { %v1706_v54 = vpop.xlane.xlu1 %1705 }
 0x69f   : > { %5601 = vrcp.f32 %v1706_v54 }
 0x6a0   : > { %v1709_v55 = vpop.xlane.xlu0 %1708 }
 0x6a1   : > { %5603 = vrcp.f32 %v1709_v55  ;;  %v5598_v8 = vpop.eup %5597 }
 0x6a2   : > { %v1587_v57 = vmul.f32 %v5598_v8, %v5582_v19  ;;  %v5458_v19 = vld [vmem:[#allocation13 + $0x18] sm:$0xff]  }
 0x6a3   : > { %4858 = vmatpush3.bf16.msra.mxu1 %v5458_v19  ;;  %v5468_v19 = vld [vmem:[#allocation16 + $0x28] sm:$0xff]  }
 0x6a4   : > { %4859 = vmatprep.subr.bf16.mxu1 %v6324_v0 }
 0x6a5   : > { %v5600_v56 = vpop.eup %5599 }
 0x6a6   : > { %v1589_v58 = vmul.f32 %v5600_v56, %v5584_v24  ;;  %v1829_v59 = vpop.xlane.xlu1 %1828  ;;  %v5460_v24 = vld [vmem:[#allocation13 + $0x28] sm:$0xff]  }
 0x6a7   : > { %5605 = vrcp.f32 %v1829_v59  ;;  %4860 = vmatpush3.bf16.msra.mxu1 %v5459_v20  ;;  %v5469_v20 = vld [vmem:[#allocation16 + $0x30] sm:$0xff]  }
 0x6a8   : > { %v1832_v60 = vpop.xlane.xlu0 %1831  ;;  %v1590_v61 = vpack.c.bf16 %v1589_v58, %v1587_v57  ;;  %4861 = vmatprep.subr.bf16.mxu1 %v6324_v0 }
 0x6a9   : > { %5607 = vrcp.f32 %v1832_v60  ;;  %v5602_v62 = vpop.eup %5601 }
 0x6aa   : > { %4824 = vmatmul.mubr.msk.bf16.vlgmr.msra.gmra.mrb[8].mxu0 %vm1445_vm5, %v1590_v61  ;;  %v1711_v3 = vmul.f32 %v5602_v62, %v5586_v29  ;;  %v1839_v6 = vpop.permute.xlu1 %1838  ;;  %v4486_v61 = vld [vmem:[%s7619_s17] ss:$0 sm:$0xff] }
 0x6ab   : > { %v5604_v63 = vpop.eup %5603  ;;  %4835 = vmatprep.mubr.msk.bf16.mxu0 %vm6325_vm1, %v6324_v0  ;;  %4862 = vmatpush3.bf16.msra.mxu1 %v5460_v24  ;;  %v5473_v24 = vld [vmem:[#allocation19 + $0x10] sm:$0xff]  }
 0x6ac   : > { %v1713_v1 = vmul.f32 %v5604_v63, %v5588_v31  ;;  %v1716_v2 = vpop.permute.xlu0 %1715  ;;  %4863 = vmatprep.subr.bf16.mxu1 %v6324_v0  ;;  %v5462_v31 = vld [vmem:[#allocation13 + $0x38] sm:$0xff]  }
 0x6ad   : > { %4834 = vmatpush3.bf16.msra.mxu0 %v1716_v2 }
 0x6ae   : > { %4845 = vmatprep.subr.bf16.mxu0 %v6324_v0  ;;  %v1714_v4 = vpack.c.bf16 %v1713_v1, %v1711_v3 }
 0x6af   : > { %4864 = vmatpush3.bf16.msra.mxu1 %v5461_v27  ;;  %v5476_v27 = vld [vmem:[#allocation19 + $0x28] sm:$0xff]  }
 0x6b0   : > { %4865 = vmatprep.subr.bf16.mxu1 %v6324_v0 }
 0x6b1   : > { %v5606_v5 = vpop.eup %5605 }
 0x6b2   : > { %4836 = vmatmul.mubr.msk.bf16.vlgmr.msra.gmra.mrb[12].mxu0 %vm1445_vm5, %v1714_v4  ;;  %v1834_v10 = vmul.f32 %v5606_v5, %v5590_v33 }
 0x6b3   : > { %v5608_v7 = vpop.eup %5607  ;;  %4846 = vmatpush3.bf16.msra.mxu0 %v1839_v6  ;;  %4847 = vmatprep.mubr.msk.bf16.mxu0 %vm6325_vm1, %v6324_v0 }
 0x6b4   : > { %v1836_v9 = vmul.f32 %v5608_v7, %v5592_v36  ;;  %4871 = vmatprep.subr.bf16.mxu0 %v6324_v0  ;;  %4866 = vmatpush3.bf16.msra.mxu1 %v5462_v31  ;;  %v5463_v7 = vld [vmem:[#allocation16] sm:$0xff]  }
 0x6b5   : > { %4891 = vmatprep.subr.bf16.mxu1 %v6324_v0 }
 0x6b6   : > { %v1837_v11 = vpack.c.bf16 %v1836_v9, %v1834_v10 }
 0x6ba   : > { %4848 = vmatmul.mubr.msk.bf16.vlgmr.msra.gmra.mrb[16].mxu0 %vm1445_vm5, %v1837_v11 }
 0x6bb   : > { %4887 = vmatprep.mubr.msk.bf16.mxu0 %vm6325_vm1, %v6324_v0  ;;  %4872 = vmatpush3.bf16.msra.mxu0 %v5463_v7 }
 0x6bc   : > { %4873 = vmatprep.subr.bf16.mxu0 %v6324_v0 }
 0x6bf   : > { %4874 = vmatpush3.bf16.msra.mxu0 %v5464_v17 }
 0x6c0   : > { %4875 = vmatprep.subr.bf16.mxu0 %v6324_v0 }
 0x709   : > { %v1506_v12 = vpop.f32.mrb[4].mxu0 }
 0x70a   : > { %v4813_v13 = vpop.f32.mrb[5].mxu0 }
 0x70b   : > { %v1509_v14 = vpop.f32.mrb[6].mxu0 }
 0x70c   : > { %v4814_v15 = vpop.f32.mrb[7].mxu0 }
 0x77d   : > { %v1632_v21 = vpop.f32.mrb[8].mxu0 }
 0x77e   : > { %v4825_v22 = vpop.f32.mrb[9].mxu0 }
 0x77f   : > { %v1635_v23 = vpop.f32.mrb[10].mxu0  ;;  %v5471_v22 = vld [vmem:[#allocation19] sm:$0xff]  }
 0x780   : > { %v5391_v25 = vpack.i.bf16 %v1635_v23, %v1632_v21  ;;  %v4826_v26 = vpop.f32.mrb[11].mxu0  ;;  %v5470_v21 = vld [vmem:[#allocation16 + $0x38] sm:$0xff]   ;;  %v5472_v23 = vld [vmem:[#allocation19 + $0x8] sm:$0xff]  }
 0x781   : > { %v5475_v26 = vld [vmem:[#allocation19 + $0x20] sm:$0xff]  }
 0x782   : > { %5392 = vrot.lane.b32.xlu1 %v5391_v25, %s6330_s8  ;;  %v5474_v25 = vld [vmem:[#allocation19 + $0x18] sm:$0xff]  }
 0x785   : > { %v1755_v28 = vpop.f32.mrb[12].mxu0 }
 0x786   : > { %v4837_v29 = vpop.f32.mrb[13].mxu0 }
 0x787   : > { %v1758_v30 = vpop.f32.mrb[14].mxu0 }
 0x788   : > { %v5396_v32 = vpack.i.bf16 %v1758_v30, %v1755_v28  ;;  %v4838_v33 = vpop.f32.mrb[15].mxu0 }
 0x78a   : > { %5397 = vrot.lane.b32.xlu0 %v5396_v32, %s6328_s3 }
 0x78d   : > { %v1878_v35 = vpop.f32.mrb[16].mxu0 }
 0x78e   : > { %v4849_v36 = vpop.f32.mrb[17].mxu0 }
 0x78f   : > { %v1881_v37 = vpop.f32.mrb[18].mxu0 }
 0x790   : > { %v5401_v38 = vpack.i.bf16 %v1881_v37, %v1878_v35  ;;  %v4850_v39 = vpop.f32.mrb[19].mxu0  ;;  %v7163_v35 = vld [vmem:[#allocation14] sm:$0xf] }
 0x792   : > { %5402 = vrot.lane.b32.xlu1 %v5401_v38, %s6329_s2  ;;  %v2059_v38 = vrot.slane %v7163_v35, %v7048_v49 }
 0x7f4   : > { %v5393_v40 = vpop.permute.xlu1 %5392 }
 0x7f5   : > { %v5395_v42 = vunpack.i.h.bf16 %v5393_v40  ;;  %v5394_v43 = vunpack.i.l.bf16 %v5393_v40 }
 0x7f7   : > { %v1910_v53 = vsel %vm1395_vm4, %v1509_v14, %v5395_v42  ;;  %v1909_v54 = vsel %vm1395_vm4, %v1506_v12, %v5394_v43  ;;  %v2065_v42 = vrot.slane %v7163_v35, %v7054_v52 }
 0x7fc   : > { %v5398_v41 = vpop.permute.xlu0 %5397 }
 0x7fd   : > { %v5400_v46 = vunpack.i.h.bf16 %v5398_v41  ;;  %v5399_v47 = vunpack.i.l.bf16 %v5398_v41 }
 0x7ff   : > { %v1913_v56 = vsel %vm1911_vm6, %v1910_v53, %v5400_v46  ;;  %v1912_v57 = vsel %vm1911_vm6, %v1909_v54, %v5399_v47  ;;  %v5477_v53 = vld [vmem:[#allocation19 + $0x30] sm:$0xff]   ;;  %v5478_v54 = vld [vmem:[#allocation19 + $0x38] sm:$0xff]  }
 0x804   : > { %v5403_v51 = vpop.permute.xlu1 %5402 }
 0x805   : > { %v5405_v55 = vunpack.i.h.bf16 %v5403_v51  ;;  %v5404_v8 = vunpack.i.l.bf16 %v5403_v51 }
 0x807   : > { %v1916_v58 = vsel %vm1914_vm7, %v1913_v56, %v5405_v55  ;;  %v1915_v59 = vsel %vm1914_vm7, %v1912_v57, %v5404_v8  ;;  %v4495_v55 = vld [vmem:[#allocation17] ss:$0 sm:$0xff] }
 0x808   : > { %v1917_v60 = vpack.c.bf16 %v1916_v58, %v1915_v59 }
 0x80a   : > { %4868 = vmatmul.mubr.bf16.vlgmr.msra.gmra.mrb[24].mxu1 %v1917_v60 }
 0x80b   : > { %4907 = vmatprep.mubr.msk.bf16.mxu1 %vm6325_vm1, %v6324_v0  ;;  %4892 = vmatpush3.bf16.msra.mxu1 %v5471_v22  ;;  %v5489_v22 = vld [vmem:[#allocation10 + $0xf4] ss:$12 sps:$4 sm:$0xff]  }
 0x80c   : > { %4893 = vmatprep.subr.bf16.mxu1 %v6324_v0 }
 0x80f   : > { %4894 = vmatpush3.bf16.msra.mxu1 %v5472_v23  ;;  %v5487_v23 = vld [vmem:[#allocation10 + $0xf0] ss:$12 sps:$4 sm:$0xff]  }
 0x810   : > { %4895 = vmatprep.subr.bf16.mxu1 %v6324_v0 }
 0x813   : > { %4896 = vmatpush3.bf16.msra.mxu1 %v5473_v24  ;;  %v5490_v24 = vld [vmem:[#allocation10 + $0xf8] ss:$12 sps:$4 sm:$0xff]  }
 0x814   : > { %4897 = vmatprep.subr.bf16.mxu1 %v6324_v0 }
 0x817   : > { %4898 = vmatpush3.bf16.msra.mxu1 %v5474_v25  ;;  %v5493_v25 = vld [vmem:[#allocation10 + $0x10c] ss:$12 sps:$4 sm:$0xff]  }
 0x818   : > { %4899 = vmatprep.subr.bf16.mxu1 %v6324_v0 }
 0x81b   : > { %4900 = vmatpush3.bf16.msra.mxu1 %v5475_v26  ;;  %v5491_v26 = vld [vmem:[#allocation10 + $0x108] ss:$12 sps:$4 sm:$0xff]  }
 0x81c   : > { %4901 = vmatprep.subr.bf16.mxu1 %v6324_v0 }
 0x81f   : > { %4902 = vmatpush3.bf16.msra.mxu1 %v5476_v27  ;;  %v5494_v27 = vld [vmem:[#allocation10 + $0x110] ss:$12 sps:$4 sm:$0xff]  }
 0x820   : > { %4903 = vmatprep.subr.bf16.mxu1 %v6324_v0 }
 0x823   : > { %4904 = vmatpush3.bf16.msra.mxu1 %v5477_v53 }
 0x824   : > { %4905 = vmatprep.subr.bf16.mxu1 %v6324_v0 }
 0x827   : > { %4906 = vmatpush3.bf16.msra.mxu1 %v5478_v54  ;;  %v2323_v54 = vrot.slane %v7163_v35, %v7051_v50 }
 0x828   : > { %4911 = vmatprep.subr.bf16.mxu1 %v6324_v0 }
 0x8dd   : > { %v2023_v62 = vpop.f32.mrb[24].mxu1 }
 0x8de   : > { %v2024_v63 = vadd.f32 %v4486_v61, %v2023_v62  ;;  %v4869_v1 = vpop.f32.mrb[25].mxu1 }
 0x8df   : > { %v2026_v2 = vpop.f32.mrb[26].mxu1 }
 0x8e0   : > { %v2027_v3 = vadd.f32 %v4486_v61, %v2026_v2  ;;  %v4870_v4 = vpop.f32.mrb[27].mxu1  ;;  %v2031_v5 = vadd.f32 %v2024_v63, %v7035_v44  ;;  %v5465_v44 = vld [vmem:[#allocation16 + $0x10] sm:$0xff]  }
 0x8e1   : > { %4876 = vmatpush3.bf16.msra.mxu0 %v5465_v44 }
 0x8e2   : > { %2033 = vadd.xlane.f32.xlu0 %v2031_v5  ;;  %v2032_v6 = vadd.f32 %v2027_v3, %v7037_v45  ;;  %4877 = vmatprep.subr.bf16.mxu0 %v6324_v0  ;;  %v5466_v45 = vld [vmem:[#allocation16 + $0x18] sm:$0xff]  }
 0x8e4   : > { %2035 = vadd.xlane.f32.xlu1 %v2032_v6 }
 0x8e5   : > { %4878 = vmatpush3.bf16.msra.mxu0 %v5466_v45 }
 0x8e6   : > { %4879 = vmatprep.subr.bf16.mxu0 %v6324_v0 }
 0x8e9   : > { %4880 = vmatpush3.bf16.msra.mxu0 %v5467_v18 }
 0x8ea   : > { %4881 = vmatprep.subr.bf16.mxu0 %v6324_v0 }
 0x8ed   : > { %4882 = vmatpush3.bf16.msra.mxu0 %v5468_v19 }
 0x8ee   : > { %4883 = vmatprep.subr.bf16.mxu0 %v6324_v0 }
 0x8f1   : > { %4884 = vmatpush3.bf16.msra.mxu0 %v5469_v20 }
 0x8f2   : > { %4885 = vmatprep.subr.bf16.mxu0 %v6324_v0 }
 0x8f5   : > { %4886 = vmatpush3.bf16.msra.mxu0 %v5470_v21 }
 0x96f   : > { %v2034_v9 = vpop.xlane.xlu0 %2033 }
 0x970   : > { %v2038_v10 = vmul.f32 0.0078125, %v2034_v9 }
 0x971   : > { %v2036_v11 = vpop.xlane.xlu1 %2035 }
 0x972   : > { %v2040_v12 = vsub.f32 %v2031_v5, %v2038_v10  ;;  %v2039_v13 = vmul.f32 0.0078125, %v2036_v11  ;;  %v5479_v10 = vld [vmem:[#allocation10 + $0xc0] ss:$12 sps:$4 sm:$0xff]   ;;  %v5481_v11 = vld [vmem:[#allocation10 + $0xc4] ss:$12 sps:$4 sm:$0xff]  }
 0x973   : > { %2512 = vmatprep.subr.bf16.mxu0 %v5481_v11 }
 0x974   : > { %v2041_v14 = vsub.f32 %v2032_v6, %v2039_v13  ;;  %v2042_v15 = vmul.f32 %v2040_v12, %v2040_v12  ;;  %v5485_v13 = vld [vmem:[#allocation10 + $0xdc] ss:$12 sps:$4 sm:$0xff]  }
 0x976   : > { %2044 = vadd.xlane.f32.xlu0 %v2042_v15  ;;  %v2043_v16 = vmul.f32 %v2041_v14, %v2041_v14  ;;  %v5483_v15 = vld [vmem:[#allocation10 + $0xd8] ss:$12 sps:$4 sm:$0xff]  }
 0x97a   : > { %2046 = vadd.xlane.f32.xlu0 %v2043_v16 }
 0xa03   : > { %v2045_v28 = vpop.xlane.xlu0 %2044 }
 0xa04   : > { %v2048_v29 = vmul.f32 0.0078125, %v2045_v28  ;;  %v5497_v28 = vld [vmem:[#allocation10 + $0x124] ss:$12 sps:$4 sm:$0xff]  }
 0xa06   : > { %v2050_v30 = vadd.f32 1e-05, %v2048_v29  ;;  %v5495_v29 = vld [vmem:[#allocation10 + $0x120] ss:$12 sps:$4 sm:$0xff]  }
 0xa07   : > { %v2047_v31 = vpop.xlane.xlu0 %2046 }
 0xa08   : > { %5609 = vrsqrt.f32 %v2050_v30  ;;  %v2049_v32 = vmul.f32 0.0078125, %v2047_v31  ;;  %v5498_v30 = vld [vmem:[#allocation10 + $0x128] ss:$12 sps:$4 sm:$0xff]  }
 0xa09   : > { %v5501_v31 = vld [vmem:[#allocation10 + $0x13c] ss:$12 sps:$4 sm:$0xff]  }
 0xa0a   : > { %v2051_v33 = vadd.f32 1e-05, %v2049_v32  ;;  %v5499_v32 = vld [vmem:[#allocation10 + $0x138] ss:$12 sps:$4 sm:$0xff]  }
 0xa0c   : > { %5611 = vrsqrt.f32 %v2051_v33  ;;  %v5502_v33 = vld [vmem:[#allocation10 + $0x140] ss:$12 sps:$4 sm:$0xff]  }
 0xa12   : > { %v5610_v36 = vpop.eup %5609 }
 0xa13   : > { %v2054_v37 = vmul.f32 %v5610_v36, %v2040_v12  ;;  %v5482_v12 = vld [vmem:[#allocation10 + $0xc8] ss:$12 sps:$4 sm:$0xff]   ;;  %v5503_v36 = vld [vmem:[#allocation10 + $0x150] ss:$12 sps:$4 sm:$0xff]  }
 0xa15   : > { %v2060_v41 = vmul.f32 %v2059_v38, %v2054_v37  ;;  %v5505_v37 = vld [vmem:[#allocation10 + $0x154] ss:$12 sps:$4 sm:$0xff]  }
 0xa16   : > { %v5612_v39 = vpop.eup %5611 }
 0xa17   : > { %v2055_v40 = vmul.f32 %v5612_v39, %v2041_v14  ;;  %v2066_v46 = vadd.f32 %v2065_v42, %v2060_v41  ;;  %v5486_v14 = vld [vmem:[#allocation10 + $0xe0] ss:$12 sps:$4 sm:$0xff]   ;;  %v5510_v41 = vld [vmem:[#allocation10 + $0x170] ss:$12 sps:$4 sm:$0xff]  }
 0xa18   : > { %v5509_v39 = vld [vmem:[#allocation10 + $0x16c] ss:$12 sps:$4 sm:$0xff]  }
 0xa19   : > { %v2061_v43 = vmul.f32 %v2059_v38, %v2055_v40  ;;  %v5506_v38 = vld [vmem:[#allocation10 + $0x158] ss:$12 sps:$4 sm:$0xff]   ;;  %v5507_v40 = vld [vmem:[#allocation10 + $0x168] ss:$12 sps:$4 sm:$0xff]  }
 0xa1b   : > { %v2067_v47 = vadd.f32 %v2065_v42, %v2061_v43 }
 0xa1d   : > { %v2068_v51 = vpack.c.bf16 %v2067_v47, %v2066_v46 }
 0xa1f   : > { %4888 = vmatmul.mubr.bf16.vlgmr.msra.gmra.mrb[20].mxu0 %v2068_v51 }
 0xa20   : > { %2544 = vmatprep.mubr.bf16.mxu0 %v6327_v34  ;;  %v4504_v34 = vld [vmem:[#allocation20] ss:$0 sm:$0xff]  ;;  %2513 = vmatpush1.bf16.msra.mxu0 %v5479_v10 }
 0xa21   : > { %2514 = vmatprep.subr.bf16.mxu0 %v5485_v13 }
 0xa24   : > { %2515 = vmatpush1.bf16.msra.mxu0 %v5483_v15 }
 0xa25   : > { %2516 = vmatprep.subr.bf16.mxu0 %v5489_v22 }
 0xa28   : > { %2517 = vmatpush1.bf16.msra.mxu0 %v5487_v23 }
 0xa29   : > { %2518 = vmatprep.subr.bf16.mxu0 %v5493_v25 }
 0xa2c   : > { %2519 = vmatpush1.bf16.msra.mxu0 %v5491_v26 }
 0xa2d   : > { %2520 = vmatprep.subr.bf16.mxu0 %v5497_v28 }
 0xa30   : > { %2521 = vmatpush1.bf16.msra.mxu0 %v5495_v29 }
 0xa31   : > { %2522 = vmatprep.subr.bf16.mxu0 %v5501_v31 }
 0xa34   : > { %2523 = vmatpush1.bf16.msra.mxu0 %v5499_v32 }
 0xa35   : > { %2524 = vmatprep.subr.bf16.mxu0 %v5505_v37 }
 0xa38   : > { %2525 = vmatpush1.bf16.msra.mxu0 %v5503_v36 }
 0xa39   : > { %2526 = vmatprep.subr.bf16.mxu0 %v5509_v39 }
 0xa3c   : > { %2527 = vmatpush1.bf16.msra.mxu0 %v5507_v40 }
 0xa3d   : > { %4931 = vmatprep.subr.bf16.mxu0 %v6324_v0 }
 0xaf2   : > { %v2174_v8 = vpop.f32.mrb[20].mxu0 }
 0xaf3   : > { %v2175_v56 = vadd.f32 %v4495_v55, %v2174_v8  ;;  %v4889_v57 = vpop.f32.mrb[21].mxu0 }
 0xaf4   : > { %v2177_v58 = vpop.f32.mrb[22].mxu0 }
 0xaf5   : > { %v2178_v59 = vadd.f32 %v4495_v55, %v2177_v58  ;;  %v4890_v60 = vpop.f32.mrb[23].mxu0  ;;  %v2181_v61 = vmax.f32 %v2175_v56, 0.0  ;;  %v2328_v55 = vsub.s32 3, %v7045_v48 }
 0xaf7   : > { %v2182_v62 = vmax.f32 %v2178_v59, 0.0  ;;  %v2329_v60 = vrot.slane %v7163_v35, %v2328_v55 }
 0xaf9   : > { %v2183_v63 = vpack.c.bf16 %v2182_v62, %v2181_v61 }
 0xafb   : > { %4908 = vmatmul.mubr.bf16.vlgmr.msra.gmra.mrb[28].mxu1 %v2183_v63 }
 0xafc   : > { %4927 = vmatprep.mubr.msk.bf16.mxu1 %vm6325_vm1, %v6324_v0  ;;  %4912 = vmatpush3.bf16.msra.mxu1 %v5482_v12 }
 0xafd   : > { %4913 = vmatprep.subr.bf16.mxu1 %v6324_v0 }
 0xb00   : > { %4914 = vmatpush3.bf16.msra.mxu1 %v5486_v14 }
 0xb01   : > { %4915 = vmatprep.subr.bf16.mxu1 %v6324_v0 }
 0xb04   : > { %4916 = vmatpush3.bf16.msra.mxu1 %v5490_v24 }
 0xb05   : > { %4917 = vmatprep.subr.bf16.mxu1 %v6324_v0 }
 0xb08   : > { %4918 = vmatpush3.bf16.msra.mxu1 %v5494_v27 }
 0xb09   : > { %4919 = vmatprep.subr.bf16.mxu1 %v6324_v0 }
 0xb0c   : > { %4920 = vmatpush3.bf16.msra.mxu1 %v5498_v30 }
 0xb0d   : > { %4921 = vmatprep.subr.bf16.mxu1 %v6324_v0 }
 0xb10   : > { %4922 = vmatpush3.bf16.msra.mxu1 %v5502_v33 }
 0xb11   : > { %4923 = vmatprep.subr.bf16.mxu1 %v6324_v0 }
 0xb14   : > { %4924 = vmatpush3.bf16.msra.mxu1 %v5506_v38 }
 0xb15   : > { %4925 = vmatprep.subr.bf16.mxu1 %v6324_v0 }
 0xb18   : > { %4926 = vmatpush3.bf16.msra.mxu1 %v5510_v41 }
 0xb19   : > { %4955 = vmatprep.subr.bf16.mxu1 %v6324_v0 }
 0xbce   : > { %v2289_v1 = vpop.f32.mrb[28].mxu1 }
 0xbcf   : > { %v2290_v2 = vadd.f32 %v4504_v34, %v2289_v1  ;;  %v4909_v3 = vpop.f32.mrb[29].mxu1  ;;  %v2367_v1 = vld [vmem:[#allocation11 + $0x3] sm:$0x7] }
 0xbd0   : > { %v2292_v4 = vpop.f32.mrb[30].mxu1  ;;  %v2380_v35 = vrot.slane %v2367_v1, %v7051_v50 }
 0xbd1   : > { %v2293_v5 = vadd.f32 %v4504_v34, %v2292_v4  ;;  %v4910_v6 = vpop.f32.mrb[31].mxu1  ;;  %v2296_v7 = vadd.f32 %v2290_v2, %v2066_v46  ;;  %v2372_v2 = vrot.slane %v2367_v1, %v7048_v49 }
 0xbd3   : > { %2298 = vadd.xlane.f32.xlu1 %v2296_v7  ;;  %v2297_v9 = vadd.f32 %v2293_v5, %v2067_v47  ;;  %v2376_v5 = vrot.slane %v2367_v1, %v7054_v52 }
 0xbd5   : > { %2300 = vadd.xlane.f32.xlu0 %v2297_v9 }
 0xc60   : > { %v2299_v16 = vpop.xlane.xlu1 %2298 }
 0xc61   : > { %v2302_v17 = vmul.f32 0.0078125, %v2299_v16 }
 0xc62   : > { %v2301_v44 = vpop.xlane.xlu0 %2300 }
 0xc63   : > { %v2304_v45 = vsub.f32 %v2296_v7, %v2302_v17  ;;  %v2303_v18 = vmul.f32 0.0078125, %v2301_v44 }
 0xc65   : > { %v2305_v19 = vsub.f32 %v2297_v9, %v2303_v18  ;;  %v2306_v20 = vmul.f32 %v2304_v45, %v2304_v45 }
 0xc67   : > { %2308 = vadd.xlane.f32.xlu1 %v2306_v20  ;;  %v2307_v21 = vmul.f32 %v2305_v19, %v2305_v19 }
 0xc69   : > { %2310 = vadd.xlane.f32.xlu0 %v2307_v21 }
 0xcf4   : > { %v2309_v42 = vpop.xlane.xlu1 %2308 }
 0xcf5   : > { %v2312_v43 = vmul.f32 0.0078125, %v2309_v42 }
 0xcf6   : > { %v2311_v46 = vpop.xlane.xlu0 %2310 }
 0xcf7   : > { %v2314_v47 = vadd.f32 1e-05, %v2312_v43  ;;  %v2313_v51 = vmul.f32 0.0078125, %v2311_v46 }
 0xcf9   : > { %5613 = vrsqrt.f32 %v2314_v47  ;;  %v2315_v53 = vadd.f32 1e-05, %v2313_v51 }
 0xcfb   : > { %5615 = vrsqrt.f32 %v2315_v53 }
 0xd03   : > { %v5614_v8 = vpop.eup %5613 }
 0xd04   : > { %v2318_v56 = vmul.f32 %v5614_v8, %v2304_v45 }
 0xd05   : > { %v5616_v57 = vpop.eup %5615 }
 0xd06   : > { %v2319_v58 = vmul.f32 %v5616_v57, %v2305_v19  ;;  %v2324_v59 = vmul.f32 %v2323_v54, %v2318_v56 }
 0xd08   : > { %v2325_v61 = vmul.f32 %v2323_v54, %v2319_v58  ;;  %v7189_v62 = vadd.f32 %v2329_v60, %v2324_v59 }
 0xd0a   : > { %v7191_v63 = vadd.f32 %v2329_v60, %v2325_v61 }
 0xd0c   : > { %v2332_v34 = vpack.c.bf16 %v7191_v63, %v7189_v62 }
 0xd0e   : > { %2545 = vmatmul.mubr.bf16.vlgmr.msra.gmra.mrb[24].mxu0 %v2332_v34  ;;  %4928 = vmatmul.mubr.bf16.vlgmr.msra.gmra.mrb[32].mxu1 %v2332_v34 }
 0xd0f   : > { %4933 = vmatprep.mubr.msk.bf16.mxu0 %vm6325_vm1, %v6324_v0  ;;  %4957 = vmatprep.mubr.msk.bf16.mxu1 %vm6325_vm1, %v6324_v0 }
 0xde1   : > { %v2546_v3 = vpop.f32.mrb[24].mxu0  ;;  %v2589_v4 = vpop.f32.mrb[32].mxu1 }
 0xde2   : > { %v2548_v6 = vpop.f32.mrb[25].mxu0  ;;  %v4929_v7 = vpop.f32.mrb[33].mxu1  ;;  %v2547_v11 = vadd.f32 %v2546_v3, %v2372_v2  ;;  %v2590_v12 = vadd.f32 %v2589_v4, %v2380_v35 }
 0xde3   : > { %v2550_v9 = vpop.f32.mrb[26].mxu0  ;;  %v2592_v10 = vpop.f32.mrb[34].mxu1  ;;  %v2549_v17 = vadd.f32 %v2548_v6, %v2376_v5 }
 0xde4   : > { %v2551_v13 = vadd.f32 %v2550_v9, %v2372_v2  ;;  %v2593_v14 = vadd.f32 %v2592_v10, %v2380_v35  ;;  %v2552_v15 = vpop.f32.mrb[27].mxu0  ;;  %v4930_v16 = vpop.f32.mrb[35].mxu1 }
 0xde5   : > { %v2553_v44 = vadd.f32 %v2552_v15, %v2376_v5 }
 0xde6   : > { %v2596_v45 = vpack.c.bf16 %v2551_v13, %v2547_v11  ;;  %v7202_v18 = vpack.c.bf16 %v2593_v14, %v2590_v12 }
 0xde7   : > { %v2597_v19 = vpack.c.bf16 %v2553_v44, %v2549_v17 }
 0xde9   : > { %v2603_v20 = vsel %vm1395_vm4, %v2597_v19, 0 }
 0xdea   : > { %4932 = vmatpush3.bf16.xpose.msra.mxu0 %v2603_v20 }
 0xdeb   : > { %4937 = vmatprep.subr.bf16.mxu0 %v6324_v0 }
 0xdf1   : > { %4934 = vmatmul.mubr.msk.bf16.vlgmr.msra.gmra.mrb[28].mxu0 %vm1395_vm4, %v2596_v45 }
 0xdf2   : > { %4938 = vmatpush3.bf16.msra.mxu0 %v7202_v18  ;;  %4939 = vmatprep.mubr.msk.bf16.mxu0 %vm6325_vm1, %v6324_v0 }
 0xdf3   : > { %4943 = vmatprep.subr.bf16.mxu0 %v6324_v0 }
 0xec4   : > { %v2639_v21 = vpop.f32.mrb[28].mxu0 }
 0xec5   : > { %v2646_v22 = vmul.f32 0.17677669, %v2639_v21  ;;  %v4935_v23 = vpop.f32.mrb[29].mxu0 }
 0xec6   : > { %v2642_v24 = vpop.f32.mrb[30].mxu0 }
 0xec7   : > { %v2647_v25 = vmul.f32 0.17677669, %v2642_v24  ;;  %v4936_v26 = vpop.f32.mrb[31].mxu0  ;;  %v2648_v27 = vsel %vm1445_vm5, %v2646_v22, -inf }
 0xec8   : > { %2649 = vmax.xlane.f32.xlu1 %v2648_v27 }
 0xec9   : > { %v2651_v28 = vsel %vm1445_vm5, %v2647_v25, -inf }
 0xeca   : > { %2652 = vmax.xlane.f32.xlu0 %v2651_v28 }
 0xf55   : > { %v2650_v29 = vpop.xlane.xlu1 %2649 }
 0xf56   : > { %v2654_v30 = vsub.f32 %v2646_v22, %v2650_v29 }
 0xf57   : > { %v2653_v31 = vpop.xlane.xlu0 %2652 }
 0xf58   : > { %v2656_v32 = vmul.f32 1.442695, %v2654_v30  ;;  %v2655_v33 = vsub.f32 %v2647_v25, %v2653_v31 }
 0xf5a   : > { %5617 = vpow2.f32 %v2656_v32  ;;  %v2658_v36 = vmul.f32 1.442695, %v2655_v33 }
 0xf5c   : > { %5619 = vpow2.f32 %v2658_v36 }
 0xf64   : > { %v5618_v37 = vpop.eup %5617 }
 0xf65   : > { %v2660_v38 = vsel %vm1445_vm5, %v5618_v37, 0.0 }
 0xf66   : > { %v5620_v39 = vpop.eup %5619  ;;  %2661 = vadd.xlane.f32.xlu1 %v2660_v38 }
 0xf67   : > { %v2663_v40 = vsel %vm1445_vm5, %v5620_v39, 0.0 }
 0xf68   : > { %2664 = vadd.xlane.f32.xlu0 %v2663_v40 }
 0xf77   : > { %2719 = vrot.lane.b32.xlu1 %v2597_v19, %s6329_s2 }
 0xf7b   : > { %2843 = vrot.lane.b32.xlu1 %v2597_v19, %s6328_s3 }
 0xf7e   : > { %2716 = vrot.lane.b32.xlu0 %v2596_v45, %s6329_s2 }
 0xf7f   : > { %2841 = vrot.lane.b32.xlu1 %v2596_v45, %s6328_s3 }
 0xf82   : > { %2966 = vrot.lane.b32.xlu0 %v2597_v19, %s6330_s8 }
 0xf83   : > { %2964 = vrot.lane.b32.xlu1 %v2596_v45, %s6330_s8 }
 0xff3   : > { %v2662_v41 = vpop.xlane.xlu1 %2661 }
 0xff4   : > { %5621 = vrcp.f32 %v2662_v41 }
 0xff5   : > { %v2665_v42 = vpop.xlane.xlu0 %2664 }
 0xff6   : > { %5623 = vrcp.f32 %v2665_v42 }
 0xff7   : > { %v2720_v43 = vpop.permute.xlu1 %2719 }
 0xff8   : > { %v2725_v61 = vsel %vm1395_vm4, %v2720_v43, 0 }
 0xff9   : > { %v2717_v46 = vpop.permute.xlu0 %2716 }
 0xffb   : > { %v2844_v47 = vpop.permute.xlu1 %2843 }
 0xffc   : > { %v2849_v51 = vsel %vm1395_vm4, %v2844_v47, 0 }
 0xffd   : > { %4956 = vmatpush3.bf16.xpose.msra.mxu1 %v2849_v51  ;;  %v2967_v57 = vpop.permute.xlu0 %2966 }
 0xffe   : > { %v5622_v53 = vpop.eup %5621  ;;  %4967 = vmatprep.subr.bf16.mxu1 %v6324_v0  ;;  %v2972_v60 = vsel %vm1395_vm4, %v2967_v57, 0 }
 0xfff   : > { %v2667_v8 = vmul.f32 %v5622_v53, %v5618_v37  ;;  %v2842_v58 = vpop.permute.xlu1 %2841 }
0x1000   : > { %v5624_v54 = vpop.eup %5623 }
0x1001   : > { %v2669_v56 = vmul.f32 %v5624_v54, %v5620_v39 }
0x1003   : > { %v2670_v59 = vpack.c.bf16 %v2669_v56, %v2667_v8  ;;  %v2965_v34 = vpop.permute.xlu1 %2964 }
0x1004   : > { %4958 = vmatmul.mubr.msk.bf16.vlgmr.msra.gmra.mrb[36].mxu1 %vm1395_vm4, %v2842_v58 }
0x1005   : > { %4940 = vmatmul.mubr.msk.bf16.vlgmr.msra.gmra.mrb[32].mxu0 %vm1445_vm5, %v2670_v59  ;;  %4968 = vmatpush3.bf16.xpose.msra.mxu1 %v2972_v60 }
0x1006   : > { %4944 = vmatpush3.bf16.xpose.msra.mxu0 %v2725_v61  ;;  %4969 = vmatprep.mubr.msk.bf16.mxu1 %vm6325_vm1, %v6324_v0 }
0x1007   : > { %4945 = vmatprep.mubr.msk.bf16.mxu0 %vm6325_vm1, %v6324_v0  ;;  %4949 = vmatprep.subr.bf16.mxu0 %v6324_v0 }
0x1008   : > { %4979 = vmatprep.subr.bf16.mxu1 %v6324_v0 }
0x100c   : > { %4970 = vmatmul.mubr.msk.bf16.vlgmr.msra.gmra.mrb[40].mxu1 %vm1395_vm4, %v2965_v34 }
0x100d   : > { %4946 = vmatmul.mubr.msk.bf16.vlgmr.msra.gmra.mrb[36].mxu0 %vm1395_vm4, %v2717_v46  ;;  %4995 = vmatprep.mubr.msk.bf16.mxu1 %vm6325_vm1, %v6324_v0 }
0x100e   : > { %4951 = vmatprep.mubr.msk.bf16.mxu0 %vm6325_vm1, %v6324_v0 }
0x10d7   : > { %v2885_v1 = vpop.f32.mrb[36].mxu1 }
0x10d8   : > { %v7239_v2 = vpop.f32.mrb[32].mxu0  ;;  %v4959_v35 = vpop.f32.mrb[37].mxu1  ;;  %v2892_v17 = vmul.f32 0.17677669, %v2885_v1 }
0x10d9   : > { %v4941_v3 = vpop.f32.mrb[33].mxu0  ;;  %v2888_v4 = vpop.f32.mrb[38].mxu1 }
0x10da   : > { %v7241_v5 = vpop.f32.mrb[34].mxu0  ;;  %v4960_v6 = vpop.f32.mrb[39].mxu1  ;;  %v2893_v22 = vmul.f32 0.17677669, %v2888_v4  ;;  %v2894_v23 = vsel %vm1445_vm5, %v2892_v17, -inf }
0x10db   : > { %v4942_v7 = vpop.f32.mrb[35].mxu0 }
0x10dc   : > { %v2897_v26 = vsel %vm1445_vm5, %v2893_v22, -inf }
0x10df   : > { %v3008_v9 = vpop.f32.mrb[40].mxu1 }
0x10e0   : > { %v2761_v10 = vpop.f32.mrb[36].mxu0  ;;  %v4971_v11 = vpop.f32.mrb[41].mxu1  ;;  %v3015_v20 = vmul.f32 0.17677669, %v3008_v9 }
0x10e1   : > { %v2768_v12 = vmul.f32 0.17677669, %v2761_v10  ;;  %v4947_v13 = vpop.f32.mrb[37].mxu0  ;;  %v3011_v14 = vpop.f32.mrb[42].mxu1 }
0x10e2   : > { %v2764_v15 = vpop.f32.mrb[38].mxu0  ;;  %v4972_v16 = vpop.f32.mrb[43].mxu1  ;;  %v3017_v24 = vsel %vm1445_vm5, %v3015_v20, -inf  ;;  %v3016_v25 = vmul.f32 0.17677669, %v3011_v14 }
0x10e3   : > { %v2769_v44 = vmul.f32 0.17677669, %v2764_v15  ;;  %v4948_v45 = vpop.f32.mrb[39].mxu0  ;;  %v2770_v19 = vsel %vm1445_vm5, %v2768_v12, -inf }
0x10e4   : > { %2771 = vmax.xlane.f32.xlu0 %v2770_v19  ;;  %v3020_v27 = vsel %vm1445_vm5, %v3016_v25, -inf }
0x10e5   : > { %v2773_v21 = vsel %vm1445_vm5, %v2769_v44, -inf }
0x10e6   : > { %2774 = vmax.xlane.f32.xlu1 %v2773_v21 }
0x10e8   : > { %2895 = vmax.xlane.f32.xlu0 %v2894_v23 }
0x10ea   : > { %3018 = vmax.xlane.f32.xlu1 %v3017_v24 }
0x10ec   : > { %2898 = vmax.xlane.f32.xlu0 %v2897_v26 }
0x10f0   : > { %3021 = vmax.xlane.f32.xlu0 %v3020_v27 }
0x1171   : > { %v2772_v28 = vpop.xlane.xlu0 %2771 }
0x1172   : > { %v2776_v32 = vsub.f32 %v2768_v12, %v2772_v28  ;;  %v5511_v28 = vld [vmem:[#allocation13 + $0x40] sm:$0xff]  }
0x1173   : > { %v2775_v29 = vpop.xlane.xlu1 %2774  ;;  %4980 = vmatpush3.bf16.msra.mxu1 %v5511_v28 }
0x1174   : > { %v2777_v36 = vsub.f32 %v2769_v44, %v2775_v29  ;;  %v2778_v42 = vmul.f32 1.442695, %v2776_v32  ;;  %v5512_v29 = vld [vmem:[#allocation13 + $0x48] sm:$0xff]   ;;  %4981 = vmatprep.subr.bf16.mxu1 %v6324_v0  ;;  %v5515_v32 = vld [vmem:[#allocation13 + $0x60] sm:$0xff]  }
0x1175   : > { %v2896_v30 = vpop.xlane.xlu0 %2895 }
0x1176   : > { %v2900_v31 = vsub.f32 %v2892_v17, %v2896_v30  ;;  %v2780_v43 = vmul.f32 1.442695, %v2777_v36  ;;  %v5513_v30 = vld [vmem:[#allocation13 + $0x50] sm:$0xff]  }
0x1177   : > { %v3019_v33 = vpop.xlane.xlu1 %3018  ;;  %4982 = vmatpush3.bf16.msra.mxu1 %v5512_v29  ;;  %v5520_v29 = vld [vmem:[#allocation16 + $0x48] sm:$0xff]  }
0x1178   : > { %v2902_v37 = vmul.f32 1.442695, %v2900_v31  ;;  %v3023_v38 = vsub.f32 %v3015_v20, %v3019_v33  ;;  %4983 = vmatprep.subr.bf16.mxu1 %v6324_v0  ;;  %v5514_v31 = vld [vmem:[#allocation13 + $0x58] sm:$0xff]  }
0x1179   : > { %v2899_v39 = vpop.xlane.xlu0 %2898 }
0x117a   : > { %5625 = vpow2.f32 %v2902_v37  ;;  %v3025_v40 = vmul.f32 1.442695, %v3023_v38  ;;  %v2901_v41 = vsub.f32 %v2893_v22, %v2899_v39  ;;  %v5516_v37 = vld [vmem:[#allocation13 + $0x68] sm:$0xff]  }
0x117b   : > { %4984 = vmatpush3.bf16.msra.mxu1 %v5513_v30  ;;  %v5523_v30 = vld [vmem:[#allocation16 + $0x60] sm:$0xff]  }
0x117c   : > { %5627 = vpow2.f32 %v3025_v40  ;;  %v2904_v46 = vmul.f32 1.442695, %v2901_v41  ;;  %4985 = vmatprep.subr.bf16.mxu1 %v6324_v0  ;;  %v5517_v41 = vld [vmem:[#allocation13 + $0x70] sm:$0xff]  }
0x117d   : > { %v3022_v47 = vpop.xlane.xlu0 %3021 }
0x117e   : > { %5629 = vpow2.f32 %v2904_v46  ;;  %v3024_v51 = vsub.f32 %v3016_v25, %v3022_v47  ;;  %v5518_v46 = vld [vmem:[#allocation13 + $0x78] sm:$0xff]  }
0x117f   : > { %5631 = vpow2.f32 %v2778_v42  ;;  %4986 = vmatpush3.bf16.msra.mxu1 %v5514_v31  ;;  %v5524_v31 = vld [vmem:[#allocation16 + $0x68] sm:$0xff]  }
0x1180   : > { %5633 = vpow2.f32 %v2780_v43  ;;  %v3027_v53 = vmul.f32 1.442695, %v3024_v51  ;;  %4987 = vmatprep.subr.bf16.mxu1 %v6324_v0 }
0x1182   : > { %5635 = vpow2.f32 %v3027_v53 }
0x1183   : > { %4988 = vmatpush3.bf16.msra.mxu1 %v5515_v32  ;;  %v5525_v32 = vld [vmem:[#allocation16 + $0x70] sm:$0xff]  }
0x1184   : > { %v5626_v54 = vpop.eup %5625  ;;  %4989 = vmatprep.subr.bf16.mxu1 %v6324_v0 }
0x1185   : > { %v2906_v8 = vsel %vm1445_vm5, %v5626_v54, 0.0 }
0x1186   : > { %v5628_v56 = vpop.eup %5627  ;;  %2907 = vadd.xlane.f32.xlu1 %v2906_v8 }
0x1187   : > { %v3029_v59 = vsel %vm1445_vm5, %v5628_v56, 0.0  ;;  %4990 = vmatpush3.bf16.msra.mxu1 %v5516_v37  ;;  %v5528_v37 = vld [vmem:[#allocation19 + $0x48] sm:$0xff]  }
0x1188   : > { %v5630_v57 = vpop.eup %5629  ;;  %4991 = vmatprep.subr.bf16.mxu1 %v6324_v0 }
0x1189   : > { %v5632_v58 = vpop.eup %5631  ;;  %v2909_v60 = vsel %vm1445_vm5, %v5630_v57, 0.0 }
0x118a   : > { %v5634_v61 = vpop.eup %5633  ;;  %3030 = vadd.xlane.f32.xlu1 %v3029_v59  ;;  %2910 = vadd.xlane.f32.xlu0 %v2909_v60  ;;  %v2782_v34 = vsel %vm1445_vm5, %v5632_v58, 0.0 }
0x118b   : > { %v2785_v1 = vsel %vm1445_vm5, %v5634_v61, 0.0  ;;  %4992 = vmatpush3.bf16.msra.mxu1 %v5517_v41  ;;  %v5532_v41 = vld [vmem:[#allocation19 + $0x68] sm:$0xff]  }
0x118c   : > { %v5636_v35 = vpop.eup %5635  ;;  %4993 = vmatprep.subr.bf16.mxu1 %v6324_v0 }
0x118d   : > { %v3032_v3 = vsel %vm1445_vm5, %v5636_v35, 0.0 }
0x118e   : > { %2783 = vadd.xlane.f32.xlu1 %v2782_v34  ;;  %2786 = vadd.xlane.f32.xlu0 %v2785_v1 }
0x118f   : > { %4994 = vmatpush3.bf16.msra.mxu1 %v5518_v46 }
0x1190   : > { %5019 = vmatprep.subr.bf16.mxu1 %v6324_v0 }
0x1192   : > { %3033 = vadd.xlane.f32.xlu0 %v3032_v3 }
0x119f   : > { %2794 = vrot.lane.b32.xlu1 %v7202_v18, %s6329_s2 }
0x11a3   : > { %3040 = vrot.lane.b32.xlu1 %v7202_v18, %s6330_s8 }
0x11a8   : > { %2917 = vrot.lane.b32.xlu0 %v7202_v18, %s6328_s3 }
0x1213   : > { %v2908_v4 = vpop.xlane.xlu1 %2907 }
0x1217   : > { %v3031_v6 = vpop.xlane.xlu1 %3030  ;;  %v2911_v7 = vpop.xlane.xlu0 %2910 }
0x121b   : > { %v2784_v9 = vpop.xlane.xlu1 %2783  ;;  %v2787_v10 = vpop.xlane.xlu0 %2786 }
0x121c   : > { %5637 = vrcp.f32 %v2784_v9 }
0x121d   : > { %5639 = vrcp.f32 %v2787_v10 }
0x121e   : > { %5641 = vrcp.f32 %v2911_v7 }
0x121f   : > { %v2795_v11 = vpop.permute.xlu1 %2794  ;;  %5643 = vrcp.f32 %v2908_v4  ;;  %v3034_v13 = vpop.xlane.xlu0 %3033 }
0x1220   : > { %4950 = vmatpush3.bf16.msra.mxu0 %v2795_v11  ;;  %5645 = vrcp.f32 %v3034_v13 }
0x1221   : > { %4961 = vmatprep.subr.bf16.mxu0 %v6324_v0  ;;  %5647 = vrcp.f32 %v3031_v6 }
0x1223   : > { %v2918_v44 = vpop.permute.xlu0 %2917  ;;  %v3041_v23 = vpop.permute.xlu1 %3040 }
0x1226   : > { %v5638_v12 = vpop.eup %5637 }
0x1227   : > { %v5640_v14 = vpop.eup %5639  ;;  %v2789_v15 = vmul.f32 %v5638_v12, %v5632_v58 }
0x1228   : > { %v2791_v16 = vmul.f32 %v5640_v14, %v5634_v61  ;;  %v5642_v17 = vpop.eup %5641 }
0x1229   : > { %v5644_v45 = vpop.eup %5643  ;;  %v2915_v19 = vmul.f32 %v5642_v17, %v5630_v57 }
0x122a   : > { %v2792_v18 = vpack.c.bf16 %v2791_v16, %v2789_v15  ;;  %v2913_v20 = vmul.f32 %v5644_v45, %v5626_v54  ;;  %v5646_v22 = vpop.eup %5645 }
0x122b   : > { %v5648_v24 = vpop.eup %5647  ;;  %v3038_v25 = vmul.f32 %v5646_v22, %v5636_v35 }
0x122c   : > { %4952 = vmatmul.mubr.msk.bf16.vlgmr.msra.gmra.mrb[40].mxu0 %vm1445_vm5, %v2792_v18  ;;  %v2916_v21 = vpack.c.bf16 %v2915_v19, %v2913_v20  ;;  %v3036_v26 = vmul.f32 %v5648_v24, %v5628_v56  ;;  %v5519_v20 = vld [vmem:[#allocation16 + $0x40] sm:$0xff]  }
0x122d   : > { %4962 = vmatpush3.bf16.msra.mxu0 %v2918_v44  ;;  %4963 = vmatprep.mubr.msk.bf16.mxu0 %vm6325_vm1, %v6324_v0 }
0x122e   : > { %4973 = vmatprep.subr.bf16.mxu0 %v6324_v0  ;;  %v3039_v27 = vpack.c.bf16 %v3038_v25, %v3036_v26 }
0x1234   : > { %4964 = vmatmul.mubr.msk.bf16.vlgmr.msra.gmra.mrb[44].mxu0 %vm1445_vm5, %v2916_v21 }
0x1235   : > { %4974 = vmatpush3.bf16.msra.mxu0 %v3041_v23  ;;  %4975 = vmatprep.mubr.msk.bf16.mxu0 %vm6325_vm1, %v6324_v0 }
0x1236   : > { %4999 = vmatprep.subr.bf16.mxu0 %v6324_v0 }
0x123c   : > { %4976 = vmatmul.mubr.msk.bf16.vlgmr.msra.gmra.mrb[48].mxu0 %vm1445_vm5, %v3039_v27 }
0x123d   : > { %5015 = vmatprep.mubr.msk.bf16.mxu0 %vm6325_vm1, %v6324_v0  ;;  %5000 = vmatpush3.bf16.msra.mxu0 %v5519_v20 }
0x123e   : > { %5001 = vmatprep.subr.bf16.mxu0 %v6324_v0 }
0x1241   : > { %5002 = vmatpush3.bf16.msra.mxu0 %v5520_v29  ;;  %v5543_v29 = vld [vmem:[#allocation25 + $0x30] sm:$0xff]  }
0x1242   : > { %5003 = vmatprep.subr.bf16.mxu0 %v6324_v0 }
0x12ff   : > { %v2834_v33 = vpop.f32.mrb[40].mxu0 }
0x1300   : > { %v4953_v36 = vpop.f32.mrb[41].mxu0 }
0x1301   : > { %v2837_v38 = vpop.f32.mrb[42].mxu0  ;;  %v5527_v36 = vld [vmem:[#allocation19 + $0x40] sm:$0xff]  }
0x1302   : > { %v5406_v39 = vpack.i.bf16 %v2837_v38, %v2834_v33  ;;  %v4954_v40 = vpop.f32.mrb[43].mxu0  ;;  %v5526_v33 = vld [vmem:[#allocation16 + $0x78] sm:$0xff]  }
0x1303   : > { %v5529_v38 = vld [vmem:[#allocation19 + $0x50] sm:$0xff]   ;;  %v5531_v40 = vld [vmem:[#allocation19 + $0x60] sm:$0xff]  }
0x1304   : > { %5407 = vrot.lane.b32.xlu1 %v5406_v39, %s6330_s8  ;;  %v5530_v39 = vld [vmem:[#allocation19 + $0x58] sm:$0xff]  }
0x1307   : > { %v2957_v42 = vpop.f32.mrb[44].mxu0 }
0x1308   : > { %v4965_v43 = vpop.f32.mrb[45].mxu0 }
0x1309   : > { %v2960_v47 = vpop.f32.mrb[46].mxu0 }
0x130a   : > { %v5411_v51 = vpack.i.bf16 %v2960_v47, %v2957_v42  ;;  %v4966_v53 = vpop.f32.mrb[47].mxu0 }
0x130c   : > { %5412 = vrot.lane.b32.xlu0 %v5411_v51, %s6328_s3  ;;  %s7625_s3 = sld [smem:[#allocation67_spill]] }
0x130f   : > { %v3080_v54 = vpop.f32.mrb[48].mxu0 }
0x1310   : > { %v4977_v8 = vpop.f32.mrb[49].mxu0 }
0x1311   : > { %v3083_v56 = vpop.f32.mrb[50].mxu0 }
0x1312   : > { %v5416_v57 = vpack.i.bf16 %v3083_v56, %v3080_v54  ;;  %v4978_v58 = vpop.f32.mrb[51].mxu0  ;;  %v7313_v54 = vld [vmem:[#allocation14 + $0x4] sm:$0xf] }
0x1314   : > { %5417 = vrot.lane.b32.xlu1 %v5416_v57, %s6329_s2  ;;  %v3261_v57 = vrot.slane %v7313_v54, %v7048_v49  ;;  %v5533_v49 = vld [vmem:[#allocation19 + $0x70] sm:$0xff]   ;;  %s7621_s2 = sld [smem:[#allocation64_spill]] }
0x131a   : > { %s7622_s8 = smov %s7621_s2 }
0x1376   : > { %v5408_v59 = vpop.permute.xlu1 %5407 }
0x1377   : > { %v5410_v61 = vunpack.i.h.bf16 %v5408_v59  ;;  %v5409_v34 = vunpack.i.l.bf16 %v5408_v59 }
0x1379   : > { %v3112_v4 = vsel %vm1395_vm4, %v7241_v5, %v5410_v61  ;;  %v3111_v6 = vsel %vm1395_vm4, %v7239_v2, %v5409_v34  ;;  %v4546_v5 = vld [vmem:[%s7619_s17 + $0x1] ss:$0 sm:$0xff]  ;;  %v3267_v61 = vrot.slane %v7313_v54, %v7054_v52  ;;  %v5535_v52 = vld [vmem:[#allocation22] sm:$0xff]  }
0x137e   : > { %v5413_v60 = vpop.permute.xlu0 %5412 }
0x137f   : > { %v5415_v1 = vunpack.i.h.bf16 %v5413_v60  ;;  %v5414_v35 = vunpack.i.l.bf16 %v5413_v60 }
0x1381   : > { %v3114_v10 = vsel %vm1911_vm6, %v3112_v4, %v5415_v1  ;;  %v3113_v11 = vsel %vm1911_vm6, %v3111_v6, %v5414_v35  ;;  %v5534_v4 = vld [vmem:[#allocation19 + $0x78] sm:$0xff]   ;;  %v5536_v6 = vld [vmem:[#allocation22 + $0x8] sm:$0x7f]  }
0x1386   : > { %v5418_v3 = vpop.permute.xlu1 %5417 }
0x1387   : > { %v5420_v7 = vunpack.i.h.bf16 %v5418_v3  ;;  %v5419_v9 = vunpack.i.l.bf16 %v5418_v3 }
0x1389   : > { %v3116_v12 = vsel %vm1914_vm7, %v3114_v10, %v5420_v7  ;;  %v3115_v13 = vsel %vm1914_vm7, %v3113_v11, %v5419_v9  ;;  %v3571_v7 = vsel %vm3569_vm8, %v5536_v6, 0  ;;  %v3547_v9 = vld [vmem:[%s1050_s15] sm:$0x1]  ;;  %v4555_v11 = vld [vmem:[#allocation17 + $0x1] ss:$0 sm:$0xff] }
0x138a   : > { %v3117_v14 = vpack.c.bf16 %v3116_v12, %v3115_v13  ;;  %v3548_v10 = vpack.c.bf16 %v3547_v9, %v3547_v9 }
0x138c   : > { %4996 = vmatmul.mubr.bf16.vlgmr.msra.gmra.mrb[44].mxu1 %v3117_v14 }
0x138d   : > { %5035 = vmatprep.mubr.msk.bf16.mxu1 %vm6325_vm1, %v6324_v0  ;;  %5020 = vmatpush3.bf16.msra.mxu1 %v5527_v36 }
0x138e   : > { %5021 = vmatprep.subr.bf16.mxu1 %v6324_v0 }
0x1391   : > { %5022 = vmatpush3.bf16.msra.mxu1 %v5528_v37 }
0x1392   : > { %5023 = vmatprep.subr.bf16.mxu1 %v6324_v0 }
0x1395   : > { %5024 = vmatpush3.bf16.msra.mxu1 %v5529_v38 }
0x1396   : > { %5025 = vmatprep.subr.bf16.mxu1 %v6324_v0 }
0x1399   : > { %5026 = vmatpush3.bf16.msra.mxu1 %v5530_v39 }
0x139a   : > { %5027 = vmatprep.subr.bf16.mxu1 %v6324_v0 }
0x139d   : > { %5028 = vmatpush3.bf16.msra.mxu1 %v5531_v40 }
0x139e   : > { %5029 = vmatprep.subr.bf16.mxu1 %v6324_v0 }
0x13a1   : > { %5030 = vmatpush3.bf16.msra.mxu1 %v5532_v41 }
0x13a2   : > { %5031 = vmatprep.subr.bf16.mxu1 %v6324_v0 }
0x13a5   : > { %5032 = vmatpush3.bf16.msra.mxu1 %v5533_v49 }
0x13a6   : > { %5033 = vmatprep.subr.bf16.mxu1 %v6324_v0 }
0x13a9   : > { %5034 = vmatpush3.bf16.msra.mxu1 %v5534_v4 }
0x13aa   : > { %5067 = vmatprep.subr.bf16.mxu1 %v6324_v0 }
0x145f   : > { %v3225_v2 = vpop.f32.mrb[44].mxu1 }
0x1460   : > { %v3226_v15 = vadd.f32 %v4546_v5, %v3225_v2  ;;  %v4997_v16 = vpop.f32.mrb[45].mxu1 }
0x1461   : > { %v3228_v18 = vpop.f32.mrb[46].mxu1 }
0x1462   : > { %v3229_v17 = vadd.f32 %v4546_v5, %v3228_v18  ;;  %v4998_v44 = vpop.f32.mrb[47].mxu1  ;;  %v3234_v45 = vadd.f32 %v3226_v15, %v7189_v62  ;;  %v5521_v62 = vld [vmem:[#allocation16 + $0x50] sm:$0xff]  }
0x1463   : > { %5004 = vmatpush3.bf16.msra.mxu0 %v5521_v62  ;;  %v5537_v44 = vld [vmem:[#allocation25] sm:$0xff]  }
0x1464   : > { %3236 = vadd.xlane.f32.xlu0 %v3234_v45  ;;  %v3235_v19 = vadd.f32 %v3229_v17, %v7191_v63  ;;  %5005 = vmatprep.subr.bf16.mxu0 %v6324_v0  ;;  %v5522_v63 = vld [vmem:[#allocation16 + $0x58] sm:$0xff]  }
0x1466   : > { %3238 = vadd.xlane.f32.xlu1 %v3235_v19 }
0x1467   : > { %5006 = vmatpush3.bf16.msra.mxu0 %v5522_v63  ;;  %v5544_v63 = vld [vmem:[#allocation25 + $0x38] sm:$0xff]  }
0x1468   : > { %5007 = vmatprep.subr.bf16.mxu0 %v6324_v0 }
0x146b   : > { %5008 = vmatpush3.bf16.msra.mxu0 %v5523_v30 }
0x146c   : > { %5009 = vmatprep.subr.bf16.mxu0 %v6324_v0 }
0x146f   : > { %5010 = vmatpush3.bf16.msra.mxu0 %v5524_v31  ;;  %v4564_v31 = vld [vmem:[#allocation20 + $0x1] ss:$0 sm:$0xff] }
0x1470   : > { %5011 = vmatprep.subr.bf16.mxu0 %v6324_v0 }
0x1473   : > { %5012 = vmatpush3.bf16.msra.mxu0 %v5525_v32 }
0x1474   : > { %5013 = vmatprep.subr.bf16.mxu0 %v6324_v0 }
0x1477   : > { %5014 = vmatpush3.bf16.msra.mxu0 %v5526_v33 }
0x1478   : > { %5039 = vmatprep.subr.bf16.mxu0 %v6324_v0 }
0x14f1   : > { %v3237_v21 = vpop.xlane.xlu0 %3236 }
0x14f2   : > { %v3240_v22 = vmul.f32 0.0078125, %v3237_v21 }
0x14f3   : > { %v3239_v23 = vpop.xlane.xlu1 %3238 }
0x14f4   : > { %v3242_v24 = vsub.f32 %v3234_v45, %v3240_v22  ;;  %v3241_v25 = vmul.f32 0.0078125, %v3239_v23  ;;  %v5538_v45 = vld [vmem:[#allocation25 + $0x8] sm:$0xff]   ;;  %v5539_v23 = vld [vmem:[#allocation25 + $0x10] sm:$0xff]  }
0x14f6   : > { %v3243_v26 = vsub.f32 %v3235_v19, %v3241_v25  ;;  %v3244_v27 = vmul.f32 %v3242_v24, %v3242_v24  ;;  %v5541_v25 = vld [vmem:[#allocation25 + $0x20] sm:$0xff]  }
0x14f8   : > { %3246 = vadd.xlane.f32.xlu0 %v3244_v27  ;;  %v3245_v28 = vmul.f32 %v3243_v26, %v3243_v26  ;;  %v3553_v27 = vld [vmem:[#allocation23] sm:$0x1] }
0x14fc   : > { %3248 = vadd.xlane.f32.xlu0 %v3245_v28 }
0x1585   : > { %v3247_v42 = vpop.xlane.xlu0 %3246 }
0x1586   : > { %v3250_v43 = vmul.f32 0.0078125, %v3247_v42 }
0x1588   : > { %v3252_v46 = vadd.f32 1e-05, %v3250_v43 }
0x1589   : > { %v3249_v47 = vpop.xlane.xlu0 %3248 }
0x158a   : > { %5649 = vrsqrt.f32 %v3252_v46  ;;  %v3251_v51 = vmul.f32 0.0078125, %v3249_v47 }
0x158c   : > { %v3253_v53 = vadd.f32 1e-05, %v3251_v51 }
0x158e   : > { %5651 = vrsqrt.f32 %v3253_v53 }
0x1594   : > { %v5650_v8 = vpop.eup %5649 }
0x1595   : > { %v3256_v56 = vmul.f32 %v5650_v8, %v3242_v24  ;;  %v5540_v24 = vld [vmem:[#allocation25 + $0x18] sm:$0xff]  }
0x1597   : > { %v3262_v60 = vmul.f32 %v3261_v57, %v3256_v56 }
0x1598   : > { %v5652_v58 = vpop.eup %5651 }
0x1599   : > { %v3257_v59 = vmul.f32 %v5652_v58, %v3243_v26  ;;  %v7319_v1 = vadd.f32 %v3267_v61, %v3262_v60  ;;  %v5542_v26 = vld [vmem:[#allocation25 + $0x28] sm:$0xff]   ;;  %v5546_v58 = vld [vmem:[%s7621_s2] sm:$0xff]   ;;  %s4616_s2 = sshll.u32 %s7600_s26, 4  ;;  %s6191_s26 = scalar_lea.vmem %s7441_s0, 16 }
0x159a   : > { %v5548_v60 = vld [vmem:[%s7622_s8 + $0x8] sm:$0xff]   ;;  %p6192_p7 = scmp.ne.s32.totalorder %s7441_s0, %s6191_s26 }
0x159b   : > { %v3263_v34 = vmul.f32 %v3261_v57, %v3257_v59  ;;  %v5545_v57 = vld [vmem:[#allocation28] sm:$0xff]   ;;  %v5547_v59 = vld [vmem:[#allocation28 + $0x8] sm:$0xff]  }
0x159c   : > { %p6193_p9 = pnand %p6192_p7, %p7627_p6 }
0x159d   : > { %v7321_v35 = vadd.f32 %v3267_v61, %v3263_v34  ;;  %v5549_v61 = vld [vmem:[#allocation28 + $0x10] sm:$0xff]  }
0x159e   : > { %v5550_v34 = vld [vmem:[%s7622_s8 + $0x10] sm:$0xff]   ;;  %p6194_p12 = pneg %p6193_p9 }
0x159f   : > { %v3270_v3 = vpack.c.bf16 %v7321_v35, %v7319_v1 }
0x15a1   : > { %5016 = vmatmul.mubr.bf16.vlgmr.msra.gmra.mrb[52].mxu0 %v3270_v3  ;;  %v5553_v3 = vld [vmem:[#allocation28 + $0x20] sm:$0xff]  }
0x15a2   : > { %5043 = vmatprep.mubr.msk.bf16.mxu0 %vm6325_vm1, %v6324_v0  ;;  %5040 = vmatpush3.bf16.msra.mxu0 %v5535_v52  ;;  %v5554_v52 = vld [vmem:[%s7622_s8 + $0x20] sm:$0xff]  }
0x15a3   : > { %5041 = vmatprep.subr.bf16.mxu0 %v6324_v0 }
0x15a6   : > { %5042 = vmatpush3.bf16.msra.mxu0 %v3571_v7  ;;  %v5555_v7 = vld [vmem:[#allocation28 + $0x28] sm:$0xff]  }
0x15a7   : > { %5047 = vmatprep.subr.bf16.mxu0 %v6324_v0 }
0x15a9   : > { %5044 = vmatmul.mubr.msk.bf16.vlgmr.msra.gmra.mrb[56].mxu0 %vm3565_vm9, %v3548_v10  ;;  %v5556_v10 = vld [vmem:[%s7622_s8 + $0x28] sm:$0xff]  }
0x15aa   : > { %5063 = vmatprep.mubr.msk.bf16.mxu0 %vm6325_vm1, %v6324_v0  ;;  %5048 = vmatpush3.bf16.msra.mxu0 %v5537_v44  ;;  %v5564_v44 = vld [vmem:[#allocation29 + $0x18] sm:$0xff]  }
0x15ab   : > { %5049 = vmatprep.subr.bf16.mxu0 %v6324_v0 }
0x15ae   : > { %5050 = vmatpush3.bf16.msra.mxu0 %v5538_v45  ;;  %v5565_v45 = vld [vmem:[#allocation29 + $0x20] sm:$0xff]  }
0x15af   : > { %5051 = vmatprep.subr.bf16.mxu0 %v6324_v0 }
0x15b2   : > { %5052 = vmatpush3.bf16.msra.mxu0 %v5539_v23 }
0x15b3   : > { %5053 = vmatprep.subr.bf16.mxu0 %v6324_v0 }
0x15b6   : > { %5054 = vmatpush3.bf16.msra.mxu0 %v5540_v24 }
0x15b7   : > { %5055 = vmatprep.subr.bf16.mxu0 %v6324_v0 }
0x15ba   : > { %5056 = vmatpush3.bf16.msra.mxu0 %v5541_v25 }
0x15bb   : > { %5057 = vmatprep.subr.bf16.mxu0 %v6324_v0 }
0x15be   : > { %5058 = vmatpush3.bf16.msra.mxu0 %v5542_v26  ;;  %v3529_v26 = vrot.slane %v7313_v54, %v7051_v50 }
0x15bf   : > { %5059 = vmatprep.subr.bf16.mxu0 %v6324_v0 }
0x15c2   : > { %5060 = vmatpush3.bf16.msra.mxu0 %v5543_v29 }
0x15c3   : > { %5061 = vmatprep.subr.bf16.mxu0 %v6324_v0 }
0x15c6   : > { %5062 = vmatpush3.bf16.msra.mxu0 %v5544_v63 }
0x15c7   : > { %5087 = vmatprep.subr.bf16.mxu0 %v6324_v0 }
0x1674   : > { %v3378_v12 = vpop.f32.mrb[52].mxu0 }
0x1675   : > { %v3379_v13 = vadd.f32 %v4555_v11, %v3378_v12  ;;  %v5017_v14 = vpop.f32.mrb[53].mxu0  ;;  %v3631_v12 = vld [vmem:[#allocation26] sm:$0x1] }
0x1676   : > { %v3381_v5 = vpop.f32.mrb[54].mxu0 }
0x1677   : > { %v3382_v2 = vadd.f32 %v4555_v11, %v3381_v5  ;;  %v5018_v15 = vpop.f32.mrb[55].mxu0  ;;  %v3385_v16 = vmax.f32 %v3379_v13, 0.0  ;;  %v5557_v11 = vld [vmem:[#allocation28 + $0x30] sm:$0xff]   ;;  %v5559_v5 = vld [vmem:[#allocation28 + $0x38] sm:$0xff]  }
0x1678   : > { %v5558_v13 = vld [vmem:[%s7622_s8 + $0x30] sm:$0xff]   ;;  %v5560_v15 = vld [vmem:[%s7622_s8 + $0x38] sm:$0xff]  }
0x1679   : > { %v3386_v18 = vmax.f32 %v3382_v2, 0.0 }
0x167b   : > { %v3387_v17 = vpack.c.bf16 %v3386_v18, %v3385_v16  ;;  %v5561_v16 = vld [vmem:[#allocation29] sm:$0xff]   ;;  %v5562_v18 = vld [vmem:[#allocation29 + $0x8] sm:$0xff]  }
0x167c   : > { %v3607_v19 = vpop.f32.mrb[56].mxu0 }
0x167d   : > { %5036 = vmatmul.mubr.bf16.vlgmr.msra.gmra.mrb[48].mxu1 %v3387_v17  ;;  %v5045_v20 = vpop.f32.mrb[57].mxu0  ;;  %v3608_v28 = vadd.f32 %v3607_v19, %v3553_v27  ;;  %v5563_v17 = vld [vmem:[#allocation29 + $0x10] sm:$0xff]   ;;  %v5566_v19 = vld [vmem:[#allocation29 + $0x28] sm:$0xff]  }
0x167e   : > { %5083 = vmatprep.mubr.msk.bf16.mxu1 %vm6325_vm1, %v6324_v0  ;;  %v3610_v21 = vpop.f32.mrb[58].mxu0  ;;  %5068 = vmatpush3.bf16.msra.mxu1 %v5545_v57  ;;  %v5572_v57 = vld [vmem:[#allocation31 + $0x18] sm:$0xff]  }
0x167f   : > { %v5046_v22 = vpop.f32.mrb[59].mxu0  ;;  %v3613_v62 = vmax.f32 %v3608_v28, 0.0  ;;  %5069 = vmatprep.subr.bf16.mxu1 %v6324_v0 }
0x1681   : > { %v3614_v30 = vpack.c.bf16 %v3613_v62, %v3613_v62  ;;  %v3535_v62 = vrot.slane %v7313_v54, %v2328_v55 }
0x1682   : > { %5070 = vmatpush3.bf16.msra.mxu1 %v5547_v59  ;;  %v5574_v59 = vld [vmem:[#allocation31 + $0x28] sm:$0xff]  }
0x1683   : > { %5064 = vmatmul.mubr.bf16.vlgmr.msra.gmra.mrb[60].mxu0 %v3614_v30  ;;  %5071 = vmatprep.subr.bf16.mxu1 %v6324_v0 }
0x1684   : > { %5103 = vmatprep.mubr.msk.bf16.mxu0 %vm6325_vm1, %v6324_v0  ;;  %5088 = vmatpush3.bf16.msra.mxu0 %v5546_v58  ;;  %v5573_v58 = vld [vmem:[#allocation31 + $0x20] sm:$0xff]  }
0x1685   : > { %5089 = vmatprep.subr.bf16.mxu0 %v6324_v0 }
0x1686   : > { %5072 = vmatpush3.bf16.msra.mxu1 %v5549_v61  ;;  %v3930_v61 = vld [vmem:[%s7623_s28] sm:$0x1]  ;;  %s7626_s28 = sld [smem:[#allocation68_spill]] }
0x1687   : > { %5073 = vmatprep.subr.bf16.mxu1 %v6324_v0 }
0x1688   : > { %5090 = vmatpush3.bf16.msra.mxu0 %v5548_v60 }
0x1689   : > { %5091 = vmatprep.subr.bf16.mxu0 %v6324_v0 }
0x168c   : > { %5092 = vmatpush3.bf16.msra.mxu0 %v5550_v34  ;;  %s7439_s4 = scalar_lea.hbm %s7626_s28, %s4616_s2 }
0x168d   : > { %5093 = vmatprep.subr.bf16.mxu0 %v6324_v0 }
0x1750   : > { %v3495_v32 = vpop.f32.mrb[48].mxu1 }
0x1751   : > { %v3496_v33 = vadd.f32 %v4564_v31, %v3495_v32  ;;  %v5037_v36 = vpop.f32.mrb[49].mxu1 }
0x1752   : > { %v3498_v37 = vpop.f32.mrb[50].mxu1 }
0x1753   : > { %v3499_v38 = vadd.f32 %v4564_v31, %v3498_v37  ;;  %v5038_v39 = vpop.f32.mrb[51].mxu1  ;;  %v3502_v40 = vadd.f32 %v3496_v33, %v7319_v1  ;;  %v5551_v1 = vld [vmem:[#allocation28 + $0x18] sm:$0xff]  }
0x1754   : > { %5074 = vmatpush3.bf16.msra.mxu1 %v5551_v1 }
0x1755   : > { %3504 = vadd.xlane.f32.xlu1 %v3502_v40  ;;  %v3503_v41 = vadd.f32 %v3499_v38, %v7321_v35  ;;  %v5552_v35 = vld [vmem:[%s7622_s8 + $0x18] sm:$0xff]   ;;  %5075 = vmatprep.subr.bf16.mxu1 %v6324_v0 }
0x1756   : > { %v3714_v49 = vpop.f32.mrb[60].mxu0  ;;  %5094 = vmatpush3.bf16.msra.mxu0 %v5552_v35 }
0x1757   : > { %3506 = vadd.xlane.f32.xlu0 %v3503_v41  ;;  %v5065_v4 = vpop.f32.mrb[61].mxu0  ;;  %5095 = vmatprep.subr.bf16.mxu0 %v6324_v0  ;;  %v3715_v14 = vadd.f32 %v3714_v49, %v3631_v12 }
0x1758   : > { %v3717_v6 = vpop.f32.mrb[62].mxu0  ;;  %5076 = vmatpush3.bf16.msra.mxu1 %v5553_v3 }
0x1759   : > { %v5066_v9 = vpop.f32.mrb[63].mxu0  ;;  %5077 = vmatprep.subr.bf16.mxu1 %v6324_v0  ;;  %v3737_v2 = vpack.c.bf16 %v3715_v14, %v3715_v14  ;;  %v5575_v6 = vld [vmem:[#allocation31 + $0x30] sm:$0xff]  }
0x175a   : > { %5096 = vmatpush3.bf16.msra.mxu0 %v5554_v52  ;;  %v3950_v9 = vld [vmem:[%s7624_s13] sm:$0x1]  ;;  %s6331_s13 = smov [#allocation32]  }
0x175b   : > { %5097 = vmatprep.subr.bf16.mxu0 %v6324_v0  ;;  %s6195_s15 = sshll.u32 %s6331_s13, 4  ;;  %s6196_s15 = int_to_ptr.vmem [resolvable:$false] %s6195_s15 }
0x175c   : > { %5078 = vmatpush3.bf16.msra.mxu1 %v5555_v7  ;;  %v5576_v7 = vld [vmem:[#allocation31 + $0x38] sm:$0xff]   ;;  %s6197_s25 = scalar_lea.vmem %s6196_s15, 32  ;;  %p6198_p1 = scmp.lt.s32.totalorder %s7441_s0, %s6196_s15 }
0x175d   : > { %5079 = vmatprep.subr.bf16.mxu1 %v6324_v0  ;;  %p6199_p13 = scmp.lt.s32.totalorder %s6197_s25, %s6191_s26 }
0x175e   : > { %5098 = vmatpush3.bf16.msra.mxu0 %v5556_v10 }
0x175f   : > { %5099 = vmatprep.subr.bf16.mxu0 %v6324_v0  ;;  %p6200_p0 = por %p6199_p13, %p6198_p1 }
0x1760   : > { %5080 = vmatpush3.bf16.msra.mxu1 %v5557_v11 }
0x1761   : > { %5081 = vmatprep.subr.bf16.mxu1 %v6324_v0  ;;  %p6201_p2 = pnand %p6200_p0, %p6194_p12 }
0x1762   : > { %5100 = vmatpush3.bf16.msra.mxu0 %v5558_v13 }
0x1763   : > { %5101 = vmatprep.subr.bf16.mxu0 %v6324_v0 }
0x1764   : > { %5082 = vmatpush3.bf16.msra.mxu1 %v5559_v5 }
0x1765   : > { %5107 = vmatprep.subr.bf16.mxu1 %v6324_v0 }
0x1766   : > { %5102 = vmatpush3.bf16.msra.mxu0 %v5560_v15 }
0x1767   : > { %5084 = vmatmul.mubr.bf16.vlgmr.msra.gmra.mrb[52].mxu1 %v3737_v2  ;;  %5127 = vmatprep.subr.bf16.mxu0 %v6324_v0 }
0x1768   : > { %5123 = vmatprep.mubr.msk.bf16.mxu1 %vm6325_vm1, %v6324_v0  ;;  %5108 = vmatpush3.bf16.msra.mxu1 %v5561_v16 }
0x1769   : > { %5109 = vmatprep.subr.bf16.mxu1 %v6324_v0 }
0x176c   : > { %5110 = vmatpush3.bf16.msra.mxu1 %v5562_v18 }
0x176d   : > { %5111 = vmatprep.subr.bf16.mxu1 %v6324_v0 }
0x1770   : > { %5112 = vmatpush3.bf16.msra.mxu1 %v5563_v17 }
0x1771   : > { %5113 = vmatprep.subr.bf16.mxu1 %v6324_v0 }
0x1774   : > { %5114 = vmatpush3.bf16.msra.mxu1 %v5564_v44 }
0x1775   : > { %5115 = vmatprep.subr.bf16.mxu1 %v6324_v0 }
0x1778   : > { %5116 = vmatpush3.bf16.msra.mxu1 %v5565_v45 }
0x1779   : > { %5117 = vmatprep.subr.bf16.mxu1 %v6324_v0 }
0x177c   : > { %5118 = vmatpush3.bf16.msra.mxu1 %v5566_v19 }
0x177d   : > { %5119 = vmatprep.subr.bf16.mxu1 %v6324_v0 }
0x17e2   : > { %v3505_v42 = vpop.xlane.xlu1 %3504 }
0x17e3   : > { %v3508_v43 = vmul.f32 0.0078125, %v3505_v42 }
0x17e4   : > { %v3507_v46 = vpop.xlane.xlu0 %3506 }
0x17e5   : > { %v7352_v47 = vsub.f32 %v3502_v40, %v3508_v43  ;;  %v3509_v51 = vmul.f32 0.0078125, %v3507_v46  ;;  %v5567_v46 = vld [vmem:[#allocation29 + $0x30] sm:$0xff]  }
0x17e6   : > { %5120 = vmatpush3.bf16.msra.mxu1 %v5567_v46 }
0x17e7   : > { %v7354_v53 = vsub.f32 %v3503_v41, %v3509_v51  ;;  %v3512_v8 = vmul.f32 %v7352_v47, %v7352_v47  ;;  %5121 = vmatprep.subr.bf16.mxu1 %v6324_v0  ;;  %v5568_v51 = vld [vmem:[#allocation29 + $0x38] sm:$0xff]  }
0x17e9   : > { %3514 = vadd.xlane.f32.xlu1 %v3512_v8  ;;  %v3513_v56 = vmul.f32 %v7354_v53, %v7354_v53  ;;  %v5570_v8 = vld [vmem:[#allocation31 + $0x8] sm:$0xff]  }
0x17ea   : > { %5122 = vmatpush3.bf16.msra.mxu1 %v5568_v51 }
0x17eb   : > { %3516 = vadd.xlane.f32.xlu0 %v3513_v56  ;;  %v5571_v56 = vld [vmem:[#allocation31 + $0x10] sm:$0xff]  }
0x183a   : > { %v3836_v48 = vpop.f32.mrb[52].mxu1 }
0x183b   : > { %v5085_v55 = vpop.f32.mrb[53].mxu1 }
0x183c   : > { %v3839_v54 = vpop.f32.mrb[54].mxu1 }
0x1876   : > { %v3515_v20 = vpop.xlane.xlu1 %3514 }
0x1877   : > { %v3518_v21 = vmul.f32 0.0078125, %v3515_v20 }
0x1878   : > { %v3517_v22 = vpop.xlane.xlu0 %3516 }
0x1879   : > { %v3520_v23 = vadd.f32 1e-05, %v3518_v21  ;;  %v3519_v24 = vmul.f32 0.0078125, %v3517_v22 }
0x187b   : > { %5653 = vrsqrt.f32 %v3520_v23  ;;  %v3521_v25 = vadd.f32 1e-05, %v3519_v24 }
0x187d   : > { %5655 = vrsqrt.f32 %v3521_v25 }
0x1885   : > { %v5654_v27 = vpop.eup %5653 }
0x1886   : > { %v3524_v28 = vmul.f32 %v5654_v27, %v7352_v47  ;;  %v5086_v47 = vpop.f32.mrb[55].mxu1 }
0x1887   : > { %v5656_v29 = vpop.eup %5655 }
0x1888   : > { %v3530_v63 = vmul.f32 %v3529_v26, %v3524_v28  ;;  %v3525_v30 = vmul.f32 %v5656_v29, %v7354_v53  ;;  %v5569_v53 = vld [vmem:[#allocation31] sm:$0xff]  }
0x188a   : > { %v3531_v31 = vmul.f32 %v3529_v26, %v3525_v30  ;;  %v3536_v32 = vadd.f32 %v3535_v62, %v3530_v63 }
0x188c   : > { %v3537_v33 = vadd.f32 %v3535_v62, %v3531_v31 }
0x188e   : > { %v3538_v36 = vadd.f32 %v3537_v33, %v3536_v32 }
0x1890   : > { %v3539_v37 = vrot.slane %v3538_v36, 4 }
0x1892   : > { %v3540_v38 = vadd.f32 %v3539_v37, %v3538_v36 }
0x1894   : > { %v3541_v39 = vrot.slane %v3540_v38, 2 }
0x1896   : > { %v3542_v40 = vadd.f32 %v3541_v39, %v3540_v38 }
0x1898   : > { %v3543_v50 = vrot.slane %v3542_v40, 1 }
0x189a   : > { %v3544_v41 = vadd.f32 %v3543_v50, %v3542_v40 }
0x189c   : > { %v3546_v42 = vmul.f32 0.0625, %v3544_v41 }
0x189e   : > { %v3720_v43 = vpack.c.bf16 %v3546_v42, %v3546_v42 }
0x18a0   : > { %5104 = vmatmul.mubr.bf16.vlgmr.msra.gmra.mrb[64].mxu0 %v3720_v43 }
0x18a1   : > { %5143 = vmatprep.mubr.msk.bf16.mxu0 %vm6325_vm1, %v6324_v0  ;;  %5128 = vmatpush3.bf16.msra.mxu0 %v5569_v53 }
0x18a2   : > { %5129 = vmatprep.subr.bf16.mxu0 %v6324_v0 }
0x18a5   : > { %5130 = vmatpush3.bf16.msra.mxu0 %v5570_v8 }
0x18a6   : > { %5131 = vmatprep.subr.bf16.mxu0 %v6324_v0 }
0x18a9   : > { %5132 = vmatpush3.bf16.msra.mxu0 %v5571_v56 }
0x18aa   : > { %5133 = vmatprep.subr.bf16.mxu0 %v6324_v0 }
0x18ad   : > { %5134 = vmatpush3.bf16.msra.mxu0 %v5572_v57 }
0x18ae   : > { %5135 = vmatprep.subr.bf16.mxu0 %v6324_v0 }
0x18b1   : > { %5136 = vmatpush3.bf16.msra.mxu0 %v5573_v58 }
0x18b2   : > { %5137 = vmatprep.subr.bf16.mxu0 %v6324_v0 }
0x18b5   : > { %5138 = vmatpush3.bf16.msra.mxu0 %v5574_v59 }
0x18b6   : > { %5139 = vmatprep.subr.bf16.mxu0 %v6324_v0 }
0x18b9   : > { %5140 = vmatpush3.bf16.msra.mxu0 %v5575_v6 }
0x18ba   : > { %5141 = vmatprep.subr.bf16.mxu0 %v6324_v0  ;;  %v4057_v0 = vld [vmem:[%s7625_s3] sm:$0x1] }
0x18bd   : > { %5142 = vmatpush3.bf16.msra.mxu0 %v5576_v7 }
0x1973   : > { %v3924_v60 = vpop.f32.mrb[64].mxu0 }
0x1974   : > { %v3925_v34 = vadd.f32 %v3924_v60, %v3836_v48  ;;  %v5105_v1 = vpop.f32.mrb[65].mxu0 }
0x1975   : > { %v3927_v35 = vpop.f32.mrb[66].mxu0 }
0x1976   : > { %v3931_v3 = vadd.f32 %v3930_v61, %v3925_v34  ;;  %v5106_v49 = vpop.f32.mrb[67].mxu0 }
0x1978   : > { %v3932_v4 = vmax.f32 %v3931_v3, 0.0 }
0x197a   : > { %v3933_v52 = vpack.c.bf16 %v3932_v4, %v3932_v4 }
0x197c   : > { %5124 = vmatmul.mubr.bf16.vlgmr.msra.gmra.mrb[56].mxu1 %v3933_v52 }
0x1a4f   : > { %v4033_v10 = vpop.f32.mrb[56].mxu1 }
0x1a50   : > { %v4034_v11 = vadd.f32 %v4033_v10, %v3950_v9  ;;  %v5125_v12 = vpop.f32.mrb[57].mxu1 }
0x1a51   : > { %v4036_v13 = vpop.f32.mrb[58].mxu1 }
0x1a52   : > { %v4039_v14 = vmax.f32 %v4034_v11, 0.0  ;;  %v5126_v5 = vpop.f32.mrb[59].mxu1 }
0x1a54   : > { %v4040_v2 = vpack.c.bf16 %v4039_v14, %v4039_v14 }
0x1a56   : > { %5144 = vmatmul.mubr.bf16.vlgmr.msra.gmra.mrb[68].mxu0 %v4040_v2 }
0x1b29   : > { %v4140_v15 = vpop.f32.mrb[68].mxu0 }
0x1b2a   : > { %v4141_v16 = vadd.f32 %v4140_v15, %v4057_v0  ;;  %v5145_v18 = vpop.f32.mrb[69].mxu0 }
0x1b2b   : > { %v4143_v17 = vpop.f32.mrb[70].mxu0 }
0x1b2c   : > { %4146 = vst [vmem:[%s1047_s22] sm:$0x1] %v4141_v16  ;;  %v5146_v44 = vpop.f32.mrb[71].mxu0 }
0x1b2d   : > { %6204 = shalt.err (!%p6201_p2)
}
0x1b2e   : > { %s6205_s6 = scalar_lea.hbm %s7439_s4, 16  ;;  %s6209_s22 = scalar_lea.hbm %s7626_s28, 32 }
0x1b2f   : > { %p6206_p8 = scmp.ne.s32.totalorder %s7439_s4, %s6205_s6  ;;  %p6210_p11 = scmp.lt.u32.totalorder %s7439_s4, %s7626_s28 }
0x1b30   : > { %p6211_p3 = scmp.lt.u32.totalorder %s6209_s22, %s6205_s6  ;;  %p6213_p7 = scmp.lt.u32.totalorder %s6205_s6, %s7439_s4 }
0x1b31   : > { %p6207_p4 = pnand %p6206_p8, %p7627_p6 }
0x1b32   : > { %p6212_p5 = por %p6211_p3, %p6210_p11 }
0x1b33   : > { %p6208_p10 = pneg %p6207_p4 }
0x1b34   : > { %p6214_p9 = por %p6213_p7, %p6212_p5 }
0x1b36   : > { %p6215_p12 = pnand %p6214_p9, %p6208_p10 }
0x1b38   : > { %6218 = shalt.err (!%p6215_p12)
}
0x1b39   : > { %5221 = dma.vmem_to_hbm [thread:$0]  (%p7627_p6), %s7441_s0, 16, %s7439_s4, %s4148_s7  }
0x1b3a PF: > { %s7628_s26 = sld [smem:[#allocation44_spill]]  ;;  %s7629_s13 = sld [smem:[#allocation47_spill]] }
0x1b3b   : > { %p7630_p1 = scmp.ne.s32.totalorder %s7592_s11, 0 }
0x1b40   : > { %s4172_s15 = sand.u32 1, %s7628_s26   ;;  %p7631_p13 = scmp.ge.s32.totalorder %s7629_s13, 2 }
0x1b41   : > { %s4173_s25 = scalar_lea.sflag [#allocation4], %s4172_s15 }
0x1b42   : > { %p5283_p0 = pnand %p7631_p13, %p7630_p1 }
0x1b44   : > { %6276 = dma.done.wait (!%p5283_p0), %s4173_s25, 16  }
0x1b45   : > { %6278 = vsyncadd (!%p5283_p0), %s4173_s25, 4294967280  ;;  %s7632_s29 = sld [smem:[#allocation45_spill]]  ;;  %s7633_s2 = sld [smem:[#allocation46_spill]] }
0x1b46   : > { %p47_p2 = scmp.ge.s32.totalorder %s6888_s30, 4   ;;  %s7634_s6 = smov %s6899_s20 }
0x1b48   :  { %49 = sbr.rel (!%p47_p2) target bundleno = 34 (0x22), region = 249 }
0x1b4f   :  { %4177 = vsyncpa [#allocation3], 1 }
0x1b50   :  { %4179 = vsyncpa [#allocation3 + $0x1], 1 }
0x1b51   :  { %4180 = vsyncpa [#allocation6], 1 }
0x1b52   :  { %4181 = vsyncpa [#allocation9], 1 }
0x1b53   :  { %4182 = vsyncpa [#allocation12], 1 }
0x1b54   :  { %4183 = vsyncpa [#allocation15], 1 }
0x1b55   :  { %4184 = vsyncpa [#allocation18], 1 }
0x1b56   :  { %4185 = vsyncpa [#allocation21], 1 }
0x1b57   :  { %4186 = vsyncpa [#allocation24], 1 }
0x1b58   :  { %4187 = vsyncpa [#allocation27], 1 }
0x1b59   :  { %4188 = vsyncpa [#allocation30], 1 }
0x1b5a   :  { %4189 = vsyncpa [#allocation4], 1 }
0x1b5b   :  { %4191 = vsyncpa [#allocation4 + $0x1], 1 }

</bundles_post_ra>
